<compile_context>
chip_gen: v7x
topology: tpu7x:2x2x1
jax: 0.10.0
libtpu: 0.0.40
codegen_flags: <defaults>
</compile_context>

<pallas_src>
import functools
import math

import jax
import jax.numpy as jnp
from jax.experimental import pallas as pl
from jax.experimental.pallas import tpu as pltpu


# ------------------------------ fused kernels ---------------------------------

def _block_body(x_ref, w1_ref, b1_ref, w2_ref, b2_ref, xpad_ref, mid_ref,
                upsample2x, p1, p2, neg_slope):
    """Fused ConvBlock on one batch element; returns the f32 (L_out, Cout) activation."""
    L_in = x_ref.shape[1]
    K1, _, Cmid = w1_ref.shape
    K2, _, Cout = w2_ref.shape
    L_up = 2 * L_in if upsample2x else L_in
    L_pad1 = L_up + 2 * p1
    L_mid = L_pad1 - K1 + 1
    L_pad2 = L_mid + 2 * p2
    L_out = L_pad2 - K2 + 1

    # Stage 0: zero-padded (optionally 2x nearest-upsampled) input lives in a VMEM
    # scratch (bf16 for the MXU) -- replaces the wrapper-side jnp.pad / jnp.repeat.
    xpad_ref[...] = jnp.zeros_like(xpad_ref)
    x = x_ref[0].astype(xpad_ref.dtype)                      # (L_in, Cin)
    if upsample2x:
        for j in range(L_in):                                # static unroll; L_in tiny
            row = x[j:j + 1, :]
            xpad_ref[p1 + 2 * j:p1 + 2 * j + 1, :] = row
            xpad_ref[p1 + 2 * j + 1:p1 + 2 * j + 2, :] = row
    else:
        xpad_ref[p1:p1 + L_in, :] = x

    # Stage 1: conv1 (bf16 x bf16 -> f32 acc) + bias + LeakyReLU, kept in VMEM.
    xp = xpad_ref[...]
    acc = jnp.zeros((L_mid, Cmid), jnp.float32)
    for k in range(K1):                                      # static unroll over taps
        acc += jnp.dot(xp[k:k + L_mid, :], w1_ref[k],
                       preferred_element_type=jnp.float32)
    acc = acc + b1_ref[...]
    acc = jnp.where(acc > 0, acc, neg_slope * acc)           # f32 elementwise (v5e-safe)

    mid_ref[...] = jnp.zeros_like(mid_ref)                   # zero-padded mid activation
    mid_ref[p2:p2 + L_mid, :] = acc.astype(mid_ref.dtype)

    # Stage 2: conv2 + bias + LeakyReLU.
    m = mid_ref[...]
    acc2 = jnp.zeros((L_out, Cout), jnp.float32)
    for k in range(K2):
        acc2 += jnp.dot(m[k:k + L_out, :], w2_ref[k],
                        preferred_element_type=jnp.float32)
    acc2 = acc2 + b2_ref[...]
    return jnp.where(acc2 > 0, acc2, neg_slope * acc2)       # (L_out, Cout) f32


def _block_kernel(x_ref, w1_ref, b1_ref, w2_ref, b2_ref, o_ref, xpad_ref, mid_ref,
                  *, upsample2x, p1, p2, neg_slope):
    act = _block_body(x_ref, w1_ref, b1_ref, w2_ref, b2_ref, xpad_ref, mid_ref,
                      upsample2x, p1, p2, neg_slope)
    o_ref[...] = act[None].astype(o_ref.dtype)


def _block_ecg_kernel(x_ref, w1_ref, b1_ref, w2_ref, b2_ref,
                      wec_ref, bec_ref, wep_ref, bep_ref,
                      o_ref, xpad_ref, mid_ref,
                      *, upsample2x, p1, p2, neg_slope, alpha):
    """ConvBlock + to_ecg[i] + to_ecg[i-1](upsample) + alpha blend, one kernel."""
    act = _block_body(x_ref, w1_ref, b1_ref, w2_ref, b2_ref, xpad_ref, mid_ref,
                      upsample2x, p1, p2, neg_slope)
    # to_ecg[i] on the block output (1x1 conv == plain matmul); kept fully in f32.
    cur = jnp.dot(act, wec_ref[0], preferred_element_type=jnp.float32) + bec_ref[...]
    # to_ecg[i-1] on the 2x-upsampled ORIGINAL input: a 1x1 conv commutes with nearest
    # upsampling, so evaluate it at the original length and duplicate rows while
    # blending (the 512-channel upsample is never materialized).
    prev = jnp.dot(x_ref[0], wep_ref[0],
                   preferred_element_type=jnp.float32) + bep_ref[...]
    L_in = x_ref.shape[1]
    for j in range(L_in):                                    # static unroll; L_in tiny
        pj = (1.0 - alpha) * prev[j:j + 1, :]
        o_ref[:, 2 * j:2 * j + 1, :] = (
            pj + alpha * cur[2 * j:2 * j + 1, :])[None].astype(o_ref.dtype)
        o_ref[:, 2 * j + 1:2 * j + 2, :] = (
            pj + alpha * cur[2 * j + 1:2 * j + 2, :])[None].astype(o_ref.dtype)


def fused_conv_block(x, blk_params, cfg, *, upsample2x, ecg=None, neg_slope=0.2):
    """x: (N, L_in, Cin) f32.

    ecg is None                -> returns the (N, L_out, Cout) f32 feature map.
    ecg = (wc, bc, wp, bp, a)  -> additionally applies to_ecg[i], to_ecg[i-1](upsample)
                                  and the alpha blend; returns the (N, L_out, 3) ECG.
    """
    N, L_in, Cin_x = x.shape
    _, _, k1, p1, k2, p2 = cfg
    w1, b1, w2, b2 = blk_params
    K1, Cin, Cmid = w1.shape
    K2, _, Cout = w2.shape
    assert Cin_x == Cin, (Cin_x, Cin)
    L_up = 2 * L_in if upsample2x else L_in
    L_pad1 = L_up + 2 * p1
    L_mid = L_pad1 - K1 + 1
    L_pad2 = L_mid + 2 * p2
    L_out = L_pad2 - K2 + 1

    in_specs = [
        pl.BlockSpec((1, L_in, Cin), lambda n: (n, 0, 0)),
        pl.BlockSpec((K1, Cin, Cmid), lambda n: (0, 0, 0)),   # weights: fetched once
        pl.BlockSpec((1, Cmid), lambda n: (0, 0)),
        pl.BlockSpec((K2, Cmid, Cout), lambda n: (0, 0, 0)),
        pl.BlockSpec((1, Cout), lambda n: (0, 0)),
    ]
    args = [x, w1, b1, w2, b2]
    scratch = [pltpu.VMEM((L_pad1, Cin), jnp.bfloat16),       # padded/upsampled input
               pltpu.VMEM((L_pad2, Cmid), jnp.bfloat16)]      # padded mid activation

    if ecg is None:
        kern = functools.partial(_block_kernel, upsample2x=upsample2x,
                                 p1=p1, p2=p2, neg_slope=neg_slope)
        c_out = Cout
    else:
        wc, bc, wp, bp, alpha = ecg
        assert L_out == 2 * L_in, "blend path requires matching ECG lengths"
        cprev = wp.shape[1]
        in_specs += [
            pl.BlockSpec((1, Cout, N_LEADS), lambda n: (0, 0, 0)),
            pl.BlockSpec((1, N_LEADS), lambda n: (0, 0)),
            pl.BlockSpec((1, cprev, N_LEADS), lambda n: (0, 0, 0)),
            pl.BlockSpec((1, N_LEADS), lambda n: (0, 0)),
        ]
        args += [wc, bc, wp, bp]
        kern = functools.partial(_block_ecg_kernel, upsample2x=upsample2x,
                                 p1=p1, p2=p2, neg_slope=neg_slope,
                                 alpha=float(alpha))
        c_out = N_LEADS

    return pl.pallas_call(
        kern,
        out_shape=jax.ShapeDtypeStruct((N, L_out, c_out), jnp.float32),
        grid=(N,),
        in_specs=in_specs,
        out_specs=pl.BlockSpec((1, L_out, c_out), lambda n: (n, 0, 0)),
        scratch_shapes=scratch,
        compiler_params=pltpu.CompilerParams(dimension_semantics=("parallel",)),
    )(*args)


# -------------------------- parameters / model glue ---------------------------

# (in_ch, out_ch, k1, pad1, k2, pad2) per ConvBlock.
# TODO(synk): original ConvBlock(512,512,3,1) calls omit kernel_size2/padding2
# (would TypeError in PyTorch); assume the symmetric (3, 1) second conv.
BLOCK_CFG = [
    (512, 512, 4, 3, 3, 1),
    (512, 512, 3, 1, 3, 1),
    (512, 512, 3, 1, 3, 1),
    (512, 512, 3, 1, 3, 1),
    (512, 256, 3, 1, 3, 1),
    (256, 128, 3, 1, 3, 1),
]
N_LEADS = 3
TO_ECG_IN = [512, 512, 512, 512, 256, 128]


def _init_conv(key, cin, cout, k, w_dtype=jnp.float32):
    """Deterministic PyTorch-like Conv1d init (uniform(+-1/sqrt(fan_in)))."""
    kw, kb = jax.random.split(key)
    bound = 1.0 / math.sqrt(cin * k)
    w = jax.random.uniform(kw, (k, cin, cout), jnp.float32, -bound, bound).astype(w_dtype)
    b = jax.random.uniform(kb, (1, cout), jnp.float32, -bound, bound)
    return w, b


def init_generator_params(key):
    # TODO(synk): self.label_embed is touched in __init__ but never defined nor used
    # in forward(); omitted.
    params = {"progression": [], "to_ecg": []}
    for (cin, cout, k1, p1, k2, p2) in BLOCK_CFG:
        key, ka, kb = jax.random.split(key, 3)
        # bf16 conv weights: half the weight DMA + native bf16 MXU; acc stays f32.
        w1, b1 = _init_conv(ka, cin, cout, k1, jnp.bfloat16)
        w2, b2 = _init_conv(kb, cout, cout, k2, jnp.bfloat16)
        params["progression"].append((w1, b1, w2, b2))
    for cin in TO_ECG_IN:
        key, kc = jax.random.split(key)
        params["to_ecg"].append(_init_conv(kc, cin, N_LEADS, 1))   # f32 ECG path
    return params


def generator_forward(params, input_ncl, step=0, alpha=-1.0):
    """Mirrors Generator.forward. input_ncl: (N, C=512, L); returns NCL."""
    x = jnp.transpose(input_ncl, (0, 2, 1))          # NCL -> NLC (channels on lanes)
    n_blocks = len(BLOCK_CFG)
    out = None
    for i in range(n_blocks):
        if i > 0 and step > 0:
            # Blocks 0..step-1 recompute `out` from the raw input and are overwritten
            # before any use in the original loop -> skip the dead compute.
            if i < min(step, n_blocks - 1):
                continue
            if i == step and 0.0 <= alpha < 1.0:
                # Fully fused: ConvBlock + to_ecg[i] + to_ecg[i-1](upsample) + blend
                # in a single pallas_call; ECG comes back channels-last (N, L, 3).
                wc, bc = params["to_ecg"][i]
                wp, bp = params["to_ecg"][i - 1]
                ecg = fused_conv_block(x, params["progression"][i], BLOCK_CFG[i],
                                       upsample2x=True, ecg=(wc, bc, wp, bp, alpha))
                return jnp.transpose(ecg, (0, 2, 1))  # tiny (N, L, 3) -> NCL
            out = fused_conv_block(x, params["progression"][i], BLOCK_CFG[i],
                                   upsample2x=True)
        else:
            if step > 0:
                continue   # i == 0 with step > 0: dead (overwritten at i == 1)
            # TODO(synk): original reads undefined `out` at i == 0 (NameError in
            # PyTorch); use the network input there, as in standard ProGAN.
            src = x if out is None else out
            out = fused_conv_block(src, params["progression"][i], BLOCK_CFG[i],
                                   upsample2x=False)
        if i == step:
            # `current_ecg = to_ecg[i](out)` is computed-and-discarded in the original
            # on this path (pure op) -> skipped.
            break
    return jnp.transpose(out, (0, 2, 1))             # NLC -> NCL


# ----------------------------------- demo -------------------------------------

if __name__ == "__main__":
    key = jax.random.PRNGKey(0)
    k_params, k_x = jax.random.split(key)
    params = init_generator_params(k_params)

    # PyTorch Conv1d layout (N, C, L): ProGAN latent is 512-channel, length-1.
    x = jax.random.normal(k_x, (2, 512, 1), jnp.float32)

    gen = jax.jit(generator_forward, static_argnames=("step", "alpha"))

    # step=0: returns the first ConvBlock's feature map (as the original code does).
    out0 = gen(params, x, step=0, alpha=-1.0)
    # step=1, 0<=alpha<1: exercises in-kernel upsample + to_ecg + alpha-blend path.
    out1 = gen(params, x, step=1, alpha=0.5)

    jax.block_until_ready(out0)
    jax.block_until_ready(out1)
    assert out0.shape == (2, 512, 4), out0.shape
    assert out1.shape == (2, N_LEADS, 2), out1.shape
    assert bool(jnp.all(jnp.isfinite(out0))) and bool(jnp.all(jnp.isfinite(out1)))
    print("KERNEL_OK")
</pallas_src>

<mosaic_0001>
module attributes {stable_mosaic.version = 11 : i64} {
  func.func @_block_kernel(%arg0: i32, %arg1: memref<1x1x512xf32, #tpu.memory_space<vmem>>, %arg2: memref<4x512x512xbf16, #tpu.memory_space<vmem>>, %arg3: memref<1x512xf32, #tpu.memory_space<vmem>>, %arg4: memref<3x512x512xbf16, #tpu.memory_space<vmem>>, %arg5: memref<1x512xf32, #tpu.memory_space<vmem>>, %arg6: memref<1x4x512xf32, #tpu.memory_space<vmem>>, %arg7: memref<7x512xbf16, #tpu.memory_space<vmem>>, %arg8: memref<6x512xbf16, #tpu.memory_space<vmem>>) attributes {dimension_semantics = [#tpu.dimension_semantics<parallel>], iteration_bounds = array<i64: 2>, scalar_prefetch = 0 : i64, scratch_operands = 2 : i64, tpu.core_type = #tpu.core_type<tc>, window_params = [{transform_indices = @transform_0, window_bounds = array<i64: 1, 1, 512>}, {pipeline_mode = #tpu.pipeline_mode<synchronous>, transform_indices = @transform_1, window_bounds = array<i64: 4, 512, 512>}, {pipeline_mode = #tpu.pipeline_mode<synchronous>, transform_indices = @transform_2, window_bounds = array<i64: 1, 512>}, {pipeline_mode = #tpu.pipeline_mode<synchronous>, transform_indices = @transform_3, window_bounds = array<i64: 3, 512, 512>}, {pipeline_mode = #tpu.pipeline_mode<synchronous>, transform_indices = @transform_4, window_bounds = array<i64: 1, 512>}, {transform_indices = @transform_5, window_bounds = array<i64: 1, 4, 512>}]} {
    %cst = arith.constant 0.000000e+00 : bf16
    %0 = vector.broadcast %cst : bf16 to vector<7x512xbf16>
    %c0 = arith.constant 0 : index
    %c0_0 = arith.constant 0 : index
    %1 = vector.load %arg7[%c0, %c0_0] : memref<7x512xbf16, #tpu.memory_space<vmem>>, vector<7x512xbf16>
    tpu.vector_store %arg7[%c0, %c0_0], %0 {strides = array<i32>} : memref<7x512xbf16, #tpu.memory_space<vmem>>, vector<7x512xbf16>,
    %c0_1 = arith.constant 0 : index
    %c0_2 = arith.constant 0 : index
    %c0_3 = arith.constant 0 : index
    %2 = vector.load %arg1[%c0_1, %c0_2, %c0_3] : memref<1x1x512xf32, #tpu.memory_space<vmem>>, vector<1x1x512xf32>
    %3 = vector.shape_cast %2 : vector<1x1x512xf32> to vector<1x512xf32>
    %4 = arith.truncf %3 : vector<1x512xf32> to vector<1x512xbf16>
    %c3 = arith.constant 3 : index
    %c0_4 = arith.constant 0 : index
    %5 = vector.load %arg7[%c3, %c0_4] : memref<7x512xbf16, #tpu.memory_space<vmem>>, vector<1x512xbf16>
    tpu.vector_store %arg7[%c3, %c0_4], %4 {strides = array<i32>} : memref<7x512xbf16, #tpu.memory_space<vmem>>, vector<1x512xbf16>,
    %c0_5 = arith.constant 0 : index
    %c0_6 = arith.constant 0 : index
    %6 = vector.load %arg7[%c0_5, %c0_6] : memref<7x512xbf16, #tpu.memory_space<vmem>>, vector<7x512xbf16>
    %cst_7 = arith.constant 0.000000e+00 : f32
    %7 = vector.broadcast %cst_7 : f32 to vector<4x512xf32>
    %8 = vector.extract_strided_slice %6 {offsets = [0, 0], sizes = [4, 512], strides = [1, 1]} : vector<7x512xbf16> to vector<4x512xbf16>
    %c0_8 = arith.constant 0 : index
    %c0_9 = arith.constant 0 : index
    %c0_10 = arith.constant 0 : index
    %9 = vector.load %arg2[%c0_8, %c0_9, %c0_10] : memref<4x512x512xbf16, #tpu.memory_space<vmem>>, vector<1x512x512xbf16>
    %10 = vector.shape_cast %9 : vector<1x512x512xbf16> to vector<512x512xbf16>
    %cst_11 = arith.constant dense<0.000000e+00> : vector<4x512xf32>
    %11 = tpu.matmul %8, %10, %cst_11 {dimension_numbers = #tpu.dot_dimension_numbers<[1], [0], [0], [1], [0, 0, 1, 1], [], []>} : vector<4x512xbf16>, vector<512x512xbf16>, vector<4x512xf32> -> vector<4x512xf32>
    %12 = arith.addf %7, %11 : vector<4x512xf32>
    %13 = vector.extract_strided_slice %6 {offsets = [1, 0], sizes = [4, 512], strides = [1, 1]} : vector<7x512xbf16> to vector<4x512xbf16>
    %c1 = arith.constant 1 : index
    %c0_12 = arith.constant 0 : index
    %c0_13 = arith.constant 0 : index
    %14 = vector.load %arg2[%c1, %c0_12, %c0_13] : memref<4x512x512xbf16, #tpu.memory_space<vmem>>, vector<1x512x512xbf16>
    %15 = vector.shape_cast %14 : vector<1x512x512xbf16> to vector<512x512xbf16>
    %cst_14 = arith.constant dense<0.000000e+00> : vector<4x512xf32>
    %16 = tpu.matmul %13, %15, %cst_14 {dimension_numbers = #tpu.dot_dimension_numbers<[1], [0], [0], [1], [0, 0, 1, 1], [], []>} : vector<4x512xbf16>, vector<512x512xbf16>, vector<4x512xf32> -> vector<4x512xf32>
    %17 = arith.addf %12, %16 : vector<4x512xf32>
    %18 = vector.extract_strided_slice %6 {offsets = [2, 0], sizes = [4, 512], strides = [1, 1]} : vector<7x512xbf16> to vector<4x512xbf16>
    %c2 = arith.constant 2 : index
    %c0_15 = arith.constant 0 : index
    %c0_16 = arith.constant 0 : index
    %19 = vector.load %arg2[%c2, %c0_15, %c0_16] : memref<4x512x512xbf16, #tpu.memory_space<vmem>>, vector<1x512x512xbf16>
    %20 = vector.shape_cast %19 : vector<1x512x512xbf16> to vector<512x512xbf16>
    %cst_17 = arith.constant dense<0.000000e+00> : vector<4x512xf32>
    %21 = tpu.matmul %18, %20, %cst_17 {dimension_numbers = #tpu.dot_dimension_numbers<[1], [0], [0], [1], [0, 0, 1, 1], [], []>} : vector<4x512xbf16>, vector<512x512xbf16>, vector<4x512xf32> -> vector<4x512xf32>
    %22 = arith.addf %17, %21 : vector<4x512xf32>
    %23 = vector.extract_strided_slice %6 {offsets = [3, 0], sizes = [4, 512], strides = [1, 1]} : vector<7x512xbf16> to vector<4x512xbf16>
    %c3_18 = arith.constant 3 : index
    %c0_19 = arith.constant 0 : index
    %c0_20 = arith.constant 0 : index
    %24 = vector.load %arg2[%c3_18, %c0_19, %c0_20] : memref<4x512x512xbf16, #tpu.memory_space<vmem>>, vector<1x512x512xbf16>
    %25 = vector.shape_cast %24 : vector<1x512x512xbf16> to vector<512x512xbf16>
    %cst_21 = arith.constant dense<0.000000e+00> : vector<4x512xf32>
    %26 = tpu.matmul %23, %25, %cst_21 {dimension_numbers = #tpu.dot_dimension_numbers<[1], [0], [0], [1], [0, 0, 1, 1], [], []>} : vector<4x512xbf16>, vector<512x512xbf16>, vector<4x512xf32> -> vector<4x512xf32>
    %27 = arith.addf %22, %26 : vector<4x512xf32>
    %c0_22 = arith.constant 0 : index
    %c0_23 = arith.constant 0 : index
    %28 = vector.load %arg3[%c0_22, %c0_23] : memref<1x512xf32, #tpu.memory_space<vmem>>, vector<1x512xf32>
    %29 = vector.broadcast %28 : vector<1x512xf32> to vector<4x512xf32>
    %30 = arith.addf %27, %29 : vector<4x512xf32>
    %cst_24 = arith.constant 0.000000e+00 : f32
    %31 = vector.broadcast %cst_24 : f32 to vector<4x512xf32>
    %32 = arith.cmpf ogt, %30, %31 : vector<4x512xf32>
    %cst_25 = arith.constant 2.000000e-01 : f32
    %33 = vector.broadcast %cst_25 : f32 to vector<4x512xf32>
    %34 = arith.mulf %33, %30 : vector<4x512xf32>
    %35 = arith.select %32, %30, %34 : vector<4x512xi1>, vector<4x512xf32>
    %cst_26 = arith.constant 0.000000e+00 : bf16
    %36 = vector.broadcast %cst_26 : bf16 to vector<6x512xbf16>
    %c0_27 = arith.constant 0 : index
    %c0_28 = arith.constant 0 : index
    %37 = vector.load %arg8[%c0_27, %c0_28] : memref<6x512xbf16, #tpu.memory_space<vmem>>, vector<6x512xbf16>
    tpu.vector_store %arg8[%c0_27, %c0_28], %36 {strides = array<i32>} : memref<6x512xbf16, #tpu.memory_space<vmem>>, vector<6x512xbf16>,
    %38 = arith.truncf %35 : vector<4x512xf32> to vector<4x512xbf16>
    %c1_29 = arith.constant 1 : index
    %c0_30 = arith.constant 0 : index
    %39 = vector.load %arg8[%c1_29, %c0_30] : memref<6x512xbf16, #tpu.memory_space<vmem>>, vector<4x512xbf16>
    tpu.vector_store %arg8[%c1_29, %c0_30], %38 {strides = array<i32>} : memref<6x512xbf16, #tpu.memory_space<vmem>>, vector<4x512xbf16>,
    %c0_31 = arith.constant 0 : index
    %c0_32 = arith.constant 0 : index
    %40 = vector.load %arg8[%c0_31, %c0_32] : memref<6x512xbf16, #tpu.memory_space<vmem>>, vector<6x512xbf16>
    %cst_33 = arith.constant 0.000000e+00 : f32
    %41 = vector.broadcast %cst_33 : f32 to vector<4x512xf32>
    %42 = vector.extract_strided_slice %40 {offsets = [0, 0], sizes = [4, 512], strides = [1, 1]} : vector<6x512xbf16> to vector<4x512xbf16>
    %c0_34 = arith.constant 0 : index
    %c0_35 = arith.constant 0 : index
    %c0_36 = arith.constant 0 : index
    %43 = vector.load %arg4[%c0_34, %c0_35, %c0_36] : memref<3x512x512xbf16, #tpu.memory_space<vmem>>, vector<1x512x512xbf16>
    %44 = vector.shape_cast %43 : vector<1x512x512xbf16> to vector<512x512xbf16>
    %cst_37 = arith.constant dense<0.000000e+00> : vector<4x512xf32>
    %45 = tpu.matmul %42, %44, %cst_37 {dimension_numbers = #tpu.dot_dimension_numbers<[1], [0], [0], [1], [0, 0, 1, 1], [], []>} : vector<4x512xbf16>, vector<512x512xbf16>, vector<4x512xf32> -> vector<4x512xf32>
    %46 = arith.addf %41, %45 : vector<4x512xf32>
    %47 = vector.extract_strided_slice %40 {offsets = [1, 0], sizes = [4, 512], strides = [1, 1]} : vector<6x512xbf16> to vector<4x512xbf16>
    %c1_38 = arith.constant 1 : index
    %c0_39 = arith.constant 0 : index
    %c0_40 = arith.constant 0 : index
    %48 = vector.load %arg4[%c1_38, %c0_39, %c0_40] : memref<3x512x512xbf16, #tpu.memory_space<vmem>>, vector<1x512x512xbf16>
    %49 = vector.shape_cast %48 : vector<1x512x512xbf16> to vector<512x512xbf16>
    %cst_41 = arith.constant dense<0.000000e+00> : vector<4x512xf32>
    %50 = tpu.matmul %47, %49, %cst_41 {dimension_numbers = #tpu.dot_dimension_numbers<[1], [0], [0], [1], [0, 0, 1, 1], [], []>} : vector<4x512xbf16>, vector<512x512xbf16>, vector<4x512xf32> -> vector<4x512xf32>
    %51 = arith.addf %46, %50 : vector<4x512xf32>
    %52 = vector.extract_strided_slice %40 {offsets = [2, 0], sizes = [4, 512], strides = [1, 1]} : vector<6x512xbf16> to vector<4x512xbf16>
    %c2_42 = arith.constant 2 : index
    %c0_43 = arith.constant 0 : index
    %c0_44 = arith.constant 0 : index
    %53 = vector.load %arg4[%c2_42, %c0_43, %c0_44] : memref<3x512x512xbf16, #tpu.memory_space<vmem>>, vector<1x512x512xbf16>
    %54 = vector.shape_cast %53 : vector<1x512x512xbf16> to vector<512x512xbf16>
    %cst_45 = arith.constant dense<0.000000e+00> : vector<4x512xf32>
    %55 = tpu.matmul %52, %54, %cst_45 {dimension_numbers = #tpu.dot_dimension_numbers<[1], [0], [0], [1], [0, 0, 1, 1], [], []>} : vector<4x512xbf16>, vector<512x512xbf16>, vector<4x512xf32> -> vector<4x512xf32>
    %56 = arith.addf %51, %55 : vector<4x512xf32>
    %c0_46 = arith.constant 0 : index
    %c0_47 = arith.constant 0 : index
    %57 = vector.load %arg5[%c0_46, %c0_47] : memref<1x512xf32, #tpu.memory_space<vmem>>, vector<1x512xf32>
    %58 = vector.broadcast %57 : vector<1x512xf32> to vector<4x512xf32>
    %59 = arith.addf %56, %58 : vector<4x512xf32>
    %cst_48 = arith.constant 0.000000e+00 : f32
    %60 = vector.broadcast %cst_48 : f32 to vector<4x512xf32>
    %61 = arith.cmpf ogt, %59, %60 : vector<4x512xf32>
    %cst_49 = arith.constant 2.000000e-01 : f32
    %62 = vector.broadcast %cst_49 : f32 to vector<4x512xf32>
    %63 = arith.mulf %62, %59 : vector<4x512xf32>
    %64 = arith.select %61, %59, %63 : vector<4x512xi1>, vector<4x512xf32>
    %65 = vector.shape_cast %64 : vector<4x512xf32> to vector<1x4x512xf32>
    %c0_50 = arith.constant 0 : index
    %c0_51 = arith.constant 0 : index
    %c0_52 = arith.constant 0 : index
    %66 = vector.load %arg6[%c0_50, %c0_51, %c0_52] : memref<1x4x512xf32, #tpu.memory_space<vmem>>, vector<1x4x512xf32>
    tpu.vector_store %arg6[%c0_50, %c0_51, %c0_52], %65 {strides = array<i32>} : memref<1x4x512xf32, #tpu.memory_space<vmem>>, vector<1x4x512xf32>,
    return
  }
  func.func @transform_0(%arg0: i32) -> (i32, i32, i32) {
    %c0_i32 = arith.constant 0 : i32
    %c0_i32_0 = arith.constant 0 : i32
    %c0_i32_1 = arith.constant 0 : i32
    return %arg0, %c0_i32, %c0_i32_0 : i32, i32, i32
  }
  func.func @transform_1(%arg0: i32) -> (i32, i32, i32) {
    %c0_i32 = arith.constant 0 : i32
    %c0_i32_0 = arith.constant 0 : i32
    %c0_i32_1 = arith.constant 0 : i32
    %c0_i32_2 = arith.constant 0 : i32
    return %c0_i32, %c0_i32_0, %c0_i32_1 : i32, i32, i32
  }
  func.func @transform_2(%arg0: i32) -> (i32, i32) {
    %c0_i32 = arith.constant 0 : i32
    %c0_i32_0 = arith.constant 0 : i32
    %c0_i32_1 = arith.constant 0 : i32
    return %c0_i32, %c0_i32_0 : i32, i32
  }
  func.func @transform_3(%arg0: i32) -> (i32, i32, i32) {
    %c0_i32 = arith.constant 0 : i32
    %c0_i32_0 = arith.constant 0 : i32
    %c0_i32_1 = arith.constant 0 : i32
    %c0_i32_2 = arith.constant 0 : i32
    return %c0_i32, %c0_i32_0, %c0_i32_1 : i32, i32, i32
  }
  func.func @transform_4(%arg0: i32) -> (i32, i32) {
    %c0_i32 = arith.constant 0 : i32
    %c0_i32_0 = arith.constant 0 : i32
    %c0_i32_1 = arith.constant 0 : i32
    return %c0_i32, %c0_i32_0 : i32, i32
  }
  func.func @transform_5(%arg0: i32) -> (i32, i32, i32) {
    %c0_i32 = arith.constant 0 : i32
    %c0_i32_0 = arith.constant 0 : i32
    %c0_i32_1 = arith.constant 0 : i32
    return %arg0, %c0_i32, %c0_i32_0 : i32, i32, i32
  }
}

</mosaic_0001>

<bundles_post_ra>
// kernel: generator_forward.1
= control target key start
LH: loop header
LB: loop body
LE: loop exit
PB: predicated region body
PF: predicated region fallthrough
CT: control target
= control target key end

     0   :  { %10 = vsyncpa [#allocation5], 0  ;;  %s10510_s0 = inlined_call_operand.hbm [shape: f32[2,1,512], index: 0, kind: input, shape index: {}]   ;;  %s10511_s1 = inlined_call_operand.hbm [shape: bf16[4,512,512], index: 1, kind: input, shape index: {}]   ;;  %s10512_s2 = inlined_call_operand.hbm [shape: f32[1,512], index: 2, kind: input, shape index: {}]   ;;  %s10513_s3 = inlined_call_operand.hbm [shape: bf16[3,512,512], index: 3, kind: input, shape index: {}]   ;;  %s10514_s4 = inlined_call_operand.hbm [shape: f32[1,512], index: 4, kind: input, shape index: {}]   ;;  %s10515_s5 = inlined_call_operand.hbm [shape: f32[2,4,512], index: 5, kind: output, shape index: {}]  }
   0x1   :  { %12 = vsyncpa [#allocation5 + $0x1], 0 }
   0x2   :  { %13 = vsyncpa [#allocation8], 0 }
   0x3   :  { %14 = vsyncpa [#allocation11], 0 }
   0x4   :  { %15 = vsyncpa [#allocation6], 0 }
   0x5   :  { %17 = vsyncpa [#allocation6 + $0x1], 0  ;;  %s9926_s18 = smov 0   ;;  %s9928_s19 = smov 0  }
   0x6   :  { %s9930_s20 = smov 0   ;;  %s9932_s21 = smov 0  }
   0x7 LB: > { %s9887_s22 = smov [#allocation7]   ;;  %s9947_s24 = sadd.s32 4294967295, %s9885_s21   ;;  %s9885_s21 = sphi %s9932_s21, %s10551_s21   ;;  %s9881_s20 = sphi %s9930_s20, %s10550_s20   ;;  %s9877_s19 = sphi %s9928_s19, %s10549_s19   ;;  %s9873_s18 = sphi %s9926_s18, %s10548_s18  }
   0x8   : > { %s176_s23 = sshll.u32 %s9887_s22, 4  ;;  %p7292_p0 = scmp.ge.s32.totalorder %s9885_s21, 1  ;;  %s9952_s23 = int_to_ptr.vmem [resolvable:$true] %s176_s23 }
   0x9   : > { %p10516_p1 = scmp.eq.s32.totalorder %s9947_s24, 0  ;;  %p164_p2 = scmp.lt.s32.totalorder %s9885_s21, 3 }
   0xa   : > { %s9888_s26 = smov [#allocation10]   ;;  %s9889_s29 = smov [#allocation9]  }
   0xb   : > { %p9954_p3 = pnand %p7292_p0, %p164_p2  ;;  %s200_s27 = sshll.u32 %s9888_s26, 4  ;;  %s9967_s27 = int_to_ptr.vmem [resolvable:$true] %s200_s27 }
   0xc   : > { %s190_s30 = sshll.u32 %s9889_s29, 4  ;;  %s9669_s8 = scalar_lea.hbm %s10511_s1, 65536  ;;  %s9969_s30 = int_to_ptr.vmem [resolvable:$true] %s190_s30 }
   0xd   : > { %s10519_s25 = scalar_select %p9954_p3, 1, 0 }
   0xe   : > { %p8247_p5 = pneg %p9954_p3  ;;  %p9670_p7 = scmp.ne.s32.totalorder %s10511_s1, %s9669_s8 }
   0xf   : > { %p9676_p11 = scmp.lt.u32.totalorder %s9669_s8, %s10511_s1 }
  0x10   : > { %p9963_p6 = pnand %p8247_p5, %p10516_p1 }
  0x12   : > { %p9979_p8 = pneg %p9963_p6 }
  0x14   : > { %p9672_p9 = pnand %p9979_p8, %p9670_p7 }
  0x16   : > { %p9673_p10 = pneg %p9672_p9 }
  0x18   : > { %p9678_p12 = pnand %p9676_p11, %p9673_p10 }
  0x1a   : > { %9681 = shalt.err (!%p9678_p12)
}
  0x1b   : > { %s9682_s14 = scalar_lea.vmem %s9952_s23, 65536  ;;  %p9690_p5 = scmp.lt.s32.totalorder %s9952_s23, %s9952_s23 }
  0x1c   : > { %p9683_p13 = scmp.ne.s32.totalorder %s9952_s23, %s9682_s14  ;;  %p9691_p4 = scmp.lt.s32.totalorder %s9682_s14, %s9682_s14 }
  0x1e   : > { %p9685_p0 = pnand %p9683_p13, %p9979_p8  ;;  %p9692_p7 = por %p9691_p4, %p9690_p5 }
  0x20   : > { %p9686_p2 = pneg %p9685_p0 }
  0x22   : > { %p9693_p9 = pnand %p9692_p7, %p9686_p2 }
  0x24   : > { %9696 = shalt.err (!%p9693_p9)
}
  0x25   : > { %s9890_s15 = smov 256   ;;  %s9891_s16 = smov 16  }
  0x26   : > { %8250 = dma.hbm_to_vmem [thread:$0]  (!%p9963_p6), %s10511_s1, 65536, %s9952_s23, [#allocation8], %s9890_s15, %s9890_s15, %s9891_s16  }
  0x27   : > { %s9697_s6 = scalar_lea.hbm %s10513_s3, 49152 }
  0x28   : > { %p9698_p4 = scmp.ne.s32.totalorder %s10513_s3, %s9697_s6  ;;  %p9704_p12 = scmp.lt.u32.totalorder %s9697_s6, %s10513_s3 }
  0x2a   : > { %p9700_p10 = pnand %p9698_p4, %p9979_p8 }
  0x2c   : > { %p9701_p11 = pneg %p9700_p10 }
  0x2e   : > { %p9706_p13 = pnand %p9704_p12, %p9701_p11 }
  0x30   : > { %9709 = shalt.err (!%p9706_p13)
}
  0x31   : > { %s9710_s23 = scalar_lea.vmem %s9967_s27, 49152  ;;  %p9718_p7 = scmp.lt.s32.totalorder %s9967_s27, %s9967_s27 }
  0x32   : > { %p9711_p0 = scmp.ne.s32.totalorder %s9967_s27, %s9710_s23  ;;  %p9719_p9 = scmp.lt.s32.totalorder %s9710_s23, %s9710_s23 }
  0x34   : > { %p9713_p2 = pnand %p9711_p0, %p9979_p8  ;;  %p9720_p4 = por %p9719_p9, %p9718_p7 }
  0x36   : > { %p9714_p5 = pneg %p9713_p2 }
  0x38   : > { %p9721_p10 = pnand %p9720_p4, %p9714_p5 }
  0x3a   : > { %9724 = shalt.err (!%p9721_p10)
}
  0x3b   : > { %8256 = dma.hbm_to_vmem [thread:$0]  (!%p9963_p6), %s10513_s3, 49152, %s9967_s27, [#allocation11], %s9890_s15, %s9890_s15, %s9891_s16  }
  0x3c   : > { %s9725_s22 = scalar_lea.hbm %s10512_s2, 64 }
  0x3d   : > { %p9726_p11 = scmp.ne.s32.totalorder %s10512_s2, %s9725_s22  ;;  %p9732_p0 = scmp.lt.u32.totalorder %s9725_s22, %s10512_s2 }
  0x3f   : > { %p9728_p12 = pnand %p9726_p11, %p9979_p8 }
  0x41   : > { %p9729_p13 = pneg %p9728_p12 }
  0x43   : > { %p9734_p2 = pnand %p9732_p0, %p9729_p13 }
  0x45   : > { %9737 = shalt.err (!%p9734_p2)
}
  0x46   : > { %s9738_s27 = scalar_lea.vmem %s9969_s30, 64  ;;  %p9746_p4 = scmp.lt.s32.totalorder %s9969_s30, %s9969_s30 }
  0x47   : > { %p9739_p5 = scmp.ne.s32.totalorder %s9969_s30, %s9738_s27  ;;  %p9747_p10 = scmp.lt.s32.totalorder %s9738_s27, %s9738_s27 }
  0x49   : > { %p9741_p7 = pnand %p9739_p5, %p9979_p8  ;;  %p9748_p11 = por %p9747_p10, %p9746_p4 }
  0x4b   : > { %p9742_p9 = pneg %p9741_p7 }
  0x4d   : > { %p9749_p12 = pnand %p9748_p11, %p9742_p9 }
  0x4f   : > { %9752 = shalt.err (!%p9749_p12)
}
  0x50   : > { %8253 = dma.hbm_to_vmem [thread:$0]  (!%p9963_p6), %s10512_s2, 64, %s9969_s30, [#allocation8]  }
  0x51   : > { %s9892_s8 = smov [#allocation12]   ;;  %s9753_s12 = scalar_lea.hbm %s10514_s4, 64 }
  0x52   : > { %s214_s9 = sshll.u32 %s9892_s8, 4  ;;  %p9754_p13 = scmp.ne.s32.totalorder %s10514_s4, %s9753_s12  ;;  %s215_s9 = int_to_ptr.vmem [resolvable:$true] %s214_s9 }
  0x53   : > { %p9760_p5 = scmp.lt.u32.totalorder %s9753_s12, %s10514_s4 }
  0x54   : > { %p9756_p0 = pnand %p9754_p13, %p9979_p8 }
  0x56   : > { %p9757_p2 = pneg %p9756_p0 }
  0x58   : > { %p9762_p7 = pnand %p9760_p5, %p9757_p2 }
  0x5a   : > { %9765 = shalt.err (!%p9762_p7)
}
  0x5b   : > { %s9766_s30 = scalar_lea.vmem %s215_s9, 64  ;;  %p9774_p11 = scmp.lt.s32.totalorder %s215_s9, %s215_s9 }
  0x5c   : > { %p9767_p9 = scmp.ne.s32.totalorder %s215_s9, %s9766_s30  ;;  %p9775_p12 = scmp.lt.s32.totalorder %s9766_s30, %s9766_s30 }
  0x5e   : > { %p9769_p4 = pnand %p9767_p9, %p9979_p8  ;;  %p9776_p1 = por %p9775_p12, %p9774_p11 }
  0x60   : > { %p9770_p10 = pneg %p9769_p4 }
  0x62   : > { %p9777_p3 = pnand %p9776_p1, %p9770_p10 }
  0x64   : > { %9780 = shalt.err (!%p9777_p3)
}
  0x65   : > { %8259 = dma.hbm_to_vmem [thread:$0]  (!%p9963_p6), %s10514_s4, 64, %s215_s9, [#allocation11]  }
  0x66   : > { %s7291_s11 = sadd.s32 4294967294, %s9885_s21   ;;  %s10066_s28 = sadd.s32 1, %s9885_s21  }
  0x67   : > { %s27_s6 = ssub.s32 %s9885_s21, %s10066_s28  ;;  %s30_s7 = sadd.s32 1, %s9881_s20 }
  0x68   : > { %p28_p1 = scmp.eq.s32.totalorder %s27_s6, 0  ;;  %p37_p3 = scmp.ne.s32.totalorder %s9881_s20, %s9877_s19 }
  0x69   : > { %p38_p8 = scmp.eq.s32.totalorder %s9885_s21, 0  ;;  %p43_p13 = scmp.ne.s32.totalorder %s9877_s19, %s9873_s18 }
  0x6a   : > { %s10077_s27 = scalar_select %p28_p1, %s9881_s20, %s30_s7  }
  0x6b   : > { %p10079_p0 = por %p38_p8, %p37_p3  ;;  %p10523_p2 = scmp.eq.s32.totalorder %s9947_s24, 0 }
  0x6c   : > { %p151_p5 = scmp.eq.s32.totalorder %s9947_s24, 1  ;;  %p157_p7 = scmp.eq.s32.totalorder %s7291_s11, 1 }
  0x6d   : > { %p10085_p6 = por %p10523_p2, %p43_p13  ;;  %p8272_p9 = scmp.lt.s32.totalorder %s9885_s21, 2 }
  0x6e   : > { %s225_s8 = sand.u32 1, %s9881_s20   ;;  %p10092_p4 = por %p151_p5, %p37_p3 }
  0x6f   : > { %p10096_p10 = por %p157_p7, %p43_p13  ;;  %s7298_s23 = sshll.u32 %s225_s8, 2 }
  0x70   : > { %s10525_s9 = scalar_select %p10092_p4, 1, 0 }
  0x71   : > { %s10526_s10 = scalar_select %p10096_p10, 1, 0 }
  0x72   : > { %s8221_s12 = sshll.u32 %s9885_s21, 6  ;;  %s229_s22 = scalar_lea.vmem [#allocation4], %s7298_s23 }
  0x73   : > { %s10104_s17 = scalar_lea.hbm %s10510_s0, %s8221_s12  ;;  %s237_s30 = sshll.u32 %s229_s22, 4  ;;  %s10106_s30 = int_to_ptr.vmem [resolvable:$true] %s237_s30 }
  0x74   : > { %p10110_p11 = pnand %p8272_p9, %p10079_p0  ;;  %s226_s29 = scalar_lea.sflag [#allocation5], %s225_s8 }
  0x75   : > { %s9781_s11 = scalar_lea.hbm %s10104_s17, 64  ;;  %s9786_s23 = scalar_lea.hbm %s10510_s0, 128 }
  0x76   : > { %p9782_p12 = scmp.ne.s32.totalorder %s10104_s17, %s9781_s11  ;;  %p9783_p1 = pneg %p10110_p11 }
  0x77   : > { %p9787_p13 = scmp.lt.u32.totalorder %s10104_s17, %s10510_s0  ;;  %p9788_p0 = scmp.lt.u32.totalorder %s9786_s23, %s9781_s11 }
  0x78   : > { %p9784_p3 = pnand %p9783_p1, %p9782_p12  ;;  %p9790_p5 = scmp.lt.u32.totalorder %s9781_s11, %s10104_s17 }
  0x79   : > { %p9789_p2 = por %p9788_p0, %p9787_p13 }
  0x7a   : > { %p9785_p8 = pneg %p9784_p3 }
  0x7b   : > { %p9791_p7 = por %p9790_p5, %p9789_p2 }
  0x7d   : > { %p9792_p9 = pnand %p9791_p7, %p9785_p8 }
  0x7f   : > { %9795 = shalt.err (!%p9792_p9)
}
  0x80   : > { %s9796_s8 = scalar_lea.vmem %s10106_s30, 64  ;;  %s9893_s13 = smov [#allocation4]  }
  0x81   : > { %p9797_p12 = scmp.ne.s32.totalorder %s10106_s30, %s9796_s8  ;;  %s9801_s14 = sshll.u32 %s9893_s13, 4  ;;  %s9802_s14 = int_to_ptr.vmem [resolvable:$false] %s9801_s14 }
  0x82   : > { %s9803_s22 = scalar_lea.vmem %s9802_s14, 128  ;;  %p9804_p4 = scmp.lt.s32.totalorder %s10106_s30, %s9802_s14 }
  0x83   : > { %p9799_p3 = pnand %p9797_p12, %p9783_p1  ;;  %p9805_p13 = scmp.lt.s32.totalorder %s9803_s22, %s9796_s8 }
  0x85   : > { %p9800_p10 = pneg %p9799_p3  ;;  %p9806_p0 = por %p9805_p13, %p9804_p4 }
  0x87   : > { %p9807_p2 = pnand %p9806_p0, %p9800_p10 }
  0x89   : > { %9810 = shalt.err (!%p9807_p2)
}
  0x8a   : > { %8263 = dma.hbm_to_vmem [thread:$0]  (!%p10110_p11), %s10104_s17, 64, %s10106_s30, %s226_s29  }
  0x8b   : > { %p10528_p8 = scmp.ne.s32.totalorder %s10519_s25, 0 }
  0x8c   : > { %s10142_s11 = sand.u32 (!%p10528_p8), 1, %s9877_s19  }
  0x8d   : > { %246 = sbr.rel (%p10528_p8) target bundleno = 1475 (0x5c3), region = 40  ;;  %s7302_s6 = sshll.u32 (!%p10528_p8), %s10142_s11, 2 }
  0x8e   : > { %s249_s7 = scalar_lea.sflag (!%p10528_p8), [#allocation5], %s10142_s11  ;;  %s10146_s23 = scalar_lea.vmem (!%p10528_p8), [#allocation4], %s7302_s6 }
  0x94   : > { %9856 = dma.done.wait (%p10085_p6), %s249_s7, 64  }
  0x95   : > { %9858 = vsyncadd (%p10085_p6), %s249_s7, 4294967232  ;;  %p10529_p4 = scmp.eq.s32.totalorder %s9947_s24, 0 }
  0x97   : > { %9860 = dma.done.wait (%p10529_p4), [#allocation8], 65600   ;;  %p10530_p10 = pmov %p10529_p4 }
  0x98   : > { %p10531_p11 = pmov %p10529_p4 }
  0x99   : > { %9862 = vsyncadd (%p10530_p10), [#allocation8], 4294901696 }
  0x9a   : > { %9864 = dma.done.wait (%p10531_p11), [#allocation11], 49216   ;;  %p10532_p1 = pmov %p10529_p4 }
  0x9b   : > { %v8317_v0 = vld [vmem:[#allocation7 + $0x404] ss:$16 sps:$4 sm:$0xff]   ;;  %v8321_v2 = vld [vmem:[#allocation7 + $0x400] ss:$16 sps:$4 sm:$0xff]   ;;  %vm297_vm0 = vsmask.f32 3328  ;;  %v311_v37 = vlaneseq }
  0x9c   : > { %9866 = vsyncadd (%p10532_p1), [#allocation11], 4294918080  ;;  %v8319_v1 = vld [vmem:[#allocation7 + $0x604] ss:$16 sps:$4 sm:$0xff]   ;;  %1309 = vmatprep.subr.bf16.mxu0 %v8317_v0  ;;  %v8322_v3 = vld [vmem:[#allocation7 + $0x600] ss:$16 sps:$4 sm:$0xff]  }
  0x9d   : > { %1350 = vmatprep.subr.bf16.mxu1 %v8319_v1  ;;  %v8323_v4 = vld [vmem:[#allocation7 + $0x424] ss:$16 sps:$4 sm:$0xff]   ;;  %1310 = vmatpush1.bf16.msra.mxu0 %v8321_v2  ;;  %v8327_v6 = vld [vmem:[#allocation7 + $0x420] ss:$16 sps:$4 sm:$0xff]   ;;  %vm296_vm1 = vcmask 1043456   ;;  %vm299_vm2 = vcmask 1047556  }
  0x9e   : > { %1351 = vmatpush1.bf16.msra.mxu1 %v8322_v3  ;;  %v8325_v5 = vld [vmem:[#allocation7 + $0x624] ss:$16 sps:$4 sm:$0xff]   ;;  %1311 = vmatprep.subr.bf16.mxu0 %v8323_v4  ;;  %v8328_v7 = vld [vmem:[#allocation7 + $0x620] ss:$16 sps:$4 sm:$0xff]   ;;  %vm10160_vm3 = vmand %vm296_vm1, %vm297_vm0  ;;  %vm300_vm4 = vsmask.f32 7424 }
  0x9f   : > { %1352 = vmatprep.subr.bf16.mxu1 %v8325_v5  ;;  %v8329_v8 = vld [vmem:[#allocation7 + $0x444] ss:$16 sps:$4 sm:$0xff]   ;;  %v8333_v10 = vld [vmem:[#allocation7 + $0x440] ss:$16 sps:$4 sm:$0xff]   ;;  %vm10164_vm5 = vmand %vm299_vm2, %vm300_vm4  ;;  %vm356_vm6 = vsmask.f32 7942 }
  0xa0   : > { %v8331_v9 = vld [vmem:[#allocation7 + $0x644] ss:$16 sps:$4 sm:$0xff]   ;;  %v8334_v11 = vld [vmem:[#allocation7 + $0x640] ss:$16 sps:$4 sm:$0xff]   ;;  %v312_v42 = vshrl.u32 %v311_v37, 7  ;;  %vm355_vm7 = vcmask 1041409   ;;  %vm302_vm8 = vmor %vm10164_vm5, %vm10160_vm3 }
  0xa1   : > { %1312 = vmatpush1.bf16.msra.mxu0 %v8327_v6  ;;  %v8335_v12 = vld [vmem:[#allocation7 + $0x464] ss:$16 sps:$4 sm:$0xff]   ;;  %v8339_v14 = vld [vmem:[#allocation7 + $0x460] ss:$16 sps:$4 sm:$0xff]   ;;  %vm359_vm9 = vsmask.f32 7958  ;;  %vm10175_vm10 = vmand %vm355_vm7, %vm356_vm6 }
  0xa2   : > { %1353 = vmatpush1.bf16.msra.mxu1 %v8328_v7  ;;  %1313 = vmatprep.subr.bf16.mxu0 %v8329_v8  ;;  %v8337_v13 = vld [vmem:[#allocation7 + $0x664] ss:$16 sps:$4 sm:$0xff]   ;;  %v8340_v15 = vld [vmem:[#allocation7 + $0x660] ss:$16 sps:$4 sm:$0xff]   ;;  %v10172_v48 = vsub.s32 0, %v312_v42  ;;  %vm358_vm11 = vcmask 1045509  }
  0xa3   : > { %1354 = vmatprep.subr.bf16.mxu1 %v8331_v9  ;;  %v8341_v16 = vld [vmem:[#allocation7 + $0x484] ss:$16 sps:$4 sm:$0xff]   ;;  %v8345_v18 = vld [vmem:[#allocation7 + $0x480] ss:$16 sps:$4 sm:$0xff]   ;;  %v10179_v51 = vsub.s32 1, %v312_v42  ;;  %v10181_v52 = vsub.s32 2, %v312_v42  ;;  %vm10186_vm12 = vmand %vm358_vm11, %vm359_vm9 }
  0xa4   : > { %v8343_v17 = vld [vmem:[#allocation7 + $0x684] ss:$16 sps:$4 sm:$0xff]   ;;  %v8346_v19 = vld [vmem:[#allocation7 + $0x680] ss:$16 sps:$4 sm:$0xff]   ;;  %v10183_v54 = vsub.s32 3, %v312_v42  ;;  %v303_v56 = vld [vmem:[#allocation2] sm:$0xff] }
  0xa5   : > { %1314 = vmatpush1.bf16.msra.mxu0 %v8333_v10  ;;  %v8347_v20 = vld [vmem:[#allocation7 + $0x4a4] ss:$16 sps:$4 sm:$0xff]   ;;  %v8351_v22 = vld [vmem:[#allocation7 + $0x4a0] ss:$16 sps:$4 sm:$0xff]   ;;  %v304_v58 = vsel %vm302_vm8, 0, %v303_v56  ;;  %vm361_vm13 = vmor %vm10186_vm12, %vm10175_vm10  ;;  %vm4249_vm0 = vcmask 1042432  }
  0xa6   : > { %1355 = vmatpush1.bf16.msra.mxu1 %v8334_v11  ;;  %1315 = vmatprep.subr.bf16.mxu0 %v8335_v12  ;;  %v8349_v21 = vld [vmem:[#allocation7 + $0x6a4] ss:$16 sps:$4 sm:$0xff]   ;;  %v8352_v23 = vld [vmem:[#allocation7 + $0x6a0] ss:$16 sps:$4 sm:$0xff]   ;;  %v309_v59 = vld [vmem:[%s10146_s23] sm:$0xf] }
  0xa7   : > { %1356 = vmatprep.subr.bf16.mxu1 %v8337_v13  ;;  %v8353_v24 = vld [vmem:[#allocation7 + $0x4c4] ss:$16 sps:$4 sm:$0xff]   ;;  %v8357_v26 = vld [vmem:[#allocation7 + $0x4c0] ss:$16 sps:$4 sm:$0xff]   ;;  %305 = vst [vmem:[#allocation2] sm:$0xff] %v304_v58  ;;  %v314_v63 = vrot.slane %v309_v59, %v10172_v48  ;;  %v318_v0 = vrot.slane %v309_v59, %v10179_v51  ;;  %v322_v2 = vrot.slane %v309_v59, %v10181_v52  ;;  %vm4252_vm2 = vcmask 1046532  }
  0xa8   : > { %v8355_v25 = vld [vmem:[#allocation7 + $0x6c4] ss:$16 sps:$4 sm:$0xff]   ;;  %v8358_v27 = vld [vmem:[#allocation7 + $0x6c0] ss:$16 sps:$4 sm:$0xff]   ;;  %v326_v4 = vrot.slane %v309_v59, %v10183_v54  ;;  %v8420_v58 = vld [vmem:[#allocation7 + $0x608] ss:$16 sps:$4 sm:$0xff]  }
  0xa9   : > { %1316 = vmatpush1.bf16.msra.mxu0 %v8339_v14  ;;  %v8359_v28 = vld [vmem:[#allocation7 + $0x4e4] ss:$16 sps:$4 sm:$0xff]   ;;  %v8363_v30 = vld [vmem:[#allocation7 + $0x4e0] ss:$16 sps:$4 sm:$0xff]   ;;  %v8222_v5 = vpack.c.bf16 %v318_v0, %v314_v63  ;;  %v8425_v59 = vld [vmem:[#allocation7 + $0x42c] ss:$16 sps:$4 sm:$0xff]  }
  0xaa   : > { %1357 = vmatpush1.bf16.msra.mxu1 %v8340_v15  ;;  %1317 = vmatprep.subr.bf16.mxu0 %v8341_v16  ;;  %v8361_v29 = vld [vmem:[#allocation7 + $0x6e4] ss:$16 sps:$4 sm:$0xff]   ;;  %v8364_v31 = vld [vmem:[#allocation7 + $0x6e0] ss:$16 sps:$4 sm:$0xff]   ;;  %v8223_v7 = vpack.c.bf16 %v326_v4, %v322_v2  ;;  %v8431_v63 = vld [vmem:[#allocation7 + $0x44c] ss:$16 sps:$4 sm:$0xff]  }
  0xab   : > { %1358 = vmatprep.subr.bf16.mxu1 %v8343_v17  ;;  %v8365_v32 = vld [vmem:[#allocation7 + $0x504] ss:$16 sps:$4 sm:$0xff]   ;;  %v8369_v34 = vld [vmem:[#allocation7 + $0x500] ss:$16 sps:$4 sm:$0xff]   ;;  %v346_v10 = vshll.u32 %v8222_v5, 16  ;;  %s7307_s25 = sshll.u32 %s10142_s11, 4 }
  0xac   : > { %v8367_v33 = vld [vmem:[#allocation7 + $0x704] ss:$16 sps:$4 sm:$0xff]   ;;  %v8370_v35 = vld [vmem:[#allocation7 + $0x700] ss:$16 sps:$4 sm:$0xff]   ;;  %v350_v12 = vshll.u32 %v8223_v7, 16  ;;  %s294_s16 = scalar_lea.vmem [#allocation13], %s7307_s25 }
  0xad   : > { %1318 = vmatpush1.bf16.msra.mxu0 %v8345_v18  ;;  %v8371_v38 = vld [vmem:[#allocation7 + $0x524] ss:$16 sps:$4 sm:$0xff]   ;;  %v8375_v41 = vld [vmem:[#allocation7 + $0x520] ss:$16 sps:$4 sm:$0xff]   ;;  %v348_v13 = vrot.slane %v346_v10, 7  ;;  %s8226_s17 = sshll.u32 %s9947_s24, 8 }
  0xae   : > { %1359 = vmatpush1.bf16.msra.mxu1 %v8346_v19  ;;  %1319 = vmatprep.subr.bf16.mxu0 %v8347_v20  ;;  %v8373_v39 = vld [vmem:[#allocation7 + $0x724] ss:$16 sps:$4 sm:$0xff]   ;;  %v8376_v43 = vld [vmem:[#allocation7 + $0x720] ss:$16 sps:$4 sm:$0xff]   ;;  %v362_v15 = vld [vmem:[#allocation2] sm:$0x22]  ;;  %s10466_s15 = scalar_lea.hbm %s10515_s5, %s8226_s17 }
  0xaf   : > { %1360 = vmatprep.subr.bf16.mxu1 %v8349_v21  ;;  %v8377_v44 = vld [vmem:[#allocation7 + $0x544] ss:$16 sps:$4 sm:$0xff]   ;;  %v8381_v46 = vld [vmem:[#allocation7 + $0x540] ss:$16 sps:$4 sm:$0xff]   ;;  %v352_v16 = vrot.slane %v350_v12, 7  ;;  %v363_v18 = vsel %vm361_vm13, %v348_v13, %v362_v15  ;;  %s7183_s30 = sshll.u32 %s294_s16, 4  ;;  %s10468_s30 = int_to_ptr.vmem [resolvable:$true] %s7183_s30 }
  0xb0   : > { %v8379_v45 = vld [vmem:[#allocation7 + $0x744] ss:$16 sps:$4 sm:$0xff]   ;;  %v8382_v47 = vld [vmem:[#allocation7 + $0x740] ss:$16 sps:$4 sm:$0xff]   ;;  %364 = vst [vmem:[#allocation2] sm:$0x22] %v363_v18 }
  0xb1   : > { %1320 = vmatpush1.bf16.msra.mxu0 %v8351_v22  ;;  %v8383_v50 = vld [vmem:[#allocation7 + $0x564] ss:$16 sps:$4 sm:$0xff]   ;;  %v8387_v55 = vld [vmem:[#allocation7 + $0x560] ss:$16 sps:$4 sm:$0xff]   ;;  %v8434_v0 = vld [vmem:[#allocation7 + $0x64c] ss:$16 sps:$4 sm:$0xff]  }
  0xb2   : > { %1361 = vmatpush1.bf16.msra.mxu1 %v8352_v23  ;;  %1321 = vmatprep.subr.bf16.mxu0 %v8353_v24  ;;  %v8385_v53 = vld [vmem:[#allocation7 + $0x764] ss:$16 sps:$4 sm:$0xff]   ;;  %v8388_v61 = vld [vmem:[#allocation7 + $0x760] ss:$16 sps:$4 sm:$0xff]   ;;  %v8432_v2 = vld [vmem:[#allocation7 + $0x648] ss:$16 sps:$4 sm:$0xff]  }
  0xb3   : > { %1362 = vmatprep.subr.bf16.mxu1 %v8355_v25  ;;  %v306_v60 = vld [vmem:[#allocation2 + $0x8] sm:$0xff]  ;;  %v8440_v4 = vld [vmem:[#allocation7 + $0x66c] ss:$16 sps:$4 sm:$0xff]   ;;  %v8435_v5 = vld [vmem:[#allocation7 + $0x468] ss:$16 sps:$4 sm:$0xff]   ;;  %s7169_s12 = scalar_lea.sflag [#allocation6], %s10142_s11 }
  0xb4   : > { %v8389_v62 = vld [vmem:[#allocation7 + $0x584] ss:$16 sps:$4 sm:$0xff]   ;;  %v307_v1 = vsel %vm302_vm8, 0, %v306_v60  ;;  %v8393_v6 = vld [vmem:[#allocation7 + $0x580] ss:$16 sps:$4 sm:$0xff]   ;;  %s9811_s8 = scalar_lea.vmem %s10468_s30, 256 }
  0xb5   : > { %1322 = vmatpush1.bf16.msra.mxu0 %v8357_v26  ;;  %v8391_v3 = vld [vmem:[#allocation7 + $0x784] ss:$16 sps:$4 sm:$0xff]   ;;  %308 = vst [vmem:[#allocation2 + $0x8] sm:$0xff] %v307_v1  ;;  %v8394_v8 = vld [vmem:[#allocation7 + $0x780] ss:$16 sps:$4 sm:$0xff]   ;;  %p9812_p6 = scmp.ne.s32.totalorder %s10468_s30, %s9811_s8  ;;  %p10545_p5 = scmp.ne.s32.totalorder %s10525_s9, 0 }
  0xb6   : > { %1363 = vmatpush1.bf16.msra.mxu1 %v8358_v27  ;;  %1323 = vmatprep.subr.bf16.mxu0 %v8359_v28  ;;  %v8395_v9 = vld [vmem:[#allocation7 + $0x5a4] ss:$16 sps:$4 sm:$0xff]   ;;  %v8399_v14 = vld [vmem:[#allocation7 + $0x5a0] ss:$16 sps:$4 sm:$0xff]   ;;  %v8428_v60 = vld [vmem:[#allocation7 + $0x62c] ss:$16 sps:$4 sm:$0xff]  }
  0xb7   : > { %1364 = vmatprep.subr.bf16.mxu1 %v8361_v29  ;;  %v8397_v11 = vld [vmem:[#allocation7 + $0x7a4] ss:$16 sps:$4 sm:$0xff]   ;;  %v8400_v17 = vld [vmem:[#allocation7 + $0x7a0] ss:$16 sps:$4 sm:$0xff]   ;;  %v368_v29 = vld [vmem:[#allocation2] sm:$0xff]  ;;  %p9813_p7 = pnand %p9812_p6, %p10545_p5  ;;  %s9895_s24 = smov [#allocation13]  }
  0xb8   : > { %v8401_v20 = vld [vmem:[#allocation7 + $0x5c4] ss:$16 sps:$4 sm:$0xff]   ;;  %v8405_v23 = vld [vmem:[#allocation7 + $0x5c0] ss:$16 sps:$4 sm:$0xff]   ;;  %v8429_v1 = vld [vmem:[#allocation7 + $0x448] ss:$16 sps:$4 sm:$0xff]  }
  0xb9   : > { %1324 = vmatpush1.bf16.msra.mxu0 %v8363_v30  ;;  %v8403_v21 = vld [vmem:[#allocation7 + $0x7c4] ss:$16 sps:$4 sm:$0xff]   ;;  %v8406_v24 = vld [vmem:[#allocation7 + $0x7c0] ss:$16 sps:$4 sm:$0xff]   ;;  %v8419_v30 = vld [vmem:[#allocation7 + $0x40c] ss:$16 sps:$4 sm:$0xff]   ;;  %p9814_p9 = pneg %p9813_p7 }
  0xba   : > { %1365 = vmatpush1.bf16.msra.mxu1 %v8364_v31  ;;  %1325 = vmatprep.subr.bf16.mxu0 %v8365_v32  ;;  %v8407_v25 = vld [vmem:[#allocation7 + $0x5e4] ss:$16 sps:$4 sm:$0xff]   ;;  %v8411_v27 = vld [vmem:[#allocation7 + $0x5e0] ss:$16 sps:$4 sm:$0xff]   ;;  %v10219_v31 = vcombine.low %v368_v29, %v368_v29  ;;  %v10221_v32 = vcombine.high %v368_v29, %v368_v29  ;;  %v8443_v7 = vld [vmem:[#allocation7 + $0x48c] ss:$16 sps:$4 sm:$0xff]  }
  0xbb   : > { %1366 = vmatprep.subr.bf16.mxu1 %v8367_v33  ;;  %v8409_v26 = vld [vmem:[#allocation7 + $0x7e4] ss:$16 sps:$4 sm:$0xff]   ;;  %v8412_v28 = vld [vmem:[#allocation7 + $0x7e0] ss:$16 sps:$4 sm:$0xff]   ;;  %v8444_v10 = vld [vmem:[#allocation7 + $0x688] ss:$16 sps:$4 sm:$0xff]  }
  0xbc   : > { %v365_v19 = vld [vmem:[#allocation2 + $0x8] sm:$0x22]  ;;  %v645_v37 = vshrl.u32 %v10221_v32, 16  ;;  %v640_v40 = vshll.u32 %v10219_v31, 16  ;;  %v8452_v12 = vld [vmem:[#allocation7 + $0x6ac] ss:$16 sps:$4 sm:$0xff]  }
  0xbd   : > { %1326 = vmatpush1.bf16.msra.mxu0 %v8369_v34  ;;  %v366_v22 = vsel %vm361_vm13, %v352_v16, %v365_v19  ;;  %v8422_v34 = vld [vmem:[#allocation7 + $0x60c] ss:$16 sps:$4 sm:$0xff]   ;;  %v8447_v13 = vld [vmem:[#allocation7 + $0x4a8] ss:$16 sps:$4 sm:$0xff]   ;;  %vm4250_vm1 = vsmask.f32 2306 }
  0xbe   : > { %1367 = vmatpush1.bf16.msra.mxu1 %v8370_v35  ;;  %1327 = vmatprep.subr.bf16.mxu0 %v8371_v38  ;;  %367 = vst [vmem:[#allocation2 + $0x8] sm:$0x22] %v366_v22  ;;  %v647_v38 = vshll.u32 %v10221_v32, 16  ;;  %v8455_v15 = vld [vmem:[#allocation7 + $0x4cc] ss:$16 sps:$4 sm:$0xff]   ;;  %vm10359_vm4 = vmand %vm4249_vm0, %vm4250_vm1  ;;  %s9815_s13 = sshll.u32 %s9895_s24, 4  ;;  %s9816_s13 = int_to_ptr.vmem [resolvable:$false] %s9815_s13 }
  0xbf   : > { %1368 = vmatprep.subr.bf16.mxu1 %v8373_v39  ;;  %v638_v39 = vshrl.u32 %v10219_v31, 16  ;;  %v8458_v16 = vld [vmem:[#allocation7 + $0x6cc] ss:$16 sps:$4 sm:$0xff]   ;;  %v8456_v18 = vld [vmem:[#allocation7 + $0x6c8] ss:$16 sps:$4 sm:$0xff]   ;;  %s9817_s14 = scalar_lea.vmem %s9816_s13, 512  ;;  %p9818_p12 = scmp.lt.s32.totalorder %s10468_s30, %s9816_s13 }
  0xc0   : > { %v8461_v19 = vld [vmem:[#allocation7 + $0x4ec] ss:$16 sps:$4 sm:$0xff]   ;;  %v8462_v22 = vld [vmem:[#allocation7 + $0x6e8] ss:$16 sps:$4 sm:$0xff]   ;;  %vm4253_vm3 = vsmask.f32 6418  ;;  %p9819_p3 = scmp.lt.s32.totalorder %s9817_s14, %s9811_s8 }
  0xc1   : > { %1328 = vmatpush1.bf16.msra.mxu0 %v8375_v41  ;;  %v8471_v29 = vld [vmem:[#allocation7 + $0x528] ss:$16 sps:$4 sm:$0xff]   ;;  %vm10363_vm5 = vmand %vm4252_vm2, %vm4253_vm3 }
  0xc2   : > { %1369 = vmatpush1.bf16.msra.mxu1 %v8376_v43  ;;  %1329 = vmatprep.subr.bf16.mxu0 %v8377_v44  ;;  %vm4255_vm6 = vmor %vm10363_vm5, %vm10359_vm4  ;;  %p9820_p13 = por %p9819_p3, %p9818_p12 }
  0xc3   : > { %1370 = vmatprep.subr.bf16.mxu1 %v8379_v45  ;;  %v649_v45 = vrot.slane %v647_v38, 1 }
  0xc4   : > { %p9821_p0 = pnand %p9820_p13, %p9814_p9 }
  0xc5   : > { %1330 = vmatpush1.bf16.msra.mxu0 %v8381_v46  ;;  %v369_v33 = vld [vmem:[#allocation2 + $0x8] sm:$0xff]  ;;  %v642_v46 = vrot.slane %v640_v40, 1 }
  0xc6   : > { %1371 = vmatpush1.bf16.msra.mxu1 %v8382_v47  ;;  %1331 = vmatprep.subr.bf16.mxu0 %v8383_v50  ;;  %v10223_v35 = vcombine.low %v369_v33, %v369_v33  ;;  %v10225_v36 = vcombine.high %v369_v33, %v369_v33  ;;  %v650_v50 = vor.u32 %v649_v45, %v645_v37  ;;  %v8479_v33 = vld [vmem:[#allocation7 + $0x54c] ss:$16 sps:$4 sm:$0xff]   ;;  %v8477_v45 = vld [vmem:[#allocation7 + $0x548] ss:$16 sps:$4 sm:$0xff]  }
  0xc7   : > { %1372 = vmatprep.subr.bf16.mxu1 %v8385_v53  ;;  %v10247_v53 = vor.u32 %v642_v46, %v638_v39  ;;  %v8480_v46 = vld [vmem:[#allocation7 + $0x748] ss:$16 sps:$4 sm:$0xff]  }
  0xc8   : > { %v659_v41 = vshrl.u32 %v10225_v36, 16  ;;  %v661_v42 = vshll.u32 %v10225_v36, 16  ;;  %v652_v43 = vshrl.u32 %v10223_v35, 16  ;;  %v654_v44 = vshll.u32 %v10223_v35, 16  ;;  %1341 = vmatprep.mubr.bf16.mxu0 %v650_v50 }
  0xc9   : > { %1332 = vmatpush1.bf16.msra.mxu0 %v8387_v55  ;;  %v8417_v55 = vld [vmem:[#allocation7 + $0x408] ss:$16 sps:$4 sm:$0xff]  }
  0xca   : > { %1373 = vmatpush1.bf16.msra.mxu1 %v8388_v61  ;;  %1333 = vmatprep.subr.bf16.mxu0 %v8389_v62  ;;  %v663_v47 = vrot.slane %v661_v42, 1  ;;  %v656_v49 = vrot.slane %v654_v44, 1  ;;  %v8423_v61 = vld [vmem:[#allocation7 + $0x428] ss:$16 sps:$4 sm:$0xff]  }
  0xcb   : > { %1374 = vmatprep.subr.bf16.mxu1 %v8391_v3  ;;  %v8426_v62 = vld [vmem:[#allocation7 + $0x628] ss:$16 sps:$4 sm:$0xff]   ;;  %v8437_v3 = vld [vmem:[#allocation7 + $0x46c] ss:$16 sps:$4 sm:$0xff]  }
  0xcc   : > { %v664_v56 = vor.u32 %v663_v47, %v659_v41  ;;  %v10253_v57 = vor.u32 %v656_v49, %v652_v43  ;;  %v8485_v47 = vld [vmem:[#allocation7 + $0x56c] ss:$16 sps:$4 sm:$0xff]  }
  0xcd   : > { %1334 = vmatpush1.bf16.msra.mxu0 %v8393_v6  ;;  %v8438_v6 = vld [vmem:[#allocation7 + $0x668] ss:$16 sps:$4 sm:$0xff]   ;;  %v8488_v49 = vld [vmem:[#allocation7 + $0x76c] ss:$16 sps:$4 sm:$0xff]  }
  0xce   : > { %1375 = vmatpush1.bf16.msra.mxu1 %v8394_v8  ;;  %1335 = vmatprep.subr.bf16.mxu0 %v8395_v9  ;;  %v8446_v8 = vld [vmem:[#allocation7 + $0x68c] ss:$16 sps:$4 sm:$0xff]   ;;  %v8441_v9 = vld [vmem:[#allocation7 + $0x488] ss:$16 sps:$4 sm:$0xff]  }
  0xcf   : > { %1376 = vmatprep.subr.bf16.mxu1 %v8397_v11  ;;  %1382 = vmatprep.mubr.bf16.mxu1 %v664_v56  ;;  %v8449_v11 = vld [vmem:[#allocation7 + $0x4ac] ss:$16 sps:$4 sm:$0xff]  }
  0xd1   : > { %1336 = vmatpush1.bf16.msra.mxu0 %v8399_v14  ;;  %v8450_v14 = vld [vmem:[#allocation7 + $0x6a8] ss:$16 sps:$4 sm:$0xff]  }
  0xd2   : > { %1377 = vmatpush1.bf16.msra.mxu1 %v8400_v17  ;;  %1337 = vmatprep.subr.bf16.mxu0 %v8401_v20  ;;  %v8453_v17 = vld [vmem:[#allocation7 + $0x4c8] ss:$16 sps:$4 sm:$0xff]   ;;  %v8464_v20 = vld [vmem:[#allocation7 + $0x6ec] ss:$16 sps:$4 sm:$0xff]  }
  0xd3   : > { %1378 = vmatprep.subr.bf16.mxu1 %v8403_v21  ;;  %v8459_v21 = vld [vmem:[#allocation7 + $0x4e8] ss:$16 sps:$4 sm:$0xff]  }
  0xd5   : > { %1338 = vmatpush1.bf16.msra.mxu0 %v8405_v23  ;;  %v8467_v23 = vld [vmem:[#allocation7 + $0x50c] ss:$16 sps:$4 sm:$0xff]  }
  0xd6   : > { %1379 = vmatpush1.bf16.msra.mxu1 %v8406_v24  ;;  %1339 = vmatprep.subr.bf16.mxu0 %v8407_v25  ;;  %v8470_v24 = vld [vmem:[#allocation7 + $0x70c] ss:$16 sps:$4 sm:$0xff]   ;;  %v8465_v25 = vld [vmem:[#allocation7 + $0x508] ss:$16 sps:$4 sm:$0xff]  }
  0xd7   : > { %1380 = vmatprep.subr.bf16.mxu1 %v8409_v26  ;;  %v8468_v26 = vld [vmem:[#allocation7 + $0x708] ss:$16 sps:$4 sm:$0xff]  }
  0xd9   : > { %1340 = vmatpush1.bf16.msra.mxu0 %v8411_v27  ;;  %v8473_v27 = vld [vmem:[#allocation7 + $0x52c] ss:$16 sps:$4 sm:$0xff]  }
  0xda   : > { %1381 = vmatpush1.bf16.msra.mxu1 %v8412_v28  ;;  %1391 = vmatprep.subr.bf16.mxu0 %v8419_v30  ;;  %v8476_v28 = vld [vmem:[#allocation7 + $0x72c] ss:$16 sps:$4 sm:$0xff]   ;;  %v8474_v30 = vld [vmem:[#allocation7 + $0x728] ss:$16 sps:$4 sm:$0xff]  }
  0xdb   : > { %1432 = vmatprep.subr.bf16.mxu1 %v8422_v34  ;;  %v8482_v34 = vld [vmem:[#allocation7 + $0x74c] ss:$16 sps:$4 sm:$0xff]  }
  0xdc   : > { %1342 = vmatmul.mubr.bf16.vlgmr.msra.gmra.mrb[0].mxu0 %v10247_v53 }
  0xdd   : > { %1383 = vmatmul.mubr.bf16.vlgmr.msra.gmra.mrb[0].mxu1 %v10253_v57  ;;  %1392 = vmatpush1.bf16.msra.mxu0 %v8417_v55  ;;  %v8486_v55 = vld [vmem:[#allocation7 + $0x768] ss:$16 sps:$4 sm:$0xff]  }
  0xde   : > { %1433 = vmatpush1.bf16.msra.mxu1 %v8420_v58  ;;  %1393 = vmatprep.subr.bf16.mxu0 %v8425_v59  ;;  %v8494_v58 = vld [vmem:[#allocation7 + $0x78c] ss:$16 sps:$4 sm:$0xff]   ;;  %v8489_v59 = vld [vmem:[#allocation7 + $0x588] ss:$16 sps:$4 sm:$0xff]  }
  0xdf   : > { %1434 = vmatprep.subr.bf16.mxu1 %v8428_v60  ;;  %1423 = vmatprep.mubr.bf16.mxu0 %v650_v50  ;;  %v8483_v50 = vld [vmem:[#allocation7 + $0x568] ss:$16 sps:$4 sm:$0xff]  }
  0xe0   : > { %1464 = vmatprep.mubr.bf16.mxu1 %v664_v56  ;;  %v8491_v56 = vld [vmem:[#allocation7 + $0x58c] ss:$16 sps:$4 sm:$0xff]   ;;  %v8492_v60 = vld [vmem:[#allocation7 + $0x788] ss:$16 sps:$4 sm:$0xff]  }
  0xe1   : > { %1394 = vmatpush1.bf16.msra.mxu0 %v8423_v61  ;;  %v8497_v61 = vld [vmem:[#allocation7 + $0x5ac] ss:$16 sps:$4 sm:$0xff]  }
  0xe2   : > { %1435 = vmatpush1.bf16.msra.mxu1 %v8426_v62  ;;  %1395 = vmatprep.subr.bf16.mxu0 %v8431_v63  ;;  %v8500_v62 = vld [vmem:[#allocation7 + $0x7ac] ss:$16 sps:$4 sm:$0xff]   ;;  %v8495_v63 = vld [vmem:[#allocation7 + $0x5a8] ss:$16 sps:$4 sm:$0xff]  }
  0xe3   : > { %1436 = vmatprep.subr.bf16.mxu1 %v8434_v0  ;;  %v8498_v0 = vld [vmem:[#allocation7 + $0x7a8] ss:$16 sps:$4 sm:$0xff]  }
  0xe5   : > { %1396 = vmatpush1.bf16.msra.mxu0 %v8429_v1  ;;  %v8503_v1 = vld [vmem:[#allocation7 + $0x5cc] ss:$16 sps:$4 sm:$0xff]  }
  0xe6   : > { %1437 = vmatpush1.bf16.msra.mxu1 %v8432_v2  ;;  %1397 = vmatprep.subr.bf16.mxu0 %v8437_v3  ;;  %v8506_v2 = vld [vmem:[#allocation7 + $0x7cc] ss:$16 sps:$4 sm:$0xff]   ;;  %v8501_v3 = vld [vmem:[#allocation7 + $0x5c8] ss:$16 sps:$4 sm:$0xff]  }
  0xe7   : > { %1438 = vmatprep.subr.bf16.mxu1 %v8440_v4  ;;  %v8504_v4 = vld [vmem:[#allocation7 + $0x7c8] ss:$16 sps:$4 sm:$0xff]  }
  0xe9   : > { %1398 = vmatpush1.bf16.msra.mxu0 %v8435_v5  ;;  %v8509_v5 = vld [vmem:[#allocation7 + $0x5ec] ss:$16 sps:$4 sm:$0xff]  }
  0xea   : > { %1439 = vmatpush1.bf16.msra.mxu1 %v8438_v6  ;;  %1399 = vmatprep.subr.bf16.mxu0 %v8443_v7  ;;  %v8512_v6 = vld [vmem:[#allocation7 + $0x7ec] ss:$16 sps:$4 sm:$0xff]   ;;  %v8507_v7 = vld [vmem:[#allocation7 + $0x5e8] ss:$16 sps:$4 sm:$0xff]  }
  0xeb   : > { %1440 = vmatprep.subr.bf16.mxu1 %v8446_v8  ;;  %v8510_v8 = vld [vmem:[#allocation7 + $0x7e8] ss:$16 sps:$4 sm:$0xff]  }
  0xed   : > { %1400 = vmatpush1.bf16.msra.mxu0 %v8441_v9  ;;  %v8515_v9 = vld [vmem:[#allocation7 + $0x4] ss:$16 sps:$4 sm:$0xff]  }
  0xee   : > { %1441 = vmatpush1.bf16.msra.mxu1 %v8444_v10  ;;  %1401 = vmatprep.subr.bf16.mxu0 %v8449_v11  ;;  %v8518_v10 = vld [vmem:[#allocation7 + $0x204] ss:$16 sps:$4 sm:$0xff]   ;;  %v8513_v11 = vld [vmem:[#allocation7] ss:$16 sps:$4 sm:$0xff]  }
  0xef   : > { %1442 = vmatprep.subr.bf16.mxu1 %v8452_v12  ;;  %v8516_v12 = vld [vmem:[#allocation7 + $0x200] ss:$16 sps:$4 sm:$0xff]  }
  0xf1   : > { %1402 = vmatpush1.bf16.msra.mxu0 %v8447_v13  ;;  %v8521_v13 = vld [vmem:[#allocation7 + $0x24] ss:$16 sps:$4 sm:$0xff]  }
  0xf2   : > { %1443 = vmatpush1.bf16.msra.mxu1 %v8450_v14  ;;  %1403 = vmatprep.subr.bf16.mxu0 %v8455_v15  ;;  %v8524_v14 = vld [vmem:[#allocation7 + $0x224] ss:$16 sps:$4 sm:$0xff]   ;;  %v8519_v15 = vld [vmem:[#allocation7 + $0x20] ss:$16 sps:$4 sm:$0xff]  }
  0xf3   : > { %1444 = vmatprep.subr.bf16.mxu1 %v8458_v16  ;;  %v8522_v16 = vld [vmem:[#allocation7 + $0x220] ss:$16 sps:$4 sm:$0xff]  }
  0xf5   : > { %1404 = vmatpush1.bf16.msra.mxu0 %v8453_v17  ;;  %v8527_v17 = vld [vmem:[#allocation7 + $0x44] ss:$16 sps:$4 sm:$0xff]  }
  0xf6   : > { %1445 = vmatpush1.bf16.msra.mxu1 %v8456_v18  ;;  %1405 = vmatprep.subr.bf16.mxu0 %v8461_v19  ;;  %v8530_v18 = vld [vmem:[#allocation7 + $0x244] ss:$16 sps:$4 sm:$0xff]   ;;  %v8525_v19 = vld [vmem:[#allocation7 + $0x40] ss:$16 sps:$4 sm:$0xff]  }
  0xf7   : > { %1446 = vmatprep.subr.bf16.mxu1 %v8464_v20  ;;  %v8528_v20 = vld [vmem:[#allocation7 + $0x240] ss:$16 sps:$4 sm:$0xff]  }
  0xf9   : > { %1406 = vmatpush1.bf16.msra.mxu0 %v8459_v21  ;;  %v8531_v21 = vld [vmem:[#allocation7 + $0x60] ss:$16 sps:$4 sm:$0xff]  }
  0xfa   : > { %1447 = vmatpush1.bf16.msra.mxu1 %v8462_v22  ;;  %1407 = vmatprep.subr.bf16.mxu0 %v8467_v23  ;;  %v8534_v22 = vld [vmem:[#allocation7 + $0x260] ss:$16 sps:$4 sm:$0xff]   ;;  %v8539_v23 = vld [vmem:[#allocation7 + $0x84] ss:$16 sps:$4 sm:$0xff]  }
  0xfb   : > { %1448 = vmatprep.subr.bf16.mxu1 %v8470_v24  ;;  %v8542_v24 = vld [vmem:[#allocation7 + $0x284] ss:$16 sps:$4 sm:$0xff]  }
  0xfd   : > { %1408 = vmatpush1.bf16.msra.mxu0 %v8465_v25  ;;  %v8537_v25 = vld [vmem:[#allocation7 + $0x80] ss:$16 sps:$4 sm:$0xff]  }
  0xfe   : > { %1449 = vmatpush1.bf16.msra.mxu1 %v8468_v26  ;;  %1409 = vmatprep.subr.bf16.mxu0 %v8473_v27  ;;  %v8540_v26 = vld [vmem:[#allocation7 + $0x280] ss:$16 sps:$4 sm:$0xff]   ;;  %v8545_v27 = vld [vmem:[#allocation7 + $0xa4] ss:$16 sps:$4 sm:$0xff]  }
  0xff   : > { %1450 = vmatprep.subr.bf16.mxu1 %v8476_v28  ;;  %v8548_v28 = vld [vmem:[#allocation7 + $0x2a4] ss:$16 sps:$4 sm:$0xff]  }
 0x101   : > { %1410 = vmatpush1.bf16.msra.mxu0 %v8471_v29  ;;  %v8543_v29 = vld [vmem:[#allocation7 + $0xa0] ss:$16 sps:$4 sm:$0xff]  }
 0x102   : > { %1451 = vmatpush1.bf16.msra.mxu1 %v8474_v30  ;;  %1411 = vmatprep.subr.bf16.mxu0 %v8479_v33  ;;  %v8546_v30 = vld [vmem:[#allocation7 + $0x2a0] ss:$16 sps:$4 sm:$0xff]   ;;  %v8551_v33 = vld [vmem:[#allocation7 + $0xc4] ss:$16 sps:$4 sm:$0xff]  }
 0x103   : > { %1452 = vmatprep.subr.bf16.mxu1 %v8482_v34  ;;  %v8554_v34 = vld [vmem:[#allocation7 + $0x2c4] ss:$16 sps:$4 sm:$0xff]  }
 0x105   : > { %1412 = vmatpush1.bf16.msra.mxu0 %v8477_v45  ;;  %v8549_v45 = vld [vmem:[#allocation7 + $0xc0] ss:$16 sps:$4 sm:$0xff]  }
 0x106   : > { %1453 = vmatpush1.bf16.msra.mxu1 %v8480_v46  ;;  %1413 = vmatprep.subr.bf16.mxu0 %v8485_v47  ;;  %v8552_v46 = vld [vmem:[#allocation7 + $0x2c0] ss:$16 sps:$4 sm:$0xff]   ;;  %v8557_v47 = vld [vmem:[#allocation7 + $0xe4] ss:$16 sps:$4 sm:$0xff]  }
 0x107   : > { %1454 = vmatprep.subr.bf16.mxu1 %v8488_v49  ;;  %v8560_v49 = vld [vmem:[#allocation7 + $0x2e4] ss:$16 sps:$4 sm:$0xff]  }
 0x109   : > { %1414 = vmatpush1.bf16.msra.mxu0 %v8483_v50  ;;  %v8555_v50 = vld [vmem:[#allocation7 + $0xe0] ss:$16 sps:$4 sm:$0xff]  }
 0x10a   : > { %1455 = vmatpush1.bf16.msra.mxu1 %v8486_v55  ;;  %1415 = vmatprep.subr.bf16.mxu0 %v8491_v56  ;;  %v8558_v55 = vld [vmem:[#allocation7 + $0x2e0] ss:$16 sps:$4 sm:$0xff]   ;;  %v8563_v56 = vld [vmem:[#allocation7 + $0x104] ss:$16 sps:$4 sm:$0xff]  }
 0x10b   : > { %1456 = vmatprep.subr.bf16.mxu1 %v8494_v58  ;;  %v8566_v58 = vld [vmem:[#allocation7 + $0x304] ss:$16 sps:$4 sm:$0xff]  }
 0x10d   : > { %1416 = vmatpush1.bf16.msra.mxu0 %v8489_v59  ;;  %v8561_v59 = vld [vmem:[#allocation7 + $0x100] ss:$16 sps:$4 sm:$0xff]  }
 0x10e   : > { %1457 = vmatpush1.bf16.msra.mxu1 %v8492_v60  ;;  %1417 = vmatprep.subr.bf16.mxu0 %v8497_v61  ;;  %v8564_v60 = vld [vmem:[#allocation7 + $0x300] ss:$16 sps:$4 sm:$0xff]   ;;  %v8569_v61 = vld [vmem:[#allocation7 + $0x124] ss:$16 sps:$4 sm:$0xff]  }
 0x10f   : > { %1458 = vmatprep.subr.bf16.mxu1 %v8500_v62  ;;  %v8572_v62 = vld [vmem:[#allocation7 + $0x324] ss:$16 sps:$4 sm:$0xff]  }
 0x111   : > { %1418 = vmatpush1.bf16.msra.mxu0 %v8495_v63  ;;  %v8567_v63 = vld [vmem:[#allocation7 + $0x120] ss:$16 sps:$4 sm:$0xff]  }
 0x112   : > { %1459 = vmatpush1.bf16.msra.mxu1 %v8498_v0  ;;  %1419 = vmatprep.subr.bf16.mxu0 %v8503_v1  ;;  %v8570_v0 = vld [vmem:[#allocation7 + $0x320] ss:$16 sps:$4 sm:$0xff]   ;;  %v8575_v1 = vld [vmem:[#allocation7 + $0x144] ss:$16 sps:$4 sm:$0xff]  }
 0x113   : > { %1460 = vmatprep.subr.bf16.mxu1 %v8506_v2  ;;  %v8578_v2 = vld [vmem:[#allocation7 + $0x344] ss:$16 sps:$4 sm:$0xff]  }
 0x115   : > { %1420 = vmatpush1.bf16.msra.mxu0 %v8501_v3  ;;  %v8573_v3 = vld [vmem:[#allocation7 + $0x140] ss:$16 sps:$4 sm:$0xff]  }
 0x116   : > { %1461 = vmatpush1.bf16.msra.mxu1 %v8504_v4  ;;  %1421 = vmatprep.subr.bf16.mxu0 %v8509_v5  ;;  %v8576_v4 = vld [vmem:[#allocation7 + $0x340] ss:$16 sps:$4 sm:$0xff]   ;;  %v8581_v5 = vld [vmem:[#allocation7 + $0x164] ss:$16 sps:$4 sm:$0xff]  }
 0x117   : > { %1462 = vmatprep.subr.bf16.mxu1 %v8512_v6  ;;  %v8584_v6 = vld [vmem:[#allocation7 + $0x364] ss:$16 sps:$4 sm:$0xff]  }
 0x119   : > { %1422 = vmatpush1.bf16.msra.mxu0 %v8507_v7  ;;  %v8579_v7 = vld [vmem:[#allocation7 + $0x160] ss:$16 sps:$4 sm:$0xff]  }
 0x11a   : > { %1463 = vmatpush1.bf16.msra.mxu1 %v8510_v8  ;;  %2117 = vmatprep.subr.bf16.mxu0 %v8515_v9  ;;  %v8582_v8 = vld [vmem:[#allocation7 + $0x360] ss:$16 sps:$4 sm:$0xff]   ;;  %v8587_v9 = vld [vmem:[#allocation7 + $0x184] ss:$16 sps:$4 sm:$0xff]  }
 0x11b   : > { %2158 = vmatprep.subr.bf16.mxu1 %v8518_v10  ;;  %v8590_v10 = vld [vmem:[#allocation7 + $0x384] ss:$16 sps:$4 sm:$0xff]  }
 0x11c   : > { %1424 = vmatmul.mubr.bf16.vlgmr.msra.gmra.mrb[4].mxu0 %v10247_v53  ;;  %v8533_v53 = vld [vmem:[#allocation7 + $0x64] ss:$16 sps:$4 sm:$0xff]  }
 0x11d   : > { %1465 = vmatmul.mubr.bf16.vlgmr.msra.gmra.mrb[4].mxu1 %v10253_v57  ;;  %2118 = vmatpush1.bf16.msra.mxu0 %v8513_v11  ;;  %v8536_v57 = vld [vmem:[#allocation7 + $0x264] ss:$16 sps:$4 sm:$0xff]   ;;  %v8585_v11 = vld [vmem:[#allocation7 + $0x180] ss:$16 sps:$4 sm:$0xff]  }
 0x11e   : > { %2159 = vmatpush1.bf16.msra.mxu1 %v8516_v12  ;;  %2119 = vmatprep.subr.bf16.mxu0 %v8521_v13  ;;  %v8588_v12 = vld [vmem:[#allocation7 + $0x380] ss:$16 sps:$4 sm:$0xff]   ;;  %v8593_v13 = vld [vmem:[#allocation7 + $0x1a4] ss:$16 sps:$4 sm:$0xff]  }
 0x11f   : > { %2160 = vmatprep.subr.bf16.mxu1 %v8524_v14  ;;  %2149 = vmatprep.mubr.bf16.mxu0 %v10221_v32  ;;  %v8596_v14 = vld [vmem:[#allocation7 + $0x3a4] ss:$16 sps:$4 sm:$0xff]  }
 0x120   : > { %2190 = vmatprep.mubr.bf16.mxu1 %v10225_v36 }
 0x121   : > { %2120 = vmatpush1.bf16.msra.mxu0 %v8519_v15  ;;  %v8591_v15 = vld [vmem:[#allocation7 + $0x1a0] ss:$16 sps:$4 sm:$0xff]  }
 0x122   : > { %2161 = vmatpush1.bf16.msra.mxu1 %v8522_v16  ;;  %2121 = vmatprep.subr.bf16.mxu0 %v8527_v17  ;;  %v8594_v16 = vld [vmem:[#allocation7 + $0x3a0] ss:$16 sps:$4 sm:$0xff]   ;;  %v8599_v17 = vld [vmem:[#allocation7 + $0x1c4] ss:$16 sps:$4 sm:$0xff]  }
 0x123   : > { %2162 = vmatprep.subr.bf16.mxu1 %v8530_v18  ;;  %v8602_v18 = vld [vmem:[#allocation7 + $0x3c4] ss:$16 sps:$4 sm:$0xff]  }
 0x125   : > { %2122 = vmatpush1.bf16.msra.mxu0 %v8525_v19  ;;  %v8597_v19 = vld [vmem:[#allocation7 + $0x1c0] ss:$16 sps:$4 sm:$0xff]  }
 0x126   : > { %2163 = vmatpush1.bf16.msra.mxu1 %v8528_v20  ;;  %2123 = vmatprep.subr.bf16.mxu0 %v8533_v53  ;;  %v8600_v20 = vld [vmem:[#allocation7 + $0x3c0] ss:$16 sps:$4 sm:$0xff]   ;;  %v8605_v53 = vld [vmem:[#allocation7 + $0x1e4] ss:$16 sps:$4 sm:$0xff]  }
 0x127   : > { %2164 = vmatprep.subr.bf16.mxu1 %v8536_v57  ;;  %v8608_v57 = vld [vmem:[#allocation7 + $0x3e4] ss:$16 sps:$4 sm:$0xff]  }
 0x129   : > { %2124 = vmatpush1.bf16.msra.mxu0 %v8531_v21  ;;  %v8603_v21 = vld [vmem:[#allocation7 + $0x1e0] ss:$16 sps:$4 sm:$0xff]  }
 0x12a   : > { %2165 = vmatpush1.bf16.msra.mxu1 %v8534_v22  ;;  %2125 = vmatprep.subr.bf16.mxu0 %v8539_v23  ;;  %v8606_v22 = vld [vmem:[#allocation7 + $0x3e0] ss:$16 sps:$4 sm:$0xff]   ;;  %v8611_v23 = vld [vmem:[#allocation7 + $0xc] ss:$16 sps:$4 sm:$0xff]  }
 0x12b   : > { %2166 = vmatprep.subr.bf16.mxu1 %v8542_v24  ;;  %v8614_v24 = vld [vmem:[#allocation7 + $0x20c] ss:$16 sps:$4 sm:$0xff]  }
 0x12d   : > { %2126 = vmatpush1.bf16.msra.mxu0 %v8537_v25  ;;  %v8609_v25 = vld [vmem:[#allocation7 + $0x8] ss:$16 sps:$4 sm:$0xff]  }
 0x12e   : > { %2167 = vmatpush1.bf16.msra.mxu1 %v8540_v26  ;;  %2127 = vmatprep.subr.bf16.mxu0 %v8545_v27  ;;  %v8612_v26 = vld [vmem:[#allocation7 + $0x208] ss:$16 sps:$4 sm:$0xff]   ;;  %v8617_v27 = vld [vmem:[#allocation7 + $0x2c] ss:$16 sps:$4 sm:$0xff]  }
 0x12f   : > { %2168 = vmatprep.subr.bf16.mxu1 %v8548_v28  ;;  %v8620_v28 = vld [vmem:[#allocation7 + $0x22c] ss:$16 sps:$4 sm:$0xff]  }
 0x131   : > { %2128 = vmatpush1.bf16.msra.mxu0 %v8543_v29  ;;  %v8615_v29 = vld [vmem:[#allocation7 + $0x28] ss:$16 sps:$4 sm:$0xff]  }
 0x132   : > { %2169 = vmatpush1.bf16.msra.mxu1 %v8546_v30  ;;  %2129 = vmatprep.subr.bf16.mxu0 %v8551_v33  ;;  %v8618_v30 = vld [vmem:[#allocation7 + $0x228] ss:$16 sps:$4 sm:$0xff]   ;;  %v8623_v33 = vld [vmem:[#allocation7 + $0x4c] ss:$16 sps:$4 sm:$0xff]  }
 0x133   : > { %2170 = vmatprep.subr.bf16.mxu1 %v8554_v34  ;;  %v8626_v34 = vld [vmem:[#allocation7 + $0x24c] ss:$16 sps:$4 sm:$0xff]  }
 0x135   : > { %2130 = vmatpush1.bf16.msra.mxu0 %v8549_v45  ;;  %v8621_v45 = vld [vmem:[#allocation7 + $0x48] ss:$16 sps:$4 sm:$0xff]  }
 0x136   : > { %2171 = vmatpush1.bf16.msra.mxu1 %v8552_v46  ;;  %2131 = vmatprep.subr.bf16.mxu0 %v8557_v47  ;;  %v8624_v46 = vld [vmem:[#allocation7 + $0x248] ss:$16 sps:$4 sm:$0xff]   ;;  %v8629_v47 = vld [vmem:[#allocation7 + $0x6c] ss:$16 sps:$4 sm:$0xff]  }
 0x137   : > { %2172 = vmatprep.subr.bf16.mxu1 %v8560_v49  ;;  %v8632_v49 = vld [vmem:[#allocation7 + $0x26c] ss:$16 sps:$4 sm:$0xff]  }
 0x139   : > { %2132 = vmatpush1.bf16.msra.mxu0 %v8555_v50  ;;  %v8627_v50 = vld [vmem:[#allocation7 + $0x68] ss:$16 sps:$4 sm:$0xff]  }
 0x13a   : > { %2173 = vmatpush1.bf16.msra.mxu1 %v8558_v55  ;;  %2133 = vmatprep.subr.bf16.mxu0 %v8563_v56  ;;  %v8630_v55 = vld [vmem:[#allocation7 + $0x268] ss:$16 sps:$4 sm:$0xff]   ;;  %v8635_v56 = vld [vmem:[#allocation7 + $0x8c] ss:$16 sps:$4 sm:$0xff]  }
 0x13b   : > { %2174 = vmatprep.subr.bf16.mxu1 %v8566_v58  ;;  %v8638_v58 = vld [vmem:[#allocation7 + $0x28c] ss:$16 sps:$4 sm:$0xff]  }
 0x13d   : > { %2134 = vmatpush1.bf16.msra.mxu0 %v8561_v59  ;;  %v8633_v59 = vld [vmem:[#allocation7 + $0x88] ss:$16 sps:$4 sm:$0xff]  }
 0x13e   : > { %2175 = vmatpush1.bf16.msra.mxu1 %v8564_v60  ;;  %2135 = vmatprep.subr.bf16.mxu0 %v8569_v61  ;;  %v8636_v60 = vld [vmem:[#allocation7 + $0x288] ss:$16 sps:$4 sm:$0xff]   ;;  %v8641_v61 = vld [vmem:[#allocation7 + $0xac] ss:$16 sps:$4 sm:$0xff]  }
 0x13f   : > { %2176 = vmatprep.subr.bf16.mxu1 %v8572_v62  ;;  %v8644_v62 = vld [vmem:[#allocation7 + $0x2ac] ss:$16 sps:$4 sm:$0xff]  }
 0x141   : > { %2136 = vmatpush1.bf16.msra.mxu0 %v8567_v63  ;;  %v8639_v63 = vld [vmem:[#allocation7 + $0xa8] ss:$16 sps:$4 sm:$0xff]  }
 0x142   : > { %2177 = vmatpush1.bf16.msra.mxu1 %v8570_v0  ;;  %2137 = vmatprep.subr.bf16.mxu0 %v8575_v1  ;;  %v8642_v0 = vld [vmem:[#allocation7 + $0x2a8] ss:$16 sps:$4 sm:$0xff]   ;;  %v8647_v1 = vld [vmem:[#allocation7 + $0xcc] ss:$16 sps:$4 sm:$0xff]  }
 0x143   : > { %2178 = vmatprep.subr.bf16.mxu1 %v8578_v2  ;;  %v8650_v2 = vld [vmem:[#allocation7 + $0x2cc] ss:$16 sps:$4 sm:$0xff]  }
 0x145   : > { %2138 = vmatpush1.bf16.msra.mxu0 %v8573_v3  ;;  %v8645_v3 = vld [vmem:[#allocation7 + $0xc8] ss:$16 sps:$4 sm:$0xff]  }
 0x146   : > { %2179 = vmatpush1.bf16.msra.mxu1 %v8576_v4  ;;  %2139 = vmatprep.subr.bf16.mxu0 %v8581_v5  ;;  %v8648_v4 = vld [vmem:[#allocation7 + $0x2c8] ss:$16 sps:$4 sm:$0xff]   ;;  %v8653_v5 = vld [vmem:[#allocation7 + $0xec] ss:$16 sps:$4 sm:$0xff]  }
 0x147   : > { %2180 = vmatprep.subr.bf16.mxu1 %v8584_v6  ;;  %v8656_v6 = vld [vmem:[#allocation7 + $0x2ec] ss:$16 sps:$4 sm:$0xff]  }
 0x149   : > { %2140 = vmatpush1.bf16.msra.mxu0 %v8579_v7  ;;  %v8651_v7 = vld [vmem:[#allocation7 + $0xe8] ss:$16 sps:$4 sm:$0xff]  }
 0x14a   : > { %2181 = vmatpush1.bf16.msra.mxu1 %v8582_v8  ;;  %2141 = vmatprep.subr.bf16.mxu0 %v8587_v9  ;;  %v8654_v8 = vld [vmem:[#allocation7 + $0x2e8] ss:$16 sps:$4 sm:$0xff]   ;;  %v8659_v9 = vld [vmem:[#allocation7 + $0x10c] ss:$16 sps:$4 sm:$0xff]  }
 0x14b   : > { %2182 = vmatprep.subr.bf16.mxu1 %v8590_v10  ;;  %v8662_v10 = vld [vmem:[#allocation7 + $0x30c] ss:$16 sps:$4 sm:$0xff]  }
 0x14d   : > { %2142 = vmatpush1.bf16.msra.mxu0 %v8585_v11  ;;  %v8657_v11 = vld [vmem:[#allocation7 + $0x108] ss:$16 sps:$4 sm:$0xff]  }
 0x14e   : > { %2183 = vmatpush1.bf16.msra.mxu1 %v8588_v12  ;;  %2143 = vmatprep.subr.bf16.mxu0 %v8593_v13  ;;  %v8660_v12 = vld [vmem:[#allocation7 + $0x308] ss:$16 sps:$4 sm:$0xff]   ;;  %v8665_v13 = vld [vmem:[#allocation7 + $0x12c] ss:$16 sps:$4 sm:$0xff]  }
 0x14f   : > { %2184 = vmatprep.subr.bf16.mxu1 %v8596_v14  ;;  %v8668_v14 = vld [vmem:[#allocation7 + $0x32c] ss:$16 sps:$4 sm:$0xff]  }
 0x151   : > { %2144 = vmatpush1.bf16.msra.mxu0 %v8591_v15  ;;  %v8663_v15 = vld [vmem:[#allocation7 + $0x128] ss:$16 sps:$4 sm:$0xff]  }
 0x152   : > { %2185 = vmatpush1.bf16.msra.mxu1 %v8594_v16  ;;  %2145 = vmatprep.subr.bf16.mxu0 %v8599_v17  ;;  %v8666_v16 = vld [vmem:[#allocation7 + $0x328] ss:$16 sps:$4 sm:$0xff]   ;;  %v8671_v17 = vld [vmem:[#allocation7 + $0x14c] ss:$16 sps:$4 sm:$0xff]  }
 0x153   : > { %2186 = vmatprep.subr.bf16.mxu1 %v8602_v18  ;;  %v8674_v18 = vld [vmem:[#allocation7 + $0x34c] ss:$16 sps:$4 sm:$0xff]  }
 0x155   : > { %2146 = vmatpush1.bf16.msra.mxu0 %v8597_v19  ;;  %v8669_v19 = vld [vmem:[#allocation7 + $0x148] ss:$16 sps:$4 sm:$0xff]  }
 0x156   : > { %2187 = vmatpush1.bf16.msra.mxu1 %v8600_v20  ;;  %2147 = vmatprep.subr.bf16.mxu0 %v8605_v53  ;;  %v8672_v20 = vld [vmem:[#allocation7 + $0x348] ss:$16 sps:$4 sm:$0xff]   ;;  %v8677_v53 = vld [vmem:[#allocation7 + $0x16c] ss:$16 sps:$4 sm:$0xff]  }
 0x157   : > { %2188 = vmatprep.subr.bf16.mxu1 %v8608_v57  ;;  %v8680_v57 = vld [vmem:[#allocation7 + $0x36c] ss:$16 sps:$4 sm:$0xff]  }
 0x159   : > { %2148 = vmatpush1.bf16.msra.mxu0 %v8603_v21  ;;  %v8675_v21 = vld [vmem:[#allocation7 + $0x168] ss:$16 sps:$4 sm:$0xff]  }
 0x15a   : > { %2189 = vmatpush1.bf16.msra.mxu1 %v8606_v22  ;;  %2199 = vmatprep.subr.bf16.mxu0 %v8611_v23  ;;  %v8678_v22 = vld [vmem:[#allocation7 + $0x368] ss:$16 sps:$4 sm:$0xff]   ;;  %v8683_v23 = vld [vmem:[#allocation7 + $0x18c] ss:$16 sps:$4 sm:$0xff]  }
 0x15b   : > { %2240 = vmatprep.subr.bf16.mxu1 %v8614_v24  ;;  %v8686_v24 = vld [vmem:[#allocation7 + $0x38c] ss:$16 sps:$4 sm:$0xff]  }
 0x15c   : > { %2150 = vmatmul.mubr.bf16.vlgmr.msra.gmra.mrb[8].mxu0 %v10219_v31 }
 0x15d   : > { %2191 = vmatmul.mubr.bf16.vlgmr.msra.gmra.mrb[8].mxu1 %v10223_v35  ;;  %2200 = vmatpush1.bf16.msra.mxu0 %v8609_v25  ;;  %v8681_v25 = vld [vmem:[#allocation7 + $0x188] ss:$16 sps:$4 sm:$0xff]  }
 0x15e   : > { %2241 = vmatpush1.bf16.msra.mxu1 %v8612_v26  ;;  %2201 = vmatprep.subr.bf16.mxu0 %v8617_v27  ;;  %v8684_v26 = vld [vmem:[#allocation7 + $0x388] ss:$16 sps:$4 sm:$0xff]   ;;  %v8689_v27 = vld [vmem:[#allocation7 + $0x1ac] ss:$16 sps:$4 sm:$0xff]  }
 0x15f   : > { %2242 = vmatprep.subr.bf16.mxu1 %v8620_v28  ;;  %2231 = vmatprep.mubr.bf16.mxu0 %v10221_v32  ;;  %v8692_v28 = vld [vmem:[#allocation7 + $0x3ac] ss:$16 sps:$4 sm:$0xff]  }
 0x160   : > { %2272 = vmatprep.mubr.bf16.mxu1 %v10225_v36 }
 0x161   : > { %2202 = vmatpush1.bf16.msra.mxu0 %v8615_v29  ;;  %v8687_v29 = vld [vmem:[#allocation7 + $0x1a8] ss:$16 sps:$4 sm:$0xff]  }
 0x162   : > { %2243 = vmatpush1.bf16.msra.mxu1 %v8618_v30  ;;  %2203 = vmatprep.subr.bf16.mxu0 %v8623_v33  ;;  %v8690_v30 = vld [vmem:[#allocation7 + $0x3a8] ss:$16 sps:$4 sm:$0xff]   ;;  %v8695_v33 = vld [vmem:[#allocation7 + $0x1cc] ss:$16 sps:$4 sm:$0xff]  }
 0x163   : > { %2244 = vmatprep.subr.bf16.mxu1 %v8626_v34  ;;  %v8698_v34 = vld [vmem:[#allocation7 + $0x3cc] ss:$16 sps:$4 sm:$0xff]  }
 0x165   : > { %2204 = vmatpush1.bf16.msra.mxu0 %v8621_v45  ;;  %v8693_v45 = vld [vmem:[#allocation7 + $0x1c8] ss:$16 sps:$4 sm:$0xff]  }
 0x166   : > { %2245 = vmatpush1.bf16.msra.mxu1 %v8624_v46  ;;  %2205 = vmatprep.subr.bf16.mxu0 %v8629_v47  ;;  %v8696_v46 = vld [vmem:[#allocation7 + $0x3c8] ss:$16 sps:$4 sm:$0xff]   ;;  %v8701_v47 = vld [vmem:[#allocation7 + $0x1ec] ss:$16 sps:$4 sm:$0xff]  }
 0x167   : > { %2246 = vmatprep.subr.bf16.mxu1 %v8632_v49  ;;  %v8704_v49 = vld [vmem:[#allocation7 + $0x3ec] ss:$16 sps:$4 sm:$0xff]  }
 0x169   : > { %2206 = vmatpush1.bf16.msra.mxu0 %v8627_v50  ;;  %v8699_v50 = vld [vmem:[#allocation7 + $0x1e8] ss:$16 sps:$4 sm:$0xff]  }
 0x16a   : > { %2247 = vmatpush1.bf16.msra.mxu1 %v8630_v55  ;;  %2207 = vmatprep.subr.bf16.mxu0 %v8635_v56  ;;  %v8702_v55 = vld [vmem:[#allocation7 + $0x3e8] ss:$16 sps:$4 sm:$0xff]   ;;  %v8707_v56 = vld [vmem:[#allocation7 + $0x804] ss:$16 sps:$4 sm:$0xff]  }
 0x16b   : > { %2248 = vmatprep.subr.bf16.mxu1 %v8638_v58  ;;  %v8710_v58 = vld [vmem:[#allocation7 + $0xa04] ss:$16 sps:$4 sm:$0xff]  }
 0x16d   : > { %2208 = vmatpush1.bf16.msra.mxu0 %v8633_v59  ;;  %v8705_v59 = vld [vmem:[#allocation7 + $0x800] ss:$16 sps:$4 sm:$0xff]  }
 0x16e   : > { %2249 = vmatpush1.bf16.msra.mxu1 %v8636_v60  ;;  %2209 = vmatprep.subr.bf16.mxu0 %v8641_v61  ;;  %v8708_v60 = vld [vmem:[#allocation7 + $0xa00] ss:$16 sps:$4 sm:$0xff]   ;;  %v8713_v61 = vld [vmem:[#allocation7 + $0x824] ss:$16 sps:$4 sm:$0xff]  }
 0x16f   : > { %2250 = vmatprep.subr.bf16.mxu1 %v8644_v62  ;;  %v8716_v62 = vld [vmem:[#allocation7 + $0xa24] ss:$16 sps:$4 sm:$0xff]  }
 0x171   : > { %2210 = vmatpush1.bf16.msra.mxu0 %v8639_v63  ;;  %v2411_v63 = vrot.slane %v10221_v32, 1  ;;  %v8906_v32 = vld [vmem:[#allocation7 + $0xe20] ss:$16 sps:$4 sm:$0xff]  }
 0x172   : > { %2251 = vmatpush1.bf16.msra.mxu1 %v8642_v0  ;;  %2211 = vmatprep.subr.bf16.mxu0 %v8647_v1  ;;  %v2413_v0 = vrot.slane %v10225_v36, 1  ;;  %v8711_v1 = vld [vmem:[#allocation7 + $0x820] ss:$16 sps:$4 sm:$0xff]   ;;  %v8914_v36 = vld [vmem:[#allocation7 + $0xe44] ss:$16 sps:$4 sm:$0xff]  }
 0x173   : > { %2252 = vmatprep.subr.bf16.mxu1 %v8650_v2  ;;  %v8714_v2 = vld [vmem:[#allocation7 + $0xa20] ss:$16 sps:$4 sm:$0xff]  }
 0x175   : > { %2212 = vmatpush1.bf16.msra.mxu0 %v8645_v3  ;;  %v8719_v3 = vld [vmem:[#allocation7 + $0x844] ss:$16 sps:$4 sm:$0xff]  }
 0x176   : > { %2253 = vmatpush1.bf16.msra.mxu1 %v8648_v4  ;;  %2213 = vmatprep.subr.bf16.mxu0 %v8653_v5  ;;  %v8717_v4 = vld [vmem:[#allocation7 + $0x840] ss:$16 sps:$4 sm:$0xff]   ;;  %v8722_v5 = vld [vmem:[#allocation7 + $0xa44] ss:$16 sps:$4 sm:$0xff]  }
 0x177   : > { %2254 = vmatprep.subr.bf16.mxu1 %v8656_v6  ;;  %v8720_v6 = vld [vmem:[#allocation7 + $0xa40] ss:$16 sps:$4 sm:$0xff]  }
 0x179   : > { %2214 = vmatpush1.bf16.msra.mxu0 %v8651_v7  ;;  %v8725_v7 = vld [vmem:[#allocation7 + $0x864] ss:$16 sps:$4 sm:$0xff]  }
 0x17a   : > { %2255 = vmatpush1.bf16.msra.mxu1 %v8654_v8  ;;  %2215 = vmatprep.subr.bf16.mxu0 %v8659_v9  ;;  %v8723_v8 = vld [vmem:[#allocation7 + $0x860] ss:$16 sps:$4 sm:$0xff]   ;;  %v8728_v9 = vld [vmem:[#allocation7 + $0xa64] ss:$16 sps:$4 sm:$0xff]  }
 0x17b   : > { %2256 = vmatprep.subr.bf16.mxu1 %v8662_v10  ;;  %v8726_v10 = vld [vmem:[#allocation7 + $0xa60] ss:$16 sps:$4 sm:$0xff]  }
 0x17d   : > { %2216 = vmatpush1.bf16.msra.mxu0 %v8657_v11  ;;  %v8731_v11 = vld [vmem:[#allocation7 + $0x884] ss:$16 sps:$4 sm:$0xff]  }
 0x17e   : > { %2257 = vmatpush1.bf16.msra.mxu1 %v8660_v12  ;;  %2217 = vmatprep.subr.bf16.mxu0 %v8665_v13  ;;  %v8729_v12 = vld [vmem:[#allocation7 + $0x880] ss:$16 sps:$4 sm:$0xff]   ;;  %v8734_v13 = vld [vmem:[#allocation7 + $0xa84] ss:$16 sps:$4 sm:$0xff]  }
 0x17f   : > { %2258 = vmatprep.subr.bf16.mxu1 %v8668_v14  ;;  %v8732_v14 = vld [vmem:[#allocation7 + $0xa80] ss:$16 sps:$4 sm:$0xff]  }
 0x181   : > { %2218 = vmatpush1.bf16.msra.mxu0 %v8663_v15  ;;  %v8737_v15 = vld [vmem:[#allocation7 + $0x8a4] ss:$16 sps:$4 sm:$0xff]  }
 0x182   : > { %2259 = vmatpush1.bf16.msra.mxu1 %v8666_v16  ;;  %2219 = vmatprep.subr.bf16.mxu0 %v8671_v17  ;;  %v8735_v16 = vld [vmem:[#allocation7 + $0x8a0] ss:$16 sps:$4 sm:$0xff]   ;;  %v8740_v17 = vld [vmem:[#allocation7 + $0xaa4] ss:$16 sps:$4 sm:$0xff]  }
 0x183   : > { %2260 = vmatprep.subr.bf16.mxu1 %v8674_v18  ;;  %v8738_v18 = vld [vmem:[#allocation7 + $0xaa0] ss:$16 sps:$4 sm:$0xff]  }
 0x185   : > { %2220 = vmatpush1.bf16.msra.mxu0 %v8669_v19  ;;  %v8743_v19 = vld [vmem:[#allocation7 + $0x8c4] ss:$16 sps:$4 sm:$0xff]  }
 0x186   : > { %2261 = vmatpush1.bf16.msra.mxu1 %v8672_v20  ;;  %2221 = vmatprep.subr.bf16.mxu0 %v8677_v53  ;;  %v8741_v53 = vld [vmem:[#allocation7 + $0x8c0] ss:$16 sps:$4 sm:$0xff]  }
 0x187   : > { %2262 = vmatprep.subr.bf16.mxu1 %v8680_v57  ;;  %v8746_v57 = vld [vmem:[#allocation7 + $0xac4] ss:$16 sps:$4 sm:$0xff]  }
 0x189   : > { %2222 = vmatpush1.bf16.msra.mxu0 %v8675_v21 }
 0x18a   : > { %2263 = vmatpush1.bf16.msra.mxu1 %v8678_v22  ;;  %2223 = vmatprep.subr.bf16.mxu0 %v8683_v23  ;;  %v8744_v23 = vld [vmem:[#allocation7 + $0xac0] ss:$16 sps:$4 sm:$0xff]  }
 0x18b   : > { %2264 = vmatprep.subr.bf16.mxu1 %v8686_v24  ;;  %v8749_v24 = vld [vmem:[#allocation7 + $0x8e4] ss:$16 sps:$4 sm:$0xff]  }
 0x18d   : > { %2224 = vmatpush1.bf16.msra.mxu0 %v8681_v25 }
 0x18e   : > { %2265 = vmatpush1.bf16.msra.mxu1 %v8684_v26  ;;  %2225 = vmatprep.subr.bf16.mxu0 %v8689_v27 }
 0x18f   : > { %2266 = vmatprep.subr.bf16.mxu1 %v8692_v28 }
 0x191   : > { %2226 = vmatpush1.bf16.msra.mxu0 %v8687_v29 }
 0x192   : > { %2267 = vmatpush1.bf16.msra.mxu1 %v8690_v30  ;;  %2227 = vmatprep.subr.bf16.mxu0 %v8695_v33 }
 0x193   : > { %2268 = vmatprep.subr.bf16.mxu1 %v8698_v34  ;;  %v8752_v34 = vld [vmem:[#allocation7 + $0xae4] ss:$16 sps:$4 sm:$0xff]  }
 0x195   : > { %2228 = vmatpush1.bf16.msra.mxu0 %v8693_v45  ;;  %v8747_v45 = vld [vmem:[#allocation7 + $0x8e0] ss:$16 sps:$4 sm:$0xff]  }
 0x196   : > { %2269 = vmatpush1.bf16.msra.mxu1 %v8696_v46  ;;  %2229 = vmatprep.subr.bf16.mxu0 %v8701_v47  ;;  %v8750_v46 = vld [vmem:[#allocation7 + $0xae0] ss:$16 sps:$4 sm:$0xff]   ;;  %v8755_v47 = vld [vmem:[#allocation7 + $0x904] ss:$16 sps:$4 sm:$0xff]  }
 0x197   : > { %2270 = vmatprep.subr.bf16.mxu1 %v8704_v49  ;;  %v8753_v49 = vld [vmem:[#allocation7 + $0x900] ss:$16 sps:$4 sm:$0xff]  }
 0x199   : > { %2230 = vmatpush1.bf16.msra.mxu0 %v8699_v50  ;;  %v8758_v50 = vld [vmem:[#allocation7 + $0xb04] ss:$16 sps:$4 sm:$0xff]  }
 0x19a   : > { %2271 = vmatpush1.bf16.msra.mxu1 %v8702_v55  ;;  %3058 = vmatprep.subr.bf16.mxu0 %v8707_v56  ;;  %v8756_v55 = vld [vmem:[#allocation7 + $0xb00] ss:$16 sps:$4 sm:$0xff]   ;;  %v8761_v56 = vld [vmem:[#allocation7 + $0x924] ss:$16 sps:$4 sm:$0xff]  }
 0x19b   : > { %3099 = vmatprep.subr.bf16.mxu1 %v8710_v58  ;;  %v8759_v58 = vld [vmem:[#allocation7 + $0x920] ss:$16 sps:$4 sm:$0xff]  }
 0x19c   : > { %2232 = vmatmul.mubr.bf16.vlgmr.msra.gmra.mrb[12].mxu0 %v10219_v31 }
 0x19d   : > { %2273 = vmatmul.mubr.bf16.vlgmr.msra.gmra.mrb[12].mxu1 %v10223_v35  ;;  %3059 = vmatpush1.bf16.msra.mxu0 %v8705_v59  ;;  %v8764_v59 = vld [vmem:[#allocation7 + $0xb24] ss:$16 sps:$4 sm:$0xff]  }
 0x19e   : > { %3100 = vmatpush1.bf16.msra.mxu1 %v8708_v60  ;;  %3060 = vmatprep.subr.bf16.mxu0 %v8713_v61  ;;  %v8762_v60 = vld [vmem:[#allocation7 + $0xb20] ss:$16 sps:$4 sm:$0xff]   ;;  %v8767_v61 = vld [vmem:[#allocation7 + $0x944] ss:$16 sps:$4 sm:$0xff]  }
 0x19f   : > { %3101 = vmatprep.subr.bf16.mxu1 %v8716_v62  ;;  %3090 = vmatprep.mubr.bf16.mxu0 %v2411_v63  ;;  %v8765_v62 = vld [vmem:[#allocation7 + $0x940] ss:$16 sps:$4 sm:$0xff]  }
 0x1a0   : > { %3131 = vmatprep.mubr.bf16.mxu1 %v2413_v0 }
 0x1a1   : > { %3061 = vmatpush1.bf16.msra.mxu0 %v8711_v1  ;;  %v8770_v1 = vld [vmem:[#allocation7 + $0xb44] ss:$16 sps:$4 sm:$0xff]  }
 0x1a2   : > { %3102 = vmatpush1.bf16.msra.mxu1 %v8714_v2  ;;  %3062 = vmatprep.subr.bf16.mxu0 %v8719_v3  ;;  %v8768_v2 = vld [vmem:[#allocation7 + $0xb40] ss:$16 sps:$4 sm:$0xff]   ;;  %v8773_v3 = vld [vmem:[#allocation7 + $0x964] ss:$16 sps:$4 sm:$0xff]  }
 0x1a3   : > { %3103 = vmatprep.subr.bf16.mxu1 %v8722_v5  ;;  %v8776_v5 = vld [vmem:[#allocation7 + $0xb64] ss:$16 sps:$4 sm:$0xff]  }
 0x1a5   : > { %3063 = vmatpush1.bf16.msra.mxu0 %v8717_v4  ;;  %v8771_v4 = vld [vmem:[#allocation7 + $0x960] ss:$16 sps:$4 sm:$0xff]  }
 0x1a6   : > { %3104 = vmatpush1.bf16.msra.mxu1 %v8720_v6  ;;  %3064 = vmatprep.subr.bf16.mxu0 %v8725_v7  ;;  %v8774_v6 = vld [vmem:[#allocation7 + $0xb60] ss:$16 sps:$4 sm:$0xff]   ;;  %v8779_v7 = vld [vmem:[#allocation7 + $0x984] ss:$16 sps:$4 sm:$0xff]  }
 0x1a7   : > { %3105 = vmatprep.subr.bf16.mxu1 %v8728_v9  ;;  %v8782_v9 = vld [vmem:[#allocation7 + $0xb84] ss:$16 sps:$4 sm:$0xff]  }
 0x1a9   : > { %3065 = vmatpush1.bf16.msra.mxu0 %v8723_v8  ;;  %v8777_v8 = vld [vmem:[#allocation7 + $0x980] ss:$16 sps:$4 sm:$0xff]  }
 0x1aa   : > { %3106 = vmatpush1.bf16.msra.mxu1 %v8726_v10  ;;  %3066 = vmatprep.subr.bf16.mxu0 %v8731_v11  ;;  %v8780_v10 = vld [vmem:[#allocation7 + $0xb80] ss:$16 sps:$4 sm:$0xff]   ;;  %v8785_v11 = vld [vmem:[#allocation7 + $0x9a4] ss:$16 sps:$4 sm:$0xff]  }
 0x1ab   : > { %3107 = vmatprep.subr.bf16.mxu1 %v8734_v13  ;;  %v8788_v13 = vld [vmem:[#allocation7 + $0xba4] ss:$16 sps:$4 sm:$0xff]  }
 0x1ad   : > { %3067 = vmatpush1.bf16.msra.mxu0 %v8729_v12  ;;  %v8783_v12 = vld [vmem:[#allocation7 + $0x9a0] ss:$16 sps:$4 sm:$0xff]  }
 0x1ae   : > { %3108 = vmatpush1.bf16.msra.mxu1 %v8732_v14  ;;  %3068 = vmatprep.subr.bf16.mxu0 %v8737_v15  ;;  %v8786_v14 = vld [vmem:[#allocation7 + $0xba0] ss:$16 sps:$4 sm:$0xff]   ;;  %v8791_v15 = vld [vmem:[#allocation7 + $0x9c4] ss:$16 sps:$4 sm:$0xff]  }
 0x1af   : > { %v1343_v20 = vpop.f32.mrb[0].mxu0  ;;  %3109 = vmatprep.subr.bf16.mxu1 %v8740_v17  ;;  %v8794_v17 = vld [vmem:[#allocation7 + $0xbc4] ss:$16 sps:$4 sm:$0xff]  }
 0x1b0   : > { %v1384_v21 = vpop.f32.mrb[0].mxu1  ;;  %v1345_v22 = vpop.f32.mrb[1].mxu0 }
 0x1b1   : > { %v10273_v25 = vadd.f32 %v1384_v21, %v1343_v20  ;;  %v1386_v26 = vpop.f32.mrb[1].mxu1  ;;  %v1347_v27 = vpop.f32.mrb[2].mxu0  ;;  %3069 = vmatpush1.bf16.msra.mxu0 %v8735_v16  ;;  %v8789_v16 = vld [vmem:[#allocation7 + $0x9c0] ss:$16 sps:$4 sm:$0xff]   ;;  %v8803_v21 = vld [vmem:[#allocation7 + $0x80c] ss:$16 sps:$4 sm:$0xff]  }
 0x1b2   : > { %v10275_v28 = vadd.f32 %v1386_v26, %v1345_v22  ;;  %v1388_v29 = vpop.f32.mrb[2].mxu1  ;;  %3110 = vmatpush1.bf16.msra.mxu1 %v8738_v18  ;;  %v1348_v30 = vpop.f32.mrb[3].mxu0  ;;  %3070 = vmatprep.subr.bf16.mxu0 %v8743_v19  ;;  %v8792_v18 = vld [vmem:[#allocation7 + $0xbc0] ss:$16 sps:$4 sm:$0xff]   ;;  %v8797_v19 = vld [vmem:[#allocation7 + $0x9e4] ss:$16 sps:$4 sm:$0xff]  }
 0x1b3   : > { %v1389_v33 = vpop.f32.mrb[3].mxu1  ;;  %3111 = vmatprep.subr.bf16.mxu1 %v8746_v57  ;;  %v8795_v20 = vld [vmem:[#allocation7 + $0x9e0] ss:$16 sps:$4 sm:$0xff]   ;;  %v8801_v22 = vld [vmem:[#allocation7 + $0x808] ss:$16 sps:$4 sm:$0xff]   ;;  %v2412_v29 = vrot.slane %v10223_v35, 1 }
 0x1b4   : > { %v8798_v57 = vld [vmem:[#allocation7 + $0xbe0] ss:$16 sps:$4 sm:$0xff]   ;;  %v8804_v26 = vld [vmem:[#allocation7 + $0xa08] ss:$16 sps:$4 sm:$0xff]   ;;  %v8809_v27 = vld [vmem:[#allocation7 + $0x82c] ss:$16 sps:$4 sm:$0xff]  }
 0x1b5   : > { %3071 = vmatpush1.bf16.msra.mxu0 %v8741_v53  ;;  %v8800_v53 = vld [vmem:[#allocation7 + $0xbe4] ss:$16 sps:$4 sm:$0xff]   ;;  %v8812_v30 = vld [vmem:[#allocation7 + $0xa2c] ss:$16 sps:$4 sm:$0xff]   ;;  %v8807_v33 = vld [vmem:[#allocation7 + $0x828] ss:$16 sps:$4 sm:$0xff]  }
 0x1b6   : > { %3112 = vmatpush1.bf16.msra.mxu1 %v8744_v23  ;;  %3072 = vmatprep.subr.bf16.mxu0 %v8749_v24  ;;  %v8806_v23 = vld [vmem:[#allocation7 + $0xa0c] ss:$16 sps:$4 sm:$0xff]   ;;  %v2410_v24 = vrot.slane %v10219_v31, 1  ;;  %v9002_v35 = vld [vmem:[#allocation7 + $0xe28] ss:$16 sps:$4 sm:$0xff]  }
 0x1b7   : > { %3113 = vmatprep.subr.bf16.mxu1 %v8752_v34  ;;  %v8810_v34 = vld [vmem:[#allocation7 + $0xa28] ss:$16 sps:$4 sm:$0xff]  }
 0x1b9   : > { %3073 = vmatpush1.bf16.msra.mxu0 %v8747_v45  ;;  %v8815_v45 = vld [vmem:[#allocation7 + $0x84c] ss:$16 sps:$4 sm:$0xff]  }
 0x1ba   : > { %3114 = vmatpush1.bf16.msra.mxu1 %v8750_v46  ;;  %3074 = vmatprep.subr.bf16.mxu0 %v8755_v47  ;;  %v8813_v46 = vld [vmem:[#allocation7 + $0x848] ss:$16 sps:$4 sm:$0xff]   ;;  %v8818_v47 = vld [vmem:[#allocation7 + $0xa4c] ss:$16 sps:$4 sm:$0xff]  }
 0x1bb   : > { %3115 = vmatprep.subr.bf16.mxu1 %v8758_v50  ;;  %v8821_v50 = vld [vmem:[#allocation7 + $0x86c] ss:$16 sps:$4 sm:$0xff]  }
 0x1bd   : > { %3075 = vmatpush1.bf16.msra.mxu0 %v8753_v49  ;;  %v8816_v49 = vld [vmem:[#allocation7 + $0xa48] ss:$16 sps:$4 sm:$0xff]  }
 0x1be   : > { %3116 = vmatpush1.bf16.msra.mxu1 %v8756_v55  ;;  %3076 = vmatprep.subr.bf16.mxu0 %v8761_v56  ;;  %v8819_v55 = vld [vmem:[#allocation7 + $0x868] ss:$16 sps:$4 sm:$0xff]   ;;  %v8824_v56 = vld [vmem:[#allocation7 + $0xa6c] ss:$16 sps:$4 sm:$0xff]  }
 0x1bf   : > { %3117 = vmatprep.subr.bf16.mxu1 %v8764_v59  ;;  %v8827_v59 = vld [vmem:[#allocation7 + $0x88c] ss:$16 sps:$4 sm:$0xff]  }
 0x1c1   : > { %3077 = vmatpush1.bf16.msra.mxu0 %v8759_v58  ;;  %v8822_v58 = vld [vmem:[#allocation7 + $0xa68] ss:$16 sps:$4 sm:$0xff]  }
 0x1c2   : > { %3118 = vmatpush1.bf16.msra.mxu1 %v8762_v60  ;;  %3078 = vmatprep.subr.bf16.mxu0 %v8767_v61  ;;  %v8825_v60 = vld [vmem:[#allocation7 + $0x888] ss:$16 sps:$4 sm:$0xff]   ;;  %v8830_v61 = vld [vmem:[#allocation7 + $0xa8c] ss:$16 sps:$4 sm:$0xff]  }
 0x1c3   : > { %3119 = vmatprep.subr.bf16.mxu1 %v8770_v1  ;;  %v8836_v1 = vld [vmem:[#allocation7 + $0xaac] ss:$16 sps:$4 sm:$0xff]  }
 0x1c5   : > { %3079 = vmatpush1.bf16.msra.mxu0 %v8765_v62  ;;  %v8831_v62 = vld [vmem:[#allocation7 + $0x8a8] ss:$16 sps:$4 sm:$0xff]  }
 0x1c6   : > { %3120 = vmatpush1.bf16.msra.mxu1 %v8768_v2  ;;  %3080 = vmatprep.subr.bf16.mxu0 %v8773_v3  ;;  %v8834_v2 = vld [vmem:[#allocation7 + $0xaa8] ss:$16 sps:$4 sm:$0xff]   ;;  %v8839_v3 = vld [vmem:[#allocation7 + $0x8cc] ss:$16 sps:$4 sm:$0xff]  }
 0x1c7   : > { %3121 = vmatprep.subr.bf16.mxu1 %v8776_v5  ;;  %v8837_v5 = vld [vmem:[#allocation7 + $0x8c8] ss:$16 sps:$4 sm:$0xff]  }
 0x1c9   : > { %3081 = vmatpush1.bf16.msra.mxu0 %v8771_v4 }
 0x1ca   : > { %3122 = vmatpush1.bf16.msra.mxu1 %v8774_v6  ;;  %3082 = vmatprep.subr.bf16.mxu0 %v8779_v7  ;;  %v8842_v6 = vld [vmem:[#allocation7 + $0xacc] ss:$16 sps:$4 sm:$0xff]  }
 0x1cb   : > { %3123 = vmatprep.subr.bf16.mxu1 %v8782_v9  ;;  %v8840_v9 = vld [vmem:[#allocation7 + $0xac8] ss:$16 sps:$4 sm:$0xff]  }
 0x1cd   : > { %3083 = vmatpush1.bf16.msra.mxu0 %v8777_v8 }
 0x1ce   : > { %3124 = vmatpush1.bf16.msra.mxu1 %v8780_v10  ;;  %3084 = vmatprep.subr.bf16.mxu0 %v8785_v11  ;;  %v8845_v10 = vld [vmem:[#allocation7 + $0x8ec] ss:$16 sps:$4 sm:$0xff]  }
 0x1cf   : > { %3125 = vmatprep.subr.bf16.mxu1 %v8788_v13 }
 0x1d1   : > { %3085 = vmatpush1.bf16.msra.mxu0 %v8783_v12 }
 0x1d2   : > { %3126 = vmatpush1.bf16.msra.mxu1 %v8786_v14  ;;  %3086 = vmatprep.subr.bf16.mxu0 %v8791_v15 }
 0x1d3   : > { %3127 = vmatprep.subr.bf16.mxu1 %v8794_v17 }
 0x1d5   : > { %3087 = vmatpush1.bf16.msra.mxu0 %v8789_v16 }
 0x1d6   : > { %3128 = vmatpush1.bf16.msra.mxu1 %v8792_v18  ;;  %3088 = vmatprep.subr.bf16.mxu0 %v8797_v19  ;;  %v8848_v18 = vld [vmem:[#allocation7 + $0xaec] ss:$16 sps:$4 sm:$0xff]   ;;  %v8843_v19 = vld [vmem:[#allocation7 + $0x8e8] ss:$16 sps:$4 sm:$0xff]  }
 0x1d7   : > { %3129 = vmatprep.subr.bf16.mxu1 %v8800_v53  ;;  %v8851_v53 = vld [vmem:[#allocation7 + $0x90c] ss:$16 sps:$4 sm:$0xff]  }
 0x1d9   : > { %3089 = vmatpush1.bf16.msra.mxu0 %v8795_v20  ;;  %v8846_v20 = vld [vmem:[#allocation7 + $0xae8] ss:$16 sps:$4 sm:$0xff]  }
 0x1da   : > { %3130 = vmatpush1.bf16.msra.mxu1 %v8798_v57  ;;  %3140 = vmatprep.subr.bf16.mxu0 %v8803_v21  ;;  %v8849_v57 = vld [vmem:[#allocation7 + $0x908] ss:$16 sps:$4 sm:$0xff]   ;;  %v8854_v21 = vld [vmem:[#allocation7 + $0xb0c] ss:$16 sps:$4 sm:$0xff]  }
 0x1db   : > { %3181 = vmatprep.subr.bf16.mxu1 %v8806_v23  ;;  %v8857_v23 = vld [vmem:[#allocation7 + $0x92c] ss:$16 sps:$4 sm:$0xff]  }
 0x1dc   : > { %3091 = vmatmul.mubr.bf16.vlgmr.msra.gmra.mrb[16].mxu0 %v2410_v24 }
 0x1dd   : > { %3132 = vmatmul.mubr.bf16.vlgmr.msra.gmra.mrb[16].mxu1 %v2412_v29  ;;  %3141 = vmatpush1.bf16.msra.mxu0 %v8801_v22  ;;  %v8852_v22 = vld [vmem:[#allocation7 + $0xb08] ss:$16 sps:$4 sm:$0xff]  }
 0x1de   : > { %3182 = vmatpush1.bf16.msra.mxu1 %v8804_v26  ;;  %3142 = vmatprep.subr.bf16.mxu0 %v8809_v27  ;;  %v8855_v26 = vld [vmem:[#allocation7 + $0x928] ss:$16 sps:$4 sm:$0xff]   ;;  %v8860_v27 = vld [vmem:[#allocation7 + $0xb2c] ss:$16 sps:$4 sm:$0xff]  }
 0x1df   : > { %3183 = vmatprep.subr.bf16.mxu1 %v8812_v30  ;;  %3172 = vmatprep.mubr.bf16.mxu0 %v2411_v63  ;;  %v8828_v63 = vld [vmem:[#allocation7 + $0xa88] ss:$16 sps:$4 sm:$0xff]  }
 0x1e0   : > { %3213 = vmatprep.mubr.bf16.mxu1 %v2413_v0  ;;  %v8833_v0 = vld [vmem:[#allocation7 + $0x8ac] ss:$16 sps:$4 sm:$0xff]   ;;  %v8858_v30 = vld [vmem:[#allocation7 + $0xb28] ss:$16 sps:$4 sm:$0xff]  }
 0x1e1   : > { %3143 = vmatpush1.bf16.msra.mxu0 %v8807_v33  ;;  %v8863_v33 = vld [vmem:[#allocation7 + $0x94c] ss:$16 sps:$4 sm:$0xff]  }
 0x1e2   : > { %3184 = vmatpush1.bf16.msra.mxu1 %v8810_v34  ;;  %3144 = vmatprep.subr.bf16.mxu0 %v8815_v45  ;;  %v8861_v34 = vld [vmem:[#allocation7 + $0x948] ss:$16 sps:$4 sm:$0xff]   ;;  %v8866_v45 = vld [vmem:[#allocation7 + $0xb4c] ss:$16 sps:$4 sm:$0xff]  }
 0x1e3   : > { %3185 = vmatprep.subr.bf16.mxu1 %v8818_v47  ;;  %v8869_v47 = vld [vmem:[#allocation7 + $0x96c] ss:$16 sps:$4 sm:$0xff]  }
 0x1e5   : > { %3145 = vmatpush1.bf16.msra.mxu0 %v8813_v46  ;;  %v8864_v46 = vld [vmem:[#allocation7 + $0xb48] ss:$16 sps:$4 sm:$0xff]  }
 0x1e6   : > { %3186 = vmatpush1.bf16.msra.mxu1 %v8816_v49  ;;  %3146 = vmatprep.subr.bf16.mxu0 %v8821_v50  ;;  %v8867_v49 = vld [vmem:[#allocation7 + $0x968] ss:$16 sps:$4 sm:$0xff]   ;;  %v8872_v50 = vld [vmem:[#allocation7 + $0xb6c] ss:$16 sps:$4 sm:$0xff]  }
 0x1e7   : > { %3187 = vmatprep.subr.bf16.mxu1 %v8824_v56  ;;  %v8875_v56 = vld [vmem:[#allocation7 + $0x98c] ss:$16 sps:$4 sm:$0xff]  }
 0x1e9   : > { %3147 = vmatpush1.bf16.msra.mxu0 %v8819_v55  ;;  %v8870_v55 = vld [vmem:[#allocation7 + $0xb68] ss:$16 sps:$4 sm:$0xff]  }
 0x1ea   : > { %3188 = vmatpush1.bf16.msra.mxu1 %v8822_v58  ;;  %3148 = vmatprep.subr.bf16.mxu0 %v8827_v59  ;;  %v8873_v58 = vld [vmem:[#allocation7 + $0x988] ss:$16 sps:$4 sm:$0xff]   ;;  %v8878_v59 = vld [vmem:[#allocation7 + $0xb8c] ss:$16 sps:$4 sm:$0xff]  }
 0x1eb   : > { %3189 = vmatprep.subr.bf16.mxu1 %v8830_v61  ;;  %v8881_v61 = vld [vmem:[#allocation7 + $0x9ac] ss:$16 sps:$4 sm:$0xff]  }
 0x1ed   : > { %3149 = vmatpush1.bf16.msra.mxu0 %v8825_v60  ;;  %v8876_v60 = vld [vmem:[#allocation7 + $0xb88] ss:$16 sps:$4 sm:$0xff]  }
 0x1ee   : > { %3190 = vmatpush1.bf16.msra.mxu1 %v8828_v63  ;;  %3150 = vmatprep.subr.bf16.mxu0 %v8833_v0  ;;  %v8879_v63 = vld [vmem:[#allocation7 + $0x9a8] ss:$16 sps:$4 sm:$0xff]   ;;  %v8884_v0 = vld [vmem:[#allocation7 + $0xbac] ss:$16 sps:$4 sm:$0xff]  }
 0x1ef   : > { %v1425_v4 = vpop.f32.mrb[4].mxu0  ;;  %3191 = vmatprep.subr.bf16.mxu1 %v8836_v1  ;;  %v8887_v1 = vld [vmem:[#allocation7 + $0x9cc] ss:$16 sps:$4 sm:$0xff]  }
 0x1f0   : > { %v1466_v7 = vpop.f32.mrb[4].mxu1  ;;  %v1427_v8 = vpop.f32.mrb[5].mxu0 }
 0x1f1   : > { %v10287_v11 = vadd.f32 %v1466_v7, %v1425_v4  ;;  %v1468_v12 = vpop.f32.mrb[5].mxu1  ;;  %v1429_v13 = vpop.f32.mrb[6].mxu0  ;;  %3151 = vmatpush1.bf16.msra.mxu0 %v8831_v62  ;;  %v8882_v62 = vld [vmem:[#allocation7 + $0xba8] ss:$16 sps:$4 sm:$0xff]   ;;  %v8896_v7 = vld [vmem:[#allocation7 + $0xbec] ss:$16 sps:$4 sm:$0xff]  }
 0x1f2   : > { %v10289_v14 = vadd.f32 %v1468_v12, %v1427_v8  ;;  %v1470_v15 = vpop.f32.mrb[6].mxu1  ;;  %3192 = vmatpush1.bf16.msra.mxu1 %v8834_v2  ;;  %v1430_v16 = vpop.f32.mrb[7].mxu0  ;;  %3152 = vmatprep.subr.bf16.mxu0 %v8839_v3  ;;  %v8885_v2 = vld [vmem:[#allocation7 + $0x9c8] ss:$16 sps:$4 sm:$0xff]   ;;  %v8890_v3 = vld [vmem:[#allocation7 + $0xbcc] ss:$16 sps:$4 sm:$0xff]  }
 0x1f3   : > { %v1471_v17 = vpop.f32.mrb[7].mxu1  ;;  %3193 = vmatprep.subr.bf16.mxu1 %v8842_v6  ;;  %v8888_v4 = vld [vmem:[#allocation7 + $0xbc8] ss:$16 sps:$4 sm:$0xff]   ;;  %v8897_v12 = vld [vmem:[#allocation7 + $0xc00] ss:$16 sps:$4 sm:$0xff]   ;;  %v3359_v15 = vrot.slane %v647_v38, 2 }
 0x1f4   : > { %v8891_v6 = vld [vmem:[#allocation7 + $0x9e8] ss:$16 sps:$4 sm:$0xff]   ;;  %v8902_v13 = vld [vmem:[#allocation7 + $0xe04] ss:$16 sps:$4 sm:$0xff]   ;;  %v3364_v16 = vrot.slane %v659_v41, 1 }
 0x1f5   : > { %3153 = vmatpush1.bf16.msra.mxu0 %v8837_v5  ;;  %v8893_v5 = vld [vmem:[#allocation7 + $0x9ec] ss:$16 sps:$4 sm:$0xff]   ;;  %v8894_v8 = vld [vmem:[#allocation7 + $0xbe8] ss:$16 sps:$4 sm:$0xff]   ;;  %v8900_v17 = vld [vmem:[#allocation7 + $0xe00] ss:$16 sps:$4 sm:$0xff]  }
 0x1f6   : > { %3194 = vmatpush1.bf16.msra.mxu1 %v8840_v9  ;;  %3154 = vmatprep.subr.bf16.mxu0 %v8845_v10  ;;  %v8899_v9 = vld [vmem:[#allocation7 + $0xc04] ss:$16 sps:$4 sm:$0xff]   ;;  %v3358_v10 = vrot.slane %v645_v37, 1  ;;  %v8903_v37 = vld [vmem:[#allocation7 + $0xc20] ss:$16 sps:$4 sm:$0xff]  }
 0x1f7   : > { %3195 = vmatprep.subr.bf16.mxu1 %v8848_v18  ;;  %v8905_v18 = vld [vmem:[#allocation7 + $0xc24] ss:$16 sps:$4 sm:$0xff]   ;;  %v8909_v41 = vld [vmem:[#allocation7 + $0xc40] ss:$16 sps:$4 sm:$0xff]  }
 0x1f8   : > { %v8911_v38 = vld [vmem:[#allocation7 + $0xc44] ss:$16 sps:$4 sm:$0xff]  }
 0x1f9   : > { %3155 = vmatpush1.bf16.msra.mxu0 %v8843_v19  ;;  %v3365_v19 = vrot.slane %v661_v42, 2  ;;  %v8912_v42 = vld [vmem:[#allocation7 + $0xe40] ss:$16 sps:$4 sm:$0xff]  }
 0x1fa   : > { %3196 = vmatpush1.bf16.msra.mxu1 %v8846_v20  ;;  %3156 = vmatprep.subr.bf16.mxu0 %v8851_v53  ;;  %v8908_v20 = vld [vmem:[#allocation7 + $0xe24] ss:$16 sps:$4 sm:$0xff]   ;;  %v10299_v53 = vor.u32 %v3359_v15, %v3358_v10  ;;  %v8948_v10 = vld [vmem:[#allocation7 + $0xf00] ss:$16 sps:$4 sm:$0xff]  }
 0x1fb   : > { %3197 = vmatprep.subr.bf16.mxu1 %v8854_v21  ;;  %v8917_v21 = vld [vmem:[#allocation7 + $0xc64] ss:$16 sps:$4 sm:$0xff]   ;;  %v8951_v15 = vld [vmem:[#allocation7 + $0xd20] ss:$16 sps:$4 sm:$0xff]  }
 0x1fd   : > { %3157 = vmatpush1.bf16.msra.mxu0 %v8849_v57  ;;  %v10303_v57 = vor.u32 %v3365_v19, %v3364_v16  ;;  %v8954_v16 = vld [vmem:[#allocation7 + $0xf20] ss:$16 sps:$4 sm:$0xff]  }
 0x1fe   : > { %3198 = vmatpush1.bf16.msra.mxu1 %v8852_v22  ;;  %3158 = vmatprep.subr.bf16.mxu0 %v8857_v23  ;;  %v8915_v22 = vld [vmem:[#allocation7 + $0xc60] ss:$16 sps:$4 sm:$0xff]  }
 0x1ff   : > { %3199 = vmatprep.subr.bf16.mxu1 %v8860_v27  ;;  %v8918_v23 = vld [vmem:[#allocation7 + $0xe60] ss:$16 sps:$4 sm:$0xff]  }
 0x200   : > { %v8921_v27 = vld [vmem:[#allocation7 + $0xc80] ss:$16 sps:$4 sm:$0xff]  }
 0x201   : > { %3159 = vmatpush1.bf16.msra.mxu0 %v8855_v26  ;;  %v8926_v26 = vld [vmem:[#allocation7 + $0xe84] ss:$16 sps:$4 sm:$0xff]   ;;  %v8957_v19 = vld [vmem:[#allocation7 + $0xd40] ss:$16 sps:$4 sm:$0xff]  }
 0x202   : > { %3200 = vmatpush1.bf16.msra.mxu1 %v8858_v30  ;;  %3160 = vmatprep.subr.bf16.mxu0 %v8863_v33  ;;  %v8924_v30 = vld [vmem:[#allocation7 + $0xe80] ss:$16 sps:$4 sm:$0xff]   ;;  %v8929_v33 = vld [vmem:[#allocation7 + $0xca4] ss:$16 sps:$4 sm:$0xff]  }
 0x203   : > { %3201 = vmatprep.subr.bf16.mxu1 %v8866_v45  ;;  %v8927_v45 = vld [vmem:[#allocation7 + $0xca0] ss:$16 sps:$4 sm:$0xff]  }
 0x205   : > { %3161 = vmatpush1.bf16.msra.mxu0 %v8861_v34  ;;  %v8932_v34 = vld [vmem:[#allocation7 + $0xea4] ss:$16 sps:$4 sm:$0xff]  }
 0x206   : > { %3202 = vmatpush1.bf16.msra.mxu1 %v8864_v46  ;;  %3162 = vmatprep.subr.bf16.mxu0 %v8869_v47  ;;  %v8930_v46 = vld [vmem:[#allocation7 + $0xea0] ss:$16 sps:$4 sm:$0xff]   ;;  %v8935_v47 = vld [vmem:[#allocation7 + $0xcc4] ss:$16 sps:$4 sm:$0xff]  }
 0x207   : > { %3203 = vmatprep.subr.bf16.mxu1 %v8872_v50 }
 0x209   : > { %3163 = vmatpush1.bf16.msra.mxu0 %v8867_v49  ;;  %v8938_v49 = vld [vmem:[#allocation7 + $0xec4] ss:$16 sps:$4 sm:$0xff]  }
 0x20a   : > { %3204 = vmatpush1.bf16.msra.mxu1 %v8870_v55  ;;  %3164 = vmatprep.subr.bf16.mxu0 %v8875_v56  ;;  %v8933_v55 = vld [vmem:[#allocation7 + $0xcc0] ss:$16 sps:$4 sm:$0xff]  }
 0x20b   : > { %3205 = vmatprep.subr.bf16.mxu1 %v8878_v59 }
 0x20d   : > { %3165 = vmatpush1.bf16.msra.mxu0 %v8873_v58 }
 0x20e   : > { %3206 = vmatpush1.bf16.msra.mxu1 %v8876_v60  ;;  %3166 = vmatprep.subr.bf16.mxu0 %v8881_v61  ;;  %v8936_v60 = vld [vmem:[#allocation7 + $0xec0] ss:$16 sps:$4 sm:$0xff]   ;;  %v8941_v61 = vld [vmem:[#allocation7 + $0xce4] ss:$16 sps:$4 sm:$0xff]  }
 0x20f   : > { %3207 = vmatprep.subr.bf16.mxu1 %v8884_v0 }
 0x211   : > { %3167 = vmatpush1.bf16.msra.mxu0 %v8879_v63 }
 0x212   : > { %3208 = vmatpush1.bf16.msra.mxu1 %v8882_v62  ;;  %3168 = vmatprep.subr.bf16.mxu0 %v8887_v1  ;;  %v8944_v1 = vld [vmem:[#allocation7 + $0xee4] ss:$16 sps:$4 sm:$0xff]  }
 0x213   : > { %3209 = vmatprep.subr.bf16.mxu1 %v8890_v3 }
 0x215   : > { %3169 = vmatpush1.bf16.msra.mxu0 %v8885_v2 }
 0x216   : > { %3210 = vmatpush1.bf16.msra.mxu1 %v8888_v4  ;;  %3170 = vmatprep.subr.bf16.mxu0 %v8893_v5 }
 0x217   : > { %3211 = vmatprep.subr.bf16.mxu1 %v8896_v7  ;;  %v8942_v7 = vld [vmem:[#allocation7 + $0xee0] ss:$16 sps:$4 sm:$0xff]  }
 0x219   : > { %3171 = vmatpush1.bf16.msra.mxu0 %v8891_v6 }
 0x21a   : > { %3212 = vmatpush1.bf16.msra.mxu1 %v8894_v8  ;;  %4011 = vmatprep.subr.bf16.mxu0 %v8899_v9  ;;  %v8947_v8 = vld [vmem:[#allocation7 + $0xd04] ss:$16 sps:$4 sm:$0xff]  }
 0x21b   : > { %4052 = vmatprep.subr.bf16.mxu1 %v8902_v13  ;;  %v8950_v9 = vld [vmem:[#allocation7 + $0xf04] ss:$16 sps:$4 sm:$0xff]  }
 0x21c   : > { %3173 = vmatmul.mubr.bf16.vlgmr.msra.gmra.mrb[20].mxu0 %v2410_v24  ;;  %v8920_v24 = vld [vmem:[#allocation7 + $0xe64] ss:$16 sps:$4 sm:$0xff]  }
 0x21d   : > { %3214 = vmatmul.mubr.bf16.vlgmr.msra.gmra.mrb[20].mxu1 %v2412_v29  ;;  %4012 = vmatpush1.bf16.msra.mxu0 %v8897_v12  ;;  %v8923_v29 = vld [vmem:[#allocation7 + $0xc84] ss:$16 sps:$4 sm:$0xff]  }
 0x21e   : > { %4053 = vmatpush1.bf16.msra.mxu1 %v8900_v17  ;;  %4013 = vmatprep.subr.bf16.mxu0 %v8905_v18  ;;  %v8953_v12 = vld [vmem:[#allocation7 + $0xd24] ss:$16 sps:$4 sm:$0xff]  }
 0x21f   : > { %4054 = vmatprep.subr.bf16.mxu1 %v8908_v20  ;;  %4043 = vmatprep.mubr.bf16.mxu0 %v10299_v53  ;;  %v8956_v13 = vld [vmem:[#allocation7 + $0xf24] ss:$16 sps:$4 sm:$0xff]   ;;  %v8960_v20 = vld [vmem:[#allocation7 + $0xf40] ss:$16 sps:$4 sm:$0xff]  }
 0x220   : > { %4084 = vmatprep.mubr.bf16.mxu1 %v10303_v57  ;;  %v8959_v17 = vld [vmem:[#allocation7 + $0xd44] ss:$16 sps:$4 sm:$0xff]  }
 0x221   : > { %4014 = vmatpush1.bf16.msra.mxu0 %v8903_v37  ;;  %v8962_v18 = vld [vmem:[#allocation7 + $0xf44] ss:$16 sps:$4 sm:$0xff]  }
 0x222   : > { %4055 = vmatpush1.bf16.msra.mxu1 %v8906_v32  ;;  %4015 = vmatprep.subr.bf16.mxu0 %v8911_v38  ;;  %v8965_v37 = vld [vmem:[#allocation7 + $0xd64] ss:$16 sps:$4 sm:$0xff]   ;;  %v8963_v38 = vld [vmem:[#allocation7 + $0xd60] ss:$16 sps:$4 sm:$0xff]  }
 0x223   : > { %4056 = vmatprep.subr.bf16.mxu1 %v8914_v36  ;;  %v8968_v32 = vld [vmem:[#allocation7 + $0xf64] ss:$16 sps:$4 sm:$0xff]   ;;  %v8966_v36 = vld [vmem:[#allocation7 + $0xf60] ss:$16 sps:$4 sm:$0xff]  }
 0x225   : > { %4016 = vmatpush1.bf16.msra.mxu0 %v8909_v41  ;;  %v8971_v41 = vld [vmem:[#allocation7 + $0xd84] ss:$16 sps:$4 sm:$0xff]  }
 0x226   : > { %4057 = vmatpush1.bf16.msra.mxu1 %v8912_v42  ;;  %4017 = vmatprep.subr.bf16.mxu0 %v8917_v21  ;;  %v8974_v42 = vld [vmem:[#allocation7 + $0xf84] ss:$16 sps:$4 sm:$0xff]   ;;  %v8969_v21 = vld [vmem:[#allocation7 + $0xd80] ss:$16 sps:$4 sm:$0xff]  }
 0x227   : > { %4058 = vmatprep.subr.bf16.mxu1 %v8920_v24  ;;  %v8972_v24 = vld [vmem:[#allocation7 + $0xf80] ss:$16 sps:$4 sm:$0xff]  }
 0x229   : > { %4018 = vmatpush1.bf16.msra.mxu0 %v8915_v22  ;;  %v8977_v22 = vld [vmem:[#allocation7 + $0xda4] ss:$16 sps:$4 sm:$0xff]  }
 0x22a   : > { %4059 = vmatpush1.bf16.msra.mxu1 %v8918_v23  ;;  %4019 = vmatprep.subr.bf16.mxu0 %v8923_v29  ;;  %v8980_v23 = vld [vmem:[#allocation7 + $0xfa4] ss:$16 sps:$4 sm:$0xff]   ;;  %v8975_v29 = vld [vmem:[#allocation7 + $0xda0] ss:$16 sps:$4 sm:$0xff]  }
 0x22b   : > { %4060 = vmatprep.subr.bf16.mxu1 %v8926_v26  ;;  %v8978_v26 = vld [vmem:[#allocation7 + $0xfa0] ss:$16 sps:$4 sm:$0xff]  }
 0x22d   : > { %4020 = vmatpush1.bf16.msra.mxu0 %v8921_v27  ;;  %v8983_v27 = vld [vmem:[#allocation7 + $0xdc4] ss:$16 sps:$4 sm:$0xff]  }
 0x22e   : > { %4061 = vmatpush1.bf16.msra.mxu1 %v8924_v30  ;;  %4021 = vmatprep.subr.bf16.mxu0 %v8929_v33  ;;  %v8986_v30 = vld [vmem:[#allocation7 + $0xfc4] ss:$16 sps:$4 sm:$0xff]   ;;  %v8981_v33 = vld [vmem:[#allocation7 + $0xdc0] ss:$16 sps:$4 sm:$0xff]  }
 0x22f   : > { %v2151_v50 = vpop.f32.mrb[8].mxu0  ;;  %4062 = vmatprep.subr.bf16.mxu1 %v8932_v34  ;;  %v8984_v34 = vld [vmem:[#allocation7 + $0xfc0] ss:$16 sps:$4 sm:$0xff]  }
 0x230   : > { %v2152_v56 = vadd.f32 %v2151_v50, %v10273_v25  ;;  %v2192_v58 = vpop.f32.mrb[8].mxu1  ;;  %v2153_v59 = vpop.f32.mrb[9].mxu0  ;;  %v8939_v25 = vld [vmem:[#allocation7 + $0xce0] ss:$16 sps:$4 sm:$0xff]  }
 0x231   : > { %v2154_v63 = vadd.f32 %v2153_v59, %v10275_v28  ;;  %v2194_v0 = vpop.f32.mrb[9].mxu1  ;;  %v2155_v62 = vpop.f32.mrb[10].mxu0  ;;  %4022 = vmatpush1.bf16.msra.mxu0 %v8927_v45  ;;  %v8945_v28 = vld [vmem:[#allocation7 + $0xd00] ss:$16 sps:$4 sm:$0xff]   ;;  %v8989_v45 = vld [vmem:[#allocation7 + $0xde4] ss:$16 sps:$4 sm:$0xff]  }
 0x232   : > { %v10311_v2 = vadd.f32 %v2192_v58, %v2152_v56  ;;  %v2196_v3 = vpop.f32.mrb[10].mxu1  ;;  %4063 = vmatpush1.bf16.msra.mxu1 %v8930_v46  ;;  %v2156_v4 = vpop.f32.mrb[11].mxu0  ;;  %4023 = vmatprep.subr.bf16.mxu0 %v8935_v47  ;;  %v8992_v46 = vld [vmem:[#allocation7 + $0xfe4] ss:$16 sps:$4 sm:$0xff]   ;;  %v8987_v47 = vld [vmem:[#allocation7 + $0xde0] ss:$16 sps:$4 sm:$0xff]  }
 0x233   : > { %v10313_v5 = vadd.f32 %v2194_v0, %v2154_v63  ;;  %v2197_v6 = vpop.f32.mrb[11].mxu1  ;;  %4064 = vmatprep.subr.bf16.mxu1 %v8938_v49  ;;  %v3355_v49 = vrot.slane %v638_v39, 1  ;;  %v8990_v50 = vld [vmem:[#allocation7 + $0xfe0] ss:$16 sps:$4 sm:$0xff]   ;;  %v8995_v56 = vld [vmem:[#allocation7 + $0xc0c] ss:$16 sps:$4 sm:$0xff]  }
 0x234   : > { %v3361_v58 = vrot.slane %v652_v43, 1  ;;  %v3362_v59 = vrot.slane %v654_v44, 2  ;;  %v8996_v39 = vld [vmem:[#allocation7 + $0xe08] ss:$16 sps:$4 sm:$0xff]   ;;  %v9001_v0 = vld [vmem:[#allocation7 + $0xc2c] ss:$16 sps:$4 sm:$0xff]  }
 0x235   : > { %4024 = vmatpush1.bf16.msra.mxu0 %v8933_v55  ;;  %v3356_v55 = vrot.slane %v640_v40, 2  ;;  %v9004_v40 = vld [vmem:[#allocation7 + $0xe2c] ss:$16 sps:$4 sm:$0xff]   ;;  %v8999_v43 = vld [vmem:[#allocation7 + $0xc28] ss:$16 sps:$4 sm:$0xff]  }
 0x236   : > { %4065 = vmatpush1.bf16.msra.mxu1 %v8936_v60  ;;  %4025 = vmatprep.subr.bf16.mxu0 %v8941_v61  ;;  %v8998_v60 = vld [vmem:[#allocation7 + $0xe0c] ss:$16 sps:$4 sm:$0xff]   ;;  %v8993_v61 = vld [vmem:[#allocation7 + $0xc08] ss:$16 sps:$4 sm:$0xff]   ;;  %v10325_v31 = vor.u32 %v3362_v59, %v3361_v58 }
 0x237   : > { %4066 = vmatprep.subr.bf16.mxu1 %v8944_v1  ;;  %v10323_v63 = vor.u32 %v3356_v55, %v3355_v49  ;;  %v9007_v44 = vld [vmem:[#allocation7 + $0xc4c] ss:$16 sps:$4 sm:$0xff]   ;;  %v9005_v1 = vld [vmem:[#allocation7 + $0xc48] ss:$16 sps:$4 sm:$0xff]  }
 0x238   : > { %v9010_v62 = vld [vmem:[#allocation7 + $0xe4c] ss:$16 sps:$4 sm:$0xff]   ;;  %v9008_v3 = vld [vmem:[#allocation7 + $0xe48] ss:$16 sps:$4 sm:$0xff]  }
 0x239   : > { %4026 = vmatpush1.bf16.msra.mxu0 %v8939_v25  ;;  %v9013_v4 = vld [vmem:[#allocation7 + $0xc6c] ss:$16 sps:$4 sm:$0xff]   ;;  %v9011_v25 = vld [vmem:[#allocation7 + $0xc68] ss:$16 sps:$4 sm:$0xff]  }
 0x23a   : > { %4067 = vmatpush1.bf16.msra.mxu1 %v8942_v7  ;;  %4027 = vmatprep.subr.bf16.mxu0 %v8947_v8  ;;  %v9016_v6 = vld [vmem:[#allocation7 + $0xe6c] ss:$16 sps:$4 sm:$0xff]   ;;  %v9014_v7 = vld [vmem:[#allocation7 + $0xe68] ss:$16 sps:$4 sm:$0xff]  }
 0x23b   : > { %4068 = vmatprep.subr.bf16.mxu1 %v8950_v9  ;;  %v9019_v8 = vld [vmem:[#allocation7 + $0xc8c] ss:$16 sps:$4 sm:$0xff]   ;;  %v9050_v49 = vld [vmem:[#allocation7 + $0xf28] ss:$16 sps:$4 sm:$0xff]  }
 0x23c   : > { %v9022_v9 = vld [vmem:[#allocation7 + $0xe8c] ss:$16 sps:$4 sm:$0xff]   ;;  %v9056_v58 = vld [vmem:[#allocation7 + $0xf48] ss:$16 sps:$4 sm:$0xff]  }
 0x23d   : > { %4028 = vmatpush1.bf16.msra.mxu0 %v8945_v28  ;;  %v9017_v28 = vld [vmem:[#allocation7 + $0xc88] ss:$16 sps:$4 sm:$0xff]   ;;  %v9058_v55 = vld [vmem:[#allocation7 + $0xf4c] ss:$16 sps:$4 sm:$0xff]  }
 0x23e   : > { %4069 = vmatpush1.bf16.msra.mxu1 %v8948_v10  ;;  %4029 = vmatprep.subr.bf16.mxu0 %v8953_v12  ;;  %v9020_v10 = vld [vmem:[#allocation7 + $0xe88] ss:$16 sps:$4 sm:$0xff]   ;;  %v9028_v12 = vld [vmem:[#allocation7 + $0xeac] ss:$16 sps:$4 sm:$0xff]  }
 0x23f   : > { %4070 = vmatprep.subr.bf16.mxu1 %v8956_v13  ;;  %v9026_v13 = vld [vmem:[#allocation7 + $0xea8] ss:$16 sps:$4 sm:$0xff]   ;;  %v9061_v59 = vld [vmem:[#allocation7 + $0xd6c] ss:$16 sps:$4 sm:$0xff]  }
 0x241   : > { %4030 = vmatpush1.bf16.msra.mxu0 %v8951_v15  ;;  %v9031_v15 = vld [vmem:[#allocation7 + $0xccc] ss:$16 sps:$4 sm:$0xff]  }
 0x242   : > { %4071 = vmatpush1.bf16.msra.mxu1 %v8954_v16  ;;  %4031 = vmatprep.subr.bf16.mxu0 %v8959_v17  ;;  %v9034_v16 = vld [vmem:[#allocation7 + $0xecc] ss:$16 sps:$4 sm:$0xff]  }
 0x243   : > { %4072 = vmatprep.subr.bf16.mxu1 %v8962_v18 }
 0x245   : > { %4032 = vmatpush1.bf16.msra.mxu0 %v8957_v19 }
 0x246   : > { %4073 = vmatpush1.bf16.msra.mxu1 %v8960_v20  ;;  %4033 = vmatprep.subr.bf16.mxu0 %v8965_v37 }
 0x247   : > { %4074 = vmatprep.subr.bf16.mxu1 %v8968_v32 }
 0x249   : > { %4034 = vmatpush1.bf16.msra.mxu0 %v8963_v38 }
 0x24a   : > { %4075 = vmatpush1.bf16.msra.mxu1 %v8966_v36  ;;  %4035 = vmatprep.subr.bf16.mxu0 %v8971_v41  ;;  %v9029_v36 = vld [vmem:[#allocation7 + $0xcc8] ss:$16 sps:$4 sm:$0xff]  }
 0x24b   : > { %4076 = vmatprep.subr.bf16.mxu1 %v8974_v42 }
 0x24d   : > { %4036 = vmatpush1.bf16.msra.mxu0 %v8969_v21 }
 0x24e   : > { %4077 = vmatpush1.bf16.msra.mxu1 %v8972_v24  ;;  %4037 = vmatprep.subr.bf16.mxu0 %v8977_v22  ;;  %v9032_v24 = vld [vmem:[#allocation7 + $0xec8] ss:$16 sps:$4 sm:$0xff]   ;;  %v9037_v22 = vld [vmem:[#allocation7 + $0xcec] ss:$16 sps:$4 sm:$0xff]  }
 0x24f   : > { %4078 = vmatprep.subr.bf16.mxu1 %v8980_v23 }
 0x251   : > { %4038 = vmatpush1.bf16.msra.mxu0 %v8975_v29 }
 0x252   : > { %4079 = vmatpush1.bf16.msra.mxu1 %v8978_v26  ;;  %4039 = vmatprep.subr.bf16.mxu0 %v8983_v27  ;;  %v9035_v26 = vld [vmem:[#allocation7 + $0xce8] ss:$16 sps:$4 sm:$0xff]   ;;  %v9043_v27 = vld [vmem:[#allocation7 + $0xd0c] ss:$16 sps:$4 sm:$0xff]  }
 0x253   : > { %4080 = vmatprep.subr.bf16.mxu1 %v8986_v30  ;;  %v9046_v30 = vld [vmem:[#allocation7 + $0xf0c] ss:$16 sps:$4 sm:$0xff]  }
 0x255   : > { %4040 = vmatpush1.bf16.msra.mxu0 %v8981_v33  ;;  %v9041_v33 = vld [vmem:[#allocation7 + $0xd08] ss:$16 sps:$4 sm:$0xff]  }
 0x256   : > { %4081 = vmatpush1.bf16.msra.mxu1 %v8984_v34  ;;  %4041 = vmatprep.subr.bf16.mxu0 %v8989_v45  ;;  %v9044_v34 = vld [vmem:[#allocation7 + $0xf08] ss:$16 sps:$4 sm:$0xff]   ;;  %v9049_v45 = vld [vmem:[#allocation7 + $0xd2c] ss:$16 sps:$4 sm:$0xff]  }
 0x257   : > { %4082 = vmatprep.subr.bf16.mxu1 %v8992_v46  ;;  %v9052_v46 = vld [vmem:[#allocation7 + $0xf2c] ss:$16 sps:$4 sm:$0xff]  }
 0x259   : > { %4042 = vmatpush1.bf16.msra.mxu0 %v8987_v47  ;;  %v9047_v47 = vld [vmem:[#allocation7 + $0xd28] ss:$16 sps:$4 sm:$0xff]  }
 0x25a   : > { %4083 = vmatpush1.bf16.msra.mxu1 %v8990_v50  ;;  %4093 = vmatprep.subr.bf16.mxu0 %v8995_v56  ;;  %v9055_v50 = vld [vmem:[#allocation7 + $0xd4c] ss:$16 sps:$4 sm:$0xff]   ;;  %v9053_v56 = vld [vmem:[#allocation7 + $0xd48] ss:$16 sps:$4 sm:$0xff]  }
 0x25b   : > { %4134 = vmatprep.subr.bf16.mxu1 %v8998_v60  ;;  %v9064_v60 = vld [vmem:[#allocation7 + $0xf6c] ss:$16 sps:$4 sm:$0xff]  }
 0x25c   : > { %4044 = vmatmul.mubr.bf16.vlgmr.msra.gmra.mrb[24].mxu0 %v10323_v63 }
 0x25d   : > { %4085 = vmatmul.mubr.bf16.vlgmr.msra.gmra.mrb[24].mxu1 %v10325_v31  ;;  %4094 = vmatpush1.bf16.msra.mxu0 %v8993_v61  ;;  %v9059_v61 = vld [vmem:[#allocation7 + $0xd68] ss:$16 sps:$4 sm:$0xff]  }
 0x25e   : > { %4135 = vmatpush1.bf16.msra.mxu1 %v8996_v39  ;;  %4095 = vmatprep.subr.bf16.mxu0 %v9001_v0  ;;  %v9062_v39 = vld [vmem:[#allocation7 + $0xf68] ss:$16 sps:$4 sm:$0xff]   ;;  %v9067_v0 = vld [vmem:[#allocation7 + $0xd8c] ss:$16 sps:$4 sm:$0xff]  }
 0x25f   : > { %4136 = vmatprep.subr.bf16.mxu1 %v9004_v40  ;;  %4125 = vmatprep.mubr.bf16.mxu0 %v10299_v53  ;;  %v9025_v53 = vld [vmem:[#allocation7 + $0xcac] ss:$16 sps:$4 sm:$0xff]  }
 0x260   : > { %4166 = vmatprep.mubr.bf16.mxu1 %v10303_v57  ;;  %v9023_v57 = vld [vmem:[#allocation7 + $0xca8] ss:$16 sps:$4 sm:$0xff]   ;;  %v9070_v40 = vld [vmem:[#allocation7 + $0xf8c] ss:$16 sps:$4 sm:$0xff]  }
 0x261   : > { %4096 = vmatpush1.bf16.msra.mxu0 %v8999_v43  ;;  %v9065_v43 = vld [vmem:[#allocation7 + $0xd88] ss:$16 sps:$4 sm:$0xff]  }
 0x262   : > { %4137 = vmatpush1.bf16.msra.mxu1 %v9002_v35  ;;  %4097 = vmatprep.subr.bf16.mxu0 %v9007_v44  ;;  %v9068_v35 = vld [vmem:[#allocation7 + $0xf88] ss:$16 sps:$4 sm:$0xff]   ;;  %v9073_v44 = vld [vmem:[#allocation7 + $0xdac] ss:$16 sps:$4 sm:$0xff]  }
 0x263   : > { %4138 = vmatprep.subr.bf16.mxu1 %v9010_v62  ;;  %v9076_v62 = vld [vmem:[#allocation7 + $0xfac] ss:$16 sps:$4 sm:$0xff]  }
 0x265   : > { %4098 = vmatpush1.bf16.msra.mxu0 %v9005_v1  ;;  %v9071_v1 = vld [vmem:[#allocation7 + $0xda8] ss:$16 sps:$4 sm:$0xff]  }
 0x266   : > { %4139 = vmatpush1.bf16.msra.mxu1 %v9008_v3  ;;  %4099 = vmatprep.subr.bf16.mxu0 %v9013_v4  ;;  %v9074_v3 = vld [vmem:[#allocation7 + $0xfa8] ss:$16 sps:$4 sm:$0xff]   ;;  %v9079_v4 = vld [vmem:[#allocation7 + $0xdcc] ss:$16 sps:$4 sm:$0xff]  }
 0x267   : > { %4140 = vmatprep.subr.bf16.mxu1 %v9016_v6  ;;  %v9082_v6 = vld [vmem:[#allocation7 + $0xfcc] ss:$16 sps:$4 sm:$0xff]  }
 0x269   : > { %4100 = vmatpush1.bf16.msra.mxu0 %v9011_v25  ;;  %v9077_v25 = vld [vmem:[#allocation7 + $0xdc8] ss:$16 sps:$4 sm:$0xff]  }
 0x26a   : > { %4141 = vmatpush1.bf16.msra.mxu1 %v9014_v7  ;;  %4101 = vmatprep.subr.bf16.mxu0 %v9019_v8  ;;  %v9080_v7 = vld [vmem:[#allocation7 + $0xfc8] ss:$16 sps:$4 sm:$0xff]   ;;  %v9085_v8 = vld [vmem:[#allocation7 + $0xdec] ss:$16 sps:$4 sm:$0xff]  }
 0x26b   : > { %4142 = vmatprep.subr.bf16.mxu1 %v9022_v9  ;;  %v9088_v9 = vld [vmem:[#allocation7 + $0xfec] ss:$16 sps:$4 sm:$0xff]  }
 0x26d   : > { %4102 = vmatpush1.bf16.msra.mxu0 %v9017_v28  ;;  %v9083_v28 = vld [vmem:[#allocation7 + $0xde8] ss:$16 sps:$4 sm:$0xff]  }
 0x26e   : > { %4143 = vmatpush1.bf16.msra.mxu1 %v9020_v10  ;;  %4103 = vmatprep.subr.bf16.mxu0 %v9025_v53  ;;  %v9086_v10 = vld [vmem:[#allocation7 + $0xfe8] ss:$16 sps:$4 sm:$0xff]  }
 0x26f   : > { %v2233_v17 = vpop.f32.mrb[12].mxu0  ;;  %4144 = vmatprep.subr.bf16.mxu1 %v9028_v12  ;;  %v9091_v53 = vld [vmem:[#allocation10 + $0x404] ss:$16 sps:$4 sm:$0xff]   ;;  %v9089_v12 = vld [vmem:[#allocation10 + $0x400] ss:$16 sps:$4 sm:$0xff]  }
 0x270   : > { %v2234_v18 = vadd.f32 %v2233_v17, %v10287_v11  ;;  %v2274_v19 = vpop.f32.mrb[12].mxu1  ;;  %v2235_v20 = vpop.f32.mrb[13].mxu0  ;;  %v9040_v11 = vld [vmem:[#allocation7 + $0xeec] ss:$16 sps:$4 sm:$0xff]   ;;  %v9100_v17 = vld [vmem:[#allocation10 + $0x464] ss:$16 sps:$4 sm:$0xff]  }
 0x271   : > { %v2236_v37 = vadd.f32 %v2235_v20, %v10289_v14  ;;  %v2276_v32 = vpop.f32.mrb[13].mxu1  ;;  %v2237_v38 = vpop.f32.mrb[14].mxu0  ;;  %4104 = vmatpush1.bf16.msra.mxu0 %v9023_v57  ;;  %v9038_v14 = vld [vmem:[#allocation7 + $0xee8] ss:$16 sps:$4 sm:$0xff]   ;;  %v9101_v20 = vld [vmem:[#allocation10 + $0x480] ss:$16 sps:$4 sm:$0xff]  }
 0x272   : > { %v10333_v41 = vadd.f32 %v2274_v19, %v2234_v18  ;;  %v2278_v42 = vpop.f32.mrb[14].mxu1  ;;  %4145 = vmatpush1.bf16.msra.mxu1 %v9026_v13  ;;  %v2238_v21 = vpop.f32.mrb[15].mxu0  ;;  %4105 = vmatprep.subr.bf16.mxu0 %v9031_v15  ;;  %v9094_v57 = vld [vmem:[#allocation10 + $0x424] ss:$16 sps:$4 sm:$0xff]   ;;  %v9092_v13 = vld [vmem:[#allocation10 + $0x420] ss:$16 sps:$4 sm:$0xff]  }
 0x273   : > { %v10335_v23 = vadd.f32 %v2276_v32, %v2236_v37  ;;  %v2279_v29 = vpop.f32.mrb[15].mxu1  ;;  %4146 = vmatprep.subr.bf16.mxu1 %v9034_v16  ;;  %v9097_v15 = vld [vmem:[#allocation10 + $0x444] ss:$16 sps:$4 sm:$0xff]   ;;  %v9095_v16 = vld [vmem:[#allocation10 + $0x440] ss:$16 sps:$4 sm:$0xff]  }
 0x274   : > { %v9098_v18 = vld [vmem:[#allocation10 + $0x460] ss:$16 sps:$4 sm:$0xff]   ;;  %v9103_v19 = vld [vmem:[#allocation10 + $0x484] ss:$16 sps:$4 sm:$0xff]  }
 0x275   : > { %4106 = vmatpush1.bf16.msra.mxu0 %v9029_v36  ;;  %v9106_v37 = vld [vmem:[#allocation10 + $0x4a4] ss:$16 sps:$4 sm:$0xff]  }
 0x276   : > { %4147 = vmatpush1.bf16.msra.mxu1 %v9032_v24  ;;  %4107 = vmatprep.subr.bf16.mxu0 %v9037_v22  ;;  %v9107_v22 = vld [vmem:[#allocation10 + $0x4c0] ss:$16 sps:$4 sm:$0xff]  }
 0x277   : > { %4148 = vmatprep.subr.bf16.mxu1 %v9040_v11 }
 0x279   : > { %4108 = vmatpush1.bf16.msra.mxu0 %v9035_v26 }
 0x27a   : > { %4149 = vmatpush1.bf16.msra.mxu1 %v9038_v14  ;;  %4109 = vmatprep.subr.bf16.mxu0 %v9043_v27  ;;  %v9112_v14 = vld [vmem:[#allocation10 + $0x4e4] ss:$16 sps:$4 sm:$0xff]  }
 0x27b   : > { %4150 = vmatprep.subr.bf16.mxu1 %v9046_v30 }
 0x27d   : > { %4110 = vmatpush1.bf16.msra.mxu0 %v9041_v33 }
 0x27e   : > { %4151 = vmatpush1.bf16.msra.mxu1 %v9044_v34  ;;  %4111 = vmatprep.subr.bf16.mxu0 %v9049_v45  ;;  %v9110_v34 = vld [vmem:[#allocation10 + $0x4e0] ss:$16 sps:$4 sm:$0xff]   ;;  %v9115_v45 = vld [vmem:[#allocation10 + $0x504] ss:$16 sps:$4 sm:$0xff]  }
 0x27f   : > { %4152 = vmatprep.subr.bf16.mxu1 %v9052_v46  ;;  %v9113_v46 = vld [vmem:[#allocation10 + $0x500] ss:$16 sps:$4 sm:$0xff]  }
 0x281   : > { %4112 = vmatpush1.bf16.msra.mxu0 %v9047_v47  ;;  %v9118_v47 = vld [vmem:[#allocation10 + $0x524] ss:$16 sps:$4 sm:$0xff]  }
 0x282   : > { %4153 = vmatpush1.bf16.msra.mxu1 %v9050_v49  ;;  %4113 = vmatprep.subr.bf16.mxu0 %v9055_v50  ;;  %v9894_v49 = vmov 0   ;;  %v9116_v50 = vld [vmem:[#allocation10 + $0x520] ss:$16 sps:$4 sm:$0xff]  }
 0x283   : > { %4154 = vmatprep.subr.bf16.mxu1 %v9058_v55  ;;  %4217 = vst [vmem:[#allocation3] sm:$0x77] %v9894_v49  ;;  %4218 = vst [vmem:[#allocation3 + $0x8] sm:$0x77] %v9894_v49  ;;  %v9119_v55 = vld [vmem:[#allocation10 + $0x540] ss:$16 sps:$4 sm:$0xff]  }
 0x284   : > { %v9231_v49 = vld [vmem:[#allocation10 + $0x7e4] ss:$16 sps:$4 sm:$0xff]  }
 0x285   : > { %4114 = vmatpush1.bf16.msra.mxu0 %v9053_v56  ;;  %v9122_v56 = vld [vmem:[#allocation10 + $0x560] ss:$16 sps:$4 sm:$0xff]  }
 0x286   : > { %4155 = vmatpush1.bf16.msra.mxu1 %v9056_v58  ;;  %4115 = vmatprep.subr.bf16.mxu0 %v9061_v59  ;;  %v9127_v58 = vld [vmem:[#allocation10 + $0x584] ss:$16 sps:$4 sm:$0xff]   ;;  %v9125_v59 = vld [vmem:[#allocation10 + $0x580] ss:$16 sps:$4 sm:$0xff]  }
 0x287   : > { %4156 = vmatprep.subr.bf16.mxu1 %v9064_v60  ;;  %v9130_v60 = vld [vmem:[#allocation10 + $0x5a4] ss:$16 sps:$4 sm:$0xff]  }
 0x289   : > { %4116 = vmatpush1.bf16.msra.mxu0 %v9059_v61  ;;  %v9128_v61 = vld [vmem:[#allocation10 + $0x5a0] ss:$16 sps:$4 sm:$0xff]  }
 0x28a   : > { %4157 = vmatpush1.bf16.msra.mxu1 %v9062_v39  ;;  %4117 = vmatprep.subr.bf16.mxu0 %v9067_v0  ;;  %v9133_v39 = vld [vmem:[#allocation10 + $0x5c4] ss:$16 sps:$4 sm:$0xff]   ;;  %v9131_v0 = vld [vmem:[#allocation10 + $0x5c0] ss:$16 sps:$4 sm:$0xff]  }
 0x28b   : > { %4158 = vmatprep.subr.bf16.mxu1 %v9070_v40  ;;  %v9136_v40 = vld [vmem:[#allocation10 + $0x5e4] ss:$16 sps:$4 sm:$0xff]  }
 0x28d   : > { %4118 = vmatpush1.bf16.msra.mxu0 %v9065_v43  ;;  %v9141_v43 = vld [vmem:[#allocation10 + $0x604] ss:$16 sps:$4 sm:$0xff]  }
 0x28e   : > { %4159 = vmatpush1.bf16.msra.mxu1 %v9068_v35  ;;  %4119 = vmatprep.subr.bf16.mxu0 %v9073_v44  ;;  %v9139_v35 = vld [vmem:[#allocation10 + $0x600] ss:$16 sps:$4 sm:$0xff]  }
 0x28f   : > { %4160 = vmatprep.subr.bf16.mxu1 %v9076_v62  ;;  %v9134_v44 = vld [vmem:[#allocation10 + $0x5e0] ss:$16 sps:$4 sm:$0xff]   ;;  %v9144_v62 = vld [vmem:[#allocation10 + $0x40c] ss:$16 sps:$4 sm:$0xff]  }
 0x291   : > { %4120 = vmatpush1.bf16.msra.mxu0 %v9071_v1  ;;  %v9145_v1 = vld [vmem:[#allocation10 + $0x620] ss:$16 sps:$4 sm:$0xff]  }
 0x292   : > { %4161 = vmatpush1.bf16.msra.mxu1 %v9074_v3  ;;  %4121 = vmatprep.subr.bf16.mxu0 %v9079_v4  ;;  %v9147_v3 = vld [vmem:[#allocation10 + $0x624] ss:$16 sps:$4 sm:$0xff]   ;;  %v9151_v4 = vld [vmem:[#allocation10 + $0x640] ss:$16 sps:$4 sm:$0xff]  }
 0x293   : > { %4162 = vmatprep.subr.bf16.mxu1 %v9082_v6  ;;  %v9153_v6 = vld [vmem:[#allocation10 + $0x644] ss:$16 sps:$4 sm:$0xff]  }
 0x295   : > { %4122 = vmatpush1.bf16.msra.mxu0 %v9077_v25  ;;  %v9157_v25 = vld [vmem:[#allocation10 + $0x660] ss:$16 sps:$4 sm:$0xff]  }
 0x296   : > { %4163 = vmatpush1.bf16.msra.mxu1 %v9080_v7  ;;  %4123 = vmatprep.subr.bf16.mxu0 %v9085_v8  ;;  %v9159_v7 = vld [vmem:[#allocation10 + $0x664] ss:$16 sps:$4 sm:$0xff]   ;;  %v9163_v8 = vld [vmem:[#allocation10 + $0x680] ss:$16 sps:$4 sm:$0xff]  }
 0x297   : > { %4164 = vmatprep.subr.bf16.mxu1 %v9088_v9  ;;  %v9165_v9 = vld [vmem:[#allocation10 + $0x684] ss:$16 sps:$4 sm:$0xff]  }
 0x299   : > { %4124 = vmatpush1.bf16.msra.mxu0 %v9083_v28  ;;  %v9169_v28 = vld [vmem:[#allocation10 + $0x6a0] ss:$16 sps:$4 sm:$0xff]  }
 0x29a   : > { %4165 = vmatpush1.bf16.msra.mxu1 %v9086_v10  ;;  %5203 = vmatprep.subr.bf16.mxu0 %v9091_v53  ;;  %v9171_v10 = vld [vmem:[#allocation10 + $0x6a4] ss:$16 sps:$4 sm:$0xff]   ;;  %v9175_v53 = vld [vmem:[#allocation10 + $0x6c0] ss:$16 sps:$4 sm:$0xff]  }
 0x29b   : > { %5244 = vmatprep.subr.bf16.mxu1 %v9141_v43 }
 0x29c   : > { %4126 = vmatmul.mubr.bf16.vlgmr.msra.gmra.mrb[28].mxu0 %v10323_v63  ;;  %v9104_v63 = vld [vmem:[#allocation10 + $0x4a0] ss:$16 sps:$4 sm:$0xff]  }
 0x29d   : > { %4167 = vmatmul.mubr.bf16.vlgmr.msra.gmra.mrb[28].mxu1 %v10325_v31  ;;  %5204 = vmatpush1.bf16.msra.mxu0 %v9089_v12  ;;  %v9109_v31 = vld [vmem:[#allocation10 + $0x4c4] ss:$16 sps:$4 sm:$0xff]  }
 0x29e   : > { %5205 = vmatprep.subr.bf16.mxu0 %v9094_v57  ;;  %5245 = vmatpush1.bf16.msra.mxu1 %v9139_v35  ;;  %v9177_v12 = vld [vmem:[#allocation10 + $0x6c4] ss:$16 sps:$4 sm:$0xff]  }
 0x29f   : > { %5246 = vmatprep.subr.bf16.mxu1 %v9147_v3 }
 0x2a1   : > { %5206 = vmatpush1.bf16.msra.mxu0 %v9092_v13  ;;  %v9183_v13 = vld [vmem:[#allocation10 + $0x6e4] ss:$16 sps:$4 sm:$0xff]  }
 0x2a2   : > { %5207 = vmatprep.subr.bf16.mxu0 %v9097_v15  ;;  %5247 = vmatpush1.bf16.msra.mxu1 %v9145_v1 }
 0x2a3   : > { %5248 = vmatprep.subr.bf16.mxu1 %v9153_v6 }
 0x2a5   : > { %5208 = vmatpush1.bf16.msra.mxu0 %v9095_v16 }
 0x2a6   : > { %5209 = vmatprep.subr.bf16.mxu0 %v9100_v17  ;;  %5249 = vmatpush1.bf16.msra.mxu1 %v9151_v4  ;;  %v9181_v17 = vld [vmem:[#allocation10 + $0x6e0] ss:$16 sps:$4 sm:$0xff]  }
 0x2a7   : > { %5250 = vmatprep.subr.bf16.mxu1 %v9159_v7 }
 0x2a9   : > { %5210 = vmatpush1.bf16.msra.mxu0 %v9098_v18 }
 0x2aa   : > { %5211 = vmatprep.subr.bf16.mxu0 %v9103_v19  ;;  %5251 = vmatpush1.bf16.msra.mxu1 %v9157_v25 }
 0x2ab   : > { %5252 = vmatprep.subr.bf16.mxu1 %v9165_v9  ;;  %v9232_v9 = vld [vmem:[#allocation10 + $0x5e8] ss:$16 sps:$4 sm:$0xff]  }
 0x2ad   : > { %5212 = vmatpush1.bf16.msra.mxu0 %v9101_v20 }
 0x2ae   : > { %5213 = vmatprep.subr.bf16.mxu0 %v9106_v37  ;;  %5253 = vmatpush1.bf16.msra.mxu1 %v9163_v8 }
 0x2af   : > { %v3092_v32 = vpop.f32.mrb[16].mxu0  ;;  %5254 = vmatprep.subr.bf16.mxu1 %v9171_v10 }
 0x2b0   : > { %v3133_v38 = vpop.f32.mrb[16].mxu1  ;;  %v3094_v36 = vpop.f32.mrb[17].mxu0 }
 0x2b1   : > { %v3134_v42 = vadd.f32 %v3133_v38, %v3092_v32  ;;  %v3135_v21 = vpop.f32.mrb[17].mxu1  ;;  %v3096_v24 = vpop.f32.mrb[18].mxu0  ;;  %5214 = vmatpush1.bf16.msra.mxu0 %v9104_v63 }
 0x2b2   : > { %v3136_v29 = vadd.f32 %v3135_v21, %v3094_v36  ;;  %v3137_v11 = vpop.f32.mrb[18].mxu1  ;;  %v3097_v26 = vpop.f32.mrb[19].mxu0  ;;  %5215 = vmatprep.subr.bf16.mxu0 %v9109_v31  ;;  %5255 = vmatpush1.bf16.msra.mxu1 %v9169_v28  ;;  %v9189_v36 = vld [vmem:[#allocation10 + $0x704] ss:$16 sps:$4 sm:$0xff]   ;;  %v9187_v21 = vld [vmem:[#allocation10 + $0x700] ss:$16 sps:$4 sm:$0xff]  }
 0x2b3   : > { %v10340_v27 = vadd.f32 %v3134_v42, %v10311_v2  ;;  %v3138_v30 = vpop.f32.mrb[19].mxu1  ;;  %v9121_v2 = vld [vmem:[#allocation10 + $0x544] ss:$16 sps:$4 sm:$0xff]   ;;  %5256 = vmatprep.subr.bf16.mxu1 %v9177_v12  ;;  %v9199_v11 = vld [vmem:[#allocation10 + $0x740] ss:$16 sps:$4 sm:$0xff]  }
 0x2b4   : > { %v10343_v33 = vadd.f32 %v3136_v29, %v10313_v5  ;;  %v9124_v5 = vld [vmem:[#allocation10 + $0x564] ss:$16 sps:$4 sm:$0xff]   ;;  %v9211_v30 = vld [vmem:[#allocation10 + $0x780] ss:$16 sps:$4 sm:$0xff]  }
 0x2b5   : > { %5216 = vmatpush1.bf16.msra.mxu0 %v9107_v22  ;;  %v9195_v24 = vld [vmem:[#allocation10 + $0x724] ss:$16 sps:$4 sm:$0xff]   ;;  %v9193_v22 = vld [vmem:[#allocation10 + $0x720] ss:$16 sps:$4 sm:$0xff]  }
 0x2b6   : > { %5217 = vmatprep.subr.bf16.mxu0 %v9112_v14  ;;  %5257 = vmatpush1.bf16.msra.mxu1 %v9175_v53  ;;  %v9201_v29 = vld [vmem:[#allocation10 + $0x744] ss:$16 sps:$4 sm:$0xff]   ;;  %v9205_v14 = vld [vmem:[#allocation10 + $0x760] ss:$16 sps:$4 sm:$0xff]  }
 0x2b7   : > { %5258 = vmatprep.subr.bf16.mxu1 %v9183_v13  ;;  %v9207_v26 = vld [vmem:[#allocation10 + $0x764] ss:$16 sps:$4 sm:$0xff]  }
 0x2b8   : > { %v4256_v53 = vld [vmem:[#allocation3] sm:$0x77] }
 0x2b9   : > { %5218 = vmatpush1.bf16.msra.mxu0 %v9110_v34  ;;  %v9219_v34 = vld [vmem:[#allocation10 + $0x7a4] ss:$16 sps:$4 sm:$0xff]  }
 0x2ba   : > { %5219 = vmatprep.subr.bf16.mxu0 %v9115_v45  ;;  %5259 = vmatpush1.bf16.msra.mxu1 %v9181_v17  ;;  %v9223_v45 = vld [vmem:[#allocation10 + $0x7c0] ss:$16 sps:$4 sm:$0xff]  }
 0x2bb   : > { %5260 = vmatprep.subr.bf16.mxu1 %v9189_v36 }
 0x2bd   : > { %5220 = vmatpush1.bf16.msra.mxu0 %v9113_v46  ;;  %v9225_v46 = vld [vmem:[#allocation10 + $0x7c4] ss:$16 sps:$4 sm:$0xff]  }
 0x2be   : > { %5221 = vmatprep.subr.bf16.mxu0 %v9118_v47  ;;  %5261 = vmatpush1.bf16.msra.mxu1 %v9187_v21  ;;  %v9229_v47 = vld [vmem:[#allocation10 + $0x7e0] ss:$16 sps:$4 sm:$0xff]   ;;  %v9150_v21 = vld [vmem:[#allocation10 + $0x42c] ss:$16 sps:$4 sm:$0xff]  }
 0x2bf   : > { %5262 = vmatprep.subr.bf16.mxu1 %v9195_v24  ;;  %v9148_v24 = vld [vmem:[#allocation10 + $0x428] ss:$16 sps:$4 sm:$0xff]  }
 0x2c1   : > { %5222 = vmatpush1.bf16.msra.mxu0 %v9116_v50  ;;  %v9239_v50 = vld [vmem:[#allocation10 + $0x60c] ss:$16 sps:$4 sm:$0xff]  }
 0x2c2   : > { %5223 = vmatprep.subr.bf16.mxu0 %v9121_v2  ;;  %5263 = vmatpush1.bf16.msra.mxu1 %v9193_v22  ;;  %v10351_v2 = vld [vmem:[#allocation9] sm:$0xf] }
 0x2c3   : > { %5264 = vmatprep.subr.bf16.mxu1 %v9201_v29  ;;  %v9156_v22 = vld [vmem:[#allocation10 + $0x44c] ss:$16 sps:$4 sm:$0xff]   ;;  %v9154_v29 = vld [vmem:[#allocation10 + $0x448] ss:$16 sps:$4 sm:$0xff]  }
 0x2c5   : > { %5224 = vmatpush1.bf16.msra.mxu0 %v9119_v55 }
 0x2c6   : > { %5225 = vmatprep.subr.bf16.mxu0 %v9124_v5  ;;  %5265 = vmatpush1.bf16.msra.mxu1 %v9199_v11  ;;  %v9162_v11 = vld [vmem:[#allocation10 + $0x46c] ss:$16 sps:$4 sm:$0xff]  }
 0x2c7   : > { %5266 = vmatprep.subr.bf16.mxu1 %v9207_v26  ;;  %v9160_v26 = vld [vmem:[#allocation10 + $0x468] ss:$16 sps:$4 sm:$0xff]  }
 0x2c9   : > { %5226 = vmatpush1.bf16.msra.mxu0 %v9122_v56 }
 0x2ca   : > { %5227 = vmatprep.subr.bf16.mxu0 %v9127_v58  ;;  %5267 = vmatpush1.bf16.msra.mxu1 %v9205_v14  ;;  %v9168_v14 = vld [vmem:[#allocation10 + $0x48c] ss:$16 sps:$4 sm:$0xff]  }
 0x2cd   : > { %5228 = vmatpush1.bf16.msra.mxu0 %v9125_v59  ;;  %v4184_v59 = vrot.slane %v10351_v2, %v10172_v48 }
 0x2ce   : > { %5229 = vmatprep.subr.bf16.mxu0 %v9130_v60 }
 0x2d1   : > { %5230 = vmatpush1.bf16.msra.mxu0 %v9128_v61 }
 0x2d2   : > { %5231 = vmatprep.subr.bf16.mxu0 %v9133_v39 }
 0x2d5   : > { %5232 = vmatpush1.bf16.msra.mxu0 %v9131_v0  ;;  %v4188_v0 = vrot.slane %v10351_v2, %v10179_v51 }
 0x2d6   : > { %5233 = vmatprep.subr.bf16.mxu0 %v9136_v40 }
 0x2d9   : > { %5234 = vmatpush1.bf16.msra.mxu0 %v9134_v44 }
 0x2da   : > { %5285 = vmatprep.subr.bf16.mxu0 %v9144_v62 }
 0x2ef   : > { %v3174_v57 = vpop.f32.mrb[20].mxu0 }
 0x2f0   : > { %v3215_v15 = vpop.f32.mrb[20].mxu1  ;;  %v3176_v16 = vpop.f32.mrb[21].mxu0 }
 0x2f1   : > { %v3216_v18 = vadd.f32 %v3215_v15, %v3174_v57  ;;  %v3217_v19 = vpop.f32.mrb[21].mxu1  ;;  %v3178_v20 = vpop.f32.mrb[22].mxu0 }
 0x2f2   : > { %v3218_v37 = vadd.f32 %v3217_v19, %v3176_v16  ;;  %v3219_v63 = vpop.f32.mrb[22].mxu1  ;;  %v3179_v31 = vpop.f32.mrb[23].mxu0 }
 0x2f3   : > { %v10346_v32 = vadd.f32 %v3216_v18, %v10333_v41  ;;  %v3220_v38 = vpop.f32.mrb[23].mxu1  ;;  %v9213_v41 = vld [vmem:[#allocation10 + $0x784] ss:$16 sps:$4 sm:$0xff]  }
 0x2f4   : > { %v10349_v42 = vadd.f32 %v3218_v37, %v10335_v23  ;;  %5268 = vmatprep.subr.bf16.mxu1 %v9213_v41  ;;  %v9217_v23 = vld [vmem:[#allocation10 + $0x7a0] ss:$16 sps:$4 sm:$0xff]   ;;  %v9142_v38 = vld [vmem:[#allocation10 + $0x408] ss:$16 sps:$4 sm:$0xff]  }
 0x2f5   : > { %5269 = vmatpush1.bf16.msra.mxu1 %v9211_v30  ;;  %v9166_v41 = vld [vmem:[#allocation10 + $0x488] ss:$16 sps:$4 sm:$0xff]   ;;  %v9174_v30 = vld [vmem:[#allocation10 + $0x4ac] ss:$16 sps:$4 sm:$0xff]  }
 0x2f6   : > { %5270 = vmatprep.subr.bf16.mxu1 %v9219_v34  ;;  %v9180_v34 = vld [vmem:[#allocation10 + $0x4cc] ss:$16 sps:$4 sm:$0xff]  }
 0x2f9   : > { %5271 = vmatpush1.bf16.msra.mxu1 %v9217_v23  ;;  %v9172_v23 = vld [vmem:[#allocation10 + $0x4a8] ss:$16 sps:$4 sm:$0xff]  }
 0x2fa   : > { %5272 = vmatprep.subr.bf16.mxu1 %v9225_v46  ;;  %v9186_v46 = vld [vmem:[#allocation10 + $0x4ec] ss:$16 sps:$4 sm:$0xff]  }
 0x2fd   : > { %5273 = vmatpush1.bf16.msra.mxu1 %v9223_v45  ;;  %v9178_v45 = vld [vmem:[#allocation10 + $0x4c8] ss:$16 sps:$4 sm:$0xff]  }
 0x2fe   : > { %5274 = vmatprep.subr.bf16.mxu1 %v9231_v49 }
 0x301   : > { %5275 = vmatpush1.bf16.msra.mxu1 %v9229_v47  ;;  %v9184_v47 = vld [vmem:[#allocation10 + $0x4e8] ss:$16 sps:$4 sm:$0xff]  }
 0x302   : > { %5326 = vmatprep.subr.bf16.mxu1 %v9239_v50  ;;  %v9192_v50 = vld [vmem:[#allocation10 + $0x50c] ss:$16 sps:$4 sm:$0xff]  }
 0x32f   : > { %v4045_v55 = vpop.f32.mrb[24].mxu0 }
 0x330   : > { %v4086_v5 = vpop.f32.mrb[24].mxu1  ;;  %v4047_v56 = vpop.f32.mrb[25].mxu0 }
 0x331   : > { %v4087_v58 = vadd.f32 %v4086_v5, %v4045_v55  ;;  %v4088_v60 = vpop.f32.mrb[25].mxu1  ;;  %v4049_v61 = vpop.f32.mrb[26].mxu0 }
 0x332   : > { %v4089_v39 = vadd.f32 %v4088_v60, %v4047_v56  ;;  %v4090_v40 = vpop.f32.mrb[26].mxu1  ;;  %v4050_v43 = vpop.f32.mrb[27].mxu0 }
 0x333   : > { %v4175_v35 = vadd.f32 %v4087_v58, %v10340_v27  ;;  %v4091_v44 = vpop.f32.mrb[27].mxu1  ;;  %v4192_v58 = vrot.slane %v10351_v2, %v10181_v52  ;;  %v9190_v43 = vld [vmem:[#allocation10 + $0x508] ss:$16 sps:$4 sm:$0xff]  }
 0x334   : > { %v4176_v62 = vadd.f32 %v4089_v39, %v10343_v33  ;;  %v4196_v39 = vrot.slane %v10351_v2, %v10183_v54 }
 0x335   : > { %v4201_v1 = vadd.f32 %v4184_v59, %v4175_v35 }
 0x336   : > { %v4202_v3 = vadd.f32 %v4188_v0, %v4176_v62  ;;  %v9198_v62 = vld [vmem:[#allocation10 + $0x52c] ss:$16 sps:$4 sm:$0xff]  }
 0x337   : > { %vm4205_vm14 = vcmp.gt.f32.partialorder %v4201_v1, 0.0  ;;  %v4209_v4 = vmul.f32 0.2, %v4201_v1 }
 0x338   : > { %vm4206_vm15 = vcmp.gt.f32.partialorder %v4202_v3, 0.0  ;;  %v4210_v6 = vmul.f32 0.2, %v4202_v3 }
 0x339   : > { %v4213_v25 = vsel %vm4205_vm14, %v4201_v1, %v4209_v4 }
 0x33a   : > { %v4214_v7 = vsel %vm4206_vm15, %v4202_v3, %v4210_v6  ;;  %v9196_v6 = vld [vmem:[#allocation10 + $0x528] ss:$16 sps:$4 sm:$0xff]  }
 0x33b   : > { %v8224_v8 = vpack.c.bf16 %v4214_v7, %v4213_v25  ;;  %v9204_v7 = vld [vmem:[#allocation10 + $0x54c] ss:$16 sps:$4 sm:$0xff]  }
 0x33d   : > { %v4234_v27 = vshrl.u32 %v8224_v8, 16  ;;  %v4237_v10 = vshll.u32 %v8224_v8, 16 }
 0x33f   : > { %v4236_v28 = vrot.slane %v4234_v27, 7 }
 0x341   : > { %v4239_v12 = vor.u32 %v4237_v10, %v4236_v28  ;;  %v9202_v28 = vld [vmem:[#allocation10 + $0x548] ss:$16 sps:$4 sm:$0xff]   ;;  %v9210_v10 = vld [vmem:[#allocation10 + $0x56c] ss:$16 sps:$4 sm:$0xff]  }
 0x343   : > { %v4257_v57 = vsel %vm4255_vm6, %v4239_v12, %v4256_v53 }
 0x344   : > { %4258 = vst [vmem:[#allocation3] sm:$0x77] %v4257_v57 }
 0x34b   : > { %v4262_v13 = vld [vmem:[#allocation3] sm:$0x77] }
 0x34c   : > { %v10376_v15 = vcombine.low %v4262_v13, %v4262_v13  ;;  %v10378_v16 = vcombine.high %v4262_v13, %v4262_v13  ;;  %v9216_v13 = vld [vmem:[#allocation10 + $0x58c] ss:$16 sps:$4 sm:$0xff]  }
 0x34e   : > { %v4541_v17 = vshll.u32 %v10378_v16, 16  ;;  %v4534_v18 = vshll.u32 %v10376_v15, 16  ;;  %v4539_v19 = vshrl.u32 %v10378_v16, 16  ;;  %v4532_v37 = vshrl.u32 %v10376_v15, 16 }
 0x350   : > { %v4543_v20 = vrot.slane %v4541_v17, 1  ;;  %v4536_v63 = vrot.slane %v4534_v18, 1  ;;  %v4259_v17 = vld [vmem:[#allocation3 + $0x8] sm:$0x77] }
 0x352   : > { %v4544_v31 = vor.u32 %v4543_v20, %v4539_v19  ;;  %v10384_v36 = vor.u32 %v4536_v63, %v4532_v37  ;;  %v9214_v19 = vld [vmem:[#allocation10 + $0x588] ss:$16 sps:$4 sm:$0xff]   ;;  %v9222_v37 = vld [vmem:[#allocation10 + $0x5ac] ss:$16 sps:$4 sm:$0xff]  }
 0x353   : > { %v9220_v63 = vld [vmem:[#allocation10 + $0x5a8] ss:$16 sps:$4 sm:$0xff]  }
 0x354   : > { %5235 = vmatprep.mubr.bf16.mxu0 %v4544_v31 }
 0x355   : > { %5236 = vmatmul.mubr.bf16.vlgmr.msra.gmra.mrb[32].mxu0 %v10384_v36 }
 0x356   : > { %5286 = vmatpush1.bf16.msra.mxu0 %v9142_v38  ;;  %5317 = vmatprep.mubr.bf16.mxu0 %v4544_v31  ;;  %v9228_v31 = vld [vmem:[#allocation10 + $0x5cc] ss:$16 sps:$4 sm:$0xff]   ;;  %v9226_v38 = vld [vmem:[#allocation10 + $0x5c8] ss:$16 sps:$4 sm:$0xff]  }
 0x357   : > { %5287 = vmatprep.subr.bf16.mxu0 %v9150_v21  ;;  %v9234_v21 = vld [vmem:[#allocation10 + $0x5ec] ss:$16 sps:$4 sm:$0xff]  }
 0x35a   : > { %5288 = vmatpush1.bf16.msra.mxu0 %v9148_v24 }
 0x35b   : > { %5289 = vmatprep.subr.bf16.mxu0 %v9156_v22 }
 0x35e   : > { %5290 = vmatpush1.bf16.msra.mxu0 %v9154_v29 }
 0x35f   : > { %5291 = vmatprep.subr.bf16.mxu0 %v9162_v11 }
 0x362   : > { %5292 = vmatpush1.bf16.msra.mxu0 %v9160_v26  ;;  %v9242_v26 = vld [vmem:[#allocation10 + $0x4] ss:$16 sps:$4 sm:$0xff]  }
 0x363   : > { %5293 = vmatprep.subr.bf16.mxu0 %v9168_v14 }
 0x366   : > { %5294 = vmatpush1.bf16.msra.mxu0 %v9166_v41 }
 0x367   : > { %5295 = vmatprep.subr.bf16.mxu0 %v9174_v30 }
 0x36a   : > { %5296 = vmatpush1.bf16.msra.mxu0 %v9172_v23 }
 0x36b   : > { %5297 = vmatprep.subr.bf16.mxu0 %v9180_v34 }
 0x36e   : > { %5298 = vmatpush1.bf16.msra.mxu0 %v9178_v45  ;;  %v9237_v45 = vld [vmem:[#allocation10 + $0x608] ss:$16 sps:$4 sm:$0xff]  }
 0x36f   : > { %v4127_v49 = vpop.f32.mrb[28].mxu0  ;;  %5299 = vmatprep.subr.bf16.mxu0 %v9186_v46  ;;  %v9240_v46 = vld [vmem:[#allocation10] ss:$16 sps:$4 sm:$0xff]  }
 0x370   : > { %v4168_v55 = vpop.f32.mrb[28].mxu1  ;;  %v4129_v5 = vpop.f32.mrb[29].mxu0 }
 0x371   : > { %v4169_v56 = vadd.f32 %v4168_v55, %v4127_v49  ;;  %v4170_v59 = vpop.f32.mrb[29].mxu1  ;;  %v4131_v60 = vpop.f32.mrb[30].mxu0  ;;  %v9245_v49 = vld [vmem:[#allocation10 + $0x62c] ss:$16 sps:$4 sm:$0xff]   ;;  %v9243_v55 = vld [vmem:[#allocation10 + $0x628] ss:$16 sps:$4 sm:$0xff]  }
 0x372   : > { %v4171_v61 = vadd.f32 %v4170_v59, %v4129_v5  ;;  %5300 = vmatpush1.bf16.msra.mxu0 %v9184_v47  ;;  %v4172_v0 = vpop.f32.mrb[30].mxu1  ;;  %v4132_v40 = vpop.f32.mrb[31].mxu0  ;;  %v9246_v5 = vld [vmem:[#allocation10 + $0x20] ss:$16 sps:$4 sm:$0xff]   ;;  %v9249_v59 = vld [vmem:[#allocation10 + $0x648] ss:$16 sps:$4 sm:$0xff]  }
 0x373   : > { %v4177_v35 = vadd.f32 %v4169_v56, %v10346_v32  ;;  %v4173_v44 = vpop.f32.mrb[31].mxu1  ;;  %5301 = vmatprep.subr.bf16.mxu0 %v9192_v50  ;;  %v9248_v50 = vld [vmem:[#allocation10 + $0x24] ss:$16 sps:$4 sm:$0xff]   ;;  %v9251_v56 = vld [vmem:[#allocation10 + $0x64c] ss:$16 sps:$4 sm:$0xff]  }
 0x374   : > { %v4178_v1 = vadd.f32 %v4171_v61, %v10349_v42  ;;  %v9208_v42 = vld [vmem:[#allocation10 + $0x568] ss:$16 sps:$4 sm:$0xff]   ;;  %v9252_v60 = vld [vmem:[#allocation10 + $0x40] ss:$16 sps:$4 sm:$0xff]   ;;  %v9260_v61 = vld [vmem:[#allocation10 + $0x64] ss:$16 sps:$4 sm:$0xff]  }
 0x375   : > { %v4203_v3 = vadd.f32 %v4192_v58, %v4177_v35  ;;  %v9254_v58 = vld [vmem:[#allocation10 + $0x44] ss:$16 sps:$4 sm:$0xff]   ;;  %v9258_v0 = vld [vmem:[#allocation10 + $0x60] ss:$16 sps:$4 sm:$0xff]   ;;  %v9263_v40 = vld [vmem:[#allocation10 + $0x68c] ss:$16 sps:$4 sm:$0xff]  }
 0x376   : > { %v4204_v4 = vadd.f32 %v4196_v39, %v4178_v1  ;;  %5302 = vmatpush1.bf16.msra.mxu0 %v9190_v43  ;;  %v9255_v39 = vld [vmem:[#allocation10 + $0x668] ss:$16 sps:$4 sm:$0xff]   ;;  %v9266_v43 = vld [vmem:[#allocation10 + $0x84] ss:$16 sps:$4 sm:$0xff]   ;;  %v9264_v44 = vld [vmem:[#allocation10 + $0x80] ss:$16 sps:$4 sm:$0xff]  }
 0x377   : > { %vm4207_vm7 = vcmp.gt.f32.partialorder %v4203_v3, 0.0  ;;  %v4211_v25 = vmul.f32 0.2, %v4203_v3  ;;  %5303 = vmatprep.subr.bf16.mxu0 %v9198_v62  ;;  %v9261_v35 = vld [vmem:[#allocation10 + $0x688] ss:$16 sps:$4 sm:$0xff]  }
 0x378   : > { %vm4208_vm8 = vcmp.gt.f32.partialorder %v4204_v4, 0.0  ;;  %v4212_v2 = vmul.f32 0.2, %v4204_v4  ;;  %v9269_v62 = vld [vmem:[#allocation10 + $0x6ac] ss:$16 sps:$4 sm:$0xff]  }
 0x379   : > { %v4215_v8 = vsel %vm4207_vm7, %v4203_v3, %v4211_v25  ;;  %v9272_v1 = vld [vmem:[#allocation10 + $0xa4] ss:$16 sps:$4 sm:$0xff]   ;;  %v9267_v3 = vld [vmem:[#allocation10 + $0x6a8] ss:$16 sps:$4 sm:$0xff]  }
 0x37a   : > { %v4216_v27 = vsel %vm4208_vm8, %v4204_v4, %v4212_v2  ;;  %5304 = vmatpush1.bf16.msra.mxu0 %v9196_v6  ;;  %v9270_v4 = vld [vmem:[#allocation10 + $0xa0] ss:$16 sps:$4 sm:$0xff]   ;;  %v9275_v6 = vld [vmem:[#allocation10 + $0x6cc] ss:$16 sps:$4 sm:$0xff]   ;;  %v9278_v25 = vld [vmem:[#allocation10 + $0xc4] ss:$16 sps:$4 sm:$0xff]  }
 0x37b   : > { %v8225_v32 = vpack.c.bf16 %v4216_v27, %v4215_v8  ;;  %5305 = vmatprep.subr.bf16.mxu0 %v9204_v7  ;;  %v9273_v7 = vld [vmem:[#allocation10 + $0x6c8] ss:$16 sps:$4 sm:$0xff]   ;;  %v9276_v2 = vld [vmem:[#allocation10 + $0xc0] ss:$16 sps:$4 sm:$0xff]   ;;  %v9281_v8 = vld [vmem:[#allocation10 + $0x6ec] ss:$16 sps:$4 sm:$0xff]  }
 0x37c   : > { %v9284_v27 = vld [vmem:[#allocation10 + $0xe4] ss:$16 sps:$4 sm:$0xff]  }
 0x37d   : > { %v4241_v53 = vshrl.u32 %v8225_v32, 16  ;;  %v4244_v57 = vshll.u32 %v8225_v32, 16  ;;  %v9282_v32 = vld [vmem:[#allocation10 + $0xe0] ss:$16 sps:$4 sm:$0xff]  }
 0x37e   : > { %5306 = vmatpush1.bf16.msra.mxu0 %v9202_v28  ;;  %v9279_v28 = vld [vmem:[#allocation10 + $0x6e8] ss:$16 sps:$4 sm:$0xff]  }
 0x37f   : > { %v4243_v12 = vrot.slane %v4241_v53, 7  ;;  %5307 = vmatprep.subr.bf16.mxu0 %v9210_v10  ;;  %v9287_v10 = vld [vmem:[#allocation10 + $0x70c] ss:$16 sps:$4 sm:$0xff]   ;;  %v9290_v53 = vld [vmem:[#allocation10 + $0x104] ss:$16 sps:$4 sm:$0xff]  }
 0x381   : > { %v4246_v18 = vor.u32 %v4244_v57, %v4243_v12  ;;  %v9288_v12 = vld [vmem:[#allocation10 + $0x100] ss:$16 sps:$4 sm:$0xff]   ;;  %v9293_v57 = vld [vmem:[#allocation10 + $0x72c] ss:$16 sps:$4 sm:$0xff]  }
 0x382   : > { %5308 = vmatpush1.bf16.msra.mxu0 %v9208_v42  ;;  %v9285_v42 = vld [vmem:[#allocation10 + $0x708] ss:$16 sps:$4 sm:$0xff]  }
 0x383   : > { %v4260_v20 = vsel %vm4255_vm6, %v4246_v18, %v4259_v17  ;;  %5309 = vmatprep.subr.bf16.mxu0 %v9216_v13  ;;  %v9296_v13 = vld [vmem:[#allocation10 + $0x124] ss:$16 sps:$4 sm:$0xff]   ;;  %v9291_v17 = vld [vmem:[#allocation10 + $0x728] ss:$16 sps:$4 sm:$0xff]   ;;  %v9294_v18 = vld [vmem:[#allocation10 + $0x120] ss:$16 sps:$4 sm:$0xff]  }
 0x384   : > { %4261 = vst [vmem:[#allocation3 + $0x8] sm:$0x77] %v4260_v20  ;;  %v9302_v20 = vld [vmem:[#allocation10 + $0x144] ss:$16 sps:$4 sm:$0xff]  }
 0x386   : > { %5310 = vmatpush1.bf16.msra.mxu0 %v9214_v19  ;;  %v9299_v19 = vld [vmem:[#allocation10 + $0x74c] ss:$16 sps:$4 sm:$0xff]  }
 0x387   : > { %5311 = vmatprep.subr.bf16.mxu0 %v9222_v37  ;;  %v9297_v37 = vld [vmem:[#allocation10 + $0x748] ss:$16 sps:$4 sm:$0xff]  }
 0x38a   : > { %5312 = vmatpush1.bf16.msra.mxu0 %v9220_v63  ;;  %v9300_v63 = vld [vmem:[#allocation10 + $0x140] ss:$16 sps:$4 sm:$0xff]  }
 0x38b   : > { %5313 = vmatprep.subr.bf16.mxu0 %v9228_v31  ;;  %v4263_v24 = vld [vmem:[#allocation3 + $0x8] sm:$0x77] }
 0x38c   : > { %v10398_v22 = vcombine.low %v4263_v24, %v4263_v24  ;;  %v10400_v29 = vcombine.high %v4263_v24, %v4263_v24  ;;  %v9305_v31 = vld [vmem:[#allocation10 + $0x76c] ss:$16 sps:$4 sm:$0xff]   ;;  %v9306_v24 = vld [vmem:[#allocation10 + $0x160] ss:$16 sps:$4 sm:$0xff]  }
 0x38e   : > { %5314 = vmatpush1.bf16.msra.mxu0 %v9226_v38  ;;  %v4555_v33 = vshll.u32 %v10400_v29, 16  ;;  %v4548_v11 = vshll.u32 %v10398_v22, 16  ;;  %v4553_v14 = vshrl.u32 %v10400_v29, 16  ;;  %v4546_v30 = vshrl.u32 %v10398_v22, 16  ;;  %v9308_v38 = vld [vmem:[#allocation10 + $0x164] ss:$16 sps:$4 sm:$0xff]  }
 0x38f   : > { %5315 = vmatprep.subr.bf16.mxu0 %v9234_v21  ;;  %v9303_v21 = vld [vmem:[#allocation10 + $0x768] ss:$16 sps:$4 sm:$0xff]  }
 0x390   : > { %v4557_v41 = vrot.slane %v4555_v33, 1  ;;  %v4550_v23 = vrot.slane %v4548_v11, 1  ;;  %v9314_v33 = vld [vmem:[#allocation10 + $0x184] ss:$16 sps:$4 sm:$0xff]   ;;  %v9309_v11 = vld [vmem:[#allocation10 + $0x788] ss:$16 sps:$4 sm:$0xff]  }
 0x392   : > { %5316 = vmatpush1.bf16.msra.mxu0 %v9232_v9  ;;  %v4558_v34 = vor.u32 %v4557_v41, %v4553_v14  ;;  %v10406_v47 = vor.u32 %v4550_v23, %v4546_v30  ;;  %v9311_v9 = vld [vmem:[#allocation10 + $0x78c] ss:$16 sps:$4 sm:$0xff]   ;;  %v9320_v41 = vld [vmem:[#allocation10 + $0x1a4] ss:$16 sps:$4 sm:$0xff]   ;;  %v9315_v30 = vld [vmem:[#allocation10 + $0x7a8] ss:$16 sps:$4 sm:$0xff]  }
 0x393   : > { %6011 = vmatprep.subr.bf16.mxu0 %v9242_v26  ;;  %v9312_v26 = vld [vmem:[#allocation10 + $0x180] ss:$16 sps:$4 sm:$0xff]   ;;  %v9317_v14 = vld [vmem:[#allocation10 + $0x7ac] ss:$16 sps:$4 sm:$0xff]  }
 0x394   : > { %5276 = vmatprep.mubr.bf16.mxu1 %v4558_v34  ;;  %v9318_v23 = vld [vmem:[#allocation10 + $0x1a0] ss:$16 sps:$4 sm:$0xff]  }
 0x395   : > { %5318 = vmatmul.mubr.bf16.vlgmr.msra.gmra.mrb[36].mxu0 %v10384_v36  ;;  %5277 = vmatmul.mubr.bf16.vlgmr.msra.gmra.mrb[32].mxu1 %v10406_v47  ;;  %v9257_v36 = vld [vmem:[#allocation10 + $0x66c] ss:$16 sps:$4 sm:$0xff]  }
 0x396   : > { %5327 = vmatpush1.bf16.msra.mxu1 %v9237_v45  ;;  %6012 = vmatpush1.bf16.msra.mxu0 %v9240_v46  ;;  %v9326_v45 = vld [vmem:[#allocation10 + $0x1c4] ss:$16 sps:$4 sm:$0xff]   ;;  %v9321_v46 = vld [vmem:[#allocation10 + $0x7c8] ss:$16 sps:$4 sm:$0xff]  }
 0x397   : > { %6043 = vmatprep.mubr.bf16.mxu0 %v10378_v16  ;;  %5358 = vmatprep.mubr.bf16.mxu1 %v4558_v34  ;;  %v9323_v34 = vld [vmem:[#allocation10 + $0x7cc] ss:$16 sps:$4 sm:$0xff]  }
 0x398   : > { %5328 = vmatprep.subr.bf16.mxu1 %v9245_v49  ;;  %6013 = vmatprep.subr.bf16.mxu0 %v9248_v50  ;;  %v9324_v49 = vld [vmem:[#allocation10 + $0x1c0] ss:$16 sps:$4 sm:$0xff]   ;;  %v9329_v50 = vld [vmem:[#allocation10 + $0x7ec] ss:$16 sps:$4 sm:$0xff]  }
 0x39a   : > { %5329 = vmatpush1.bf16.msra.mxu1 %v9243_v55  ;;  %6014 = vmatpush1.bf16.msra.mxu0 %v9246_v5  ;;  %v9332_v55 = vld [vmem:[#allocation10 + $0x1e4] ss:$16 sps:$4 sm:$0xff]   ;;  %v9327_v5 = vld [vmem:[#allocation10 + $0x7e8] ss:$16 sps:$4 sm:$0xff]  }
 0x39b   : > { %5330 = vmatprep.subr.bf16.mxu1 %v9251_v56  ;;  %6015 = vmatprep.subr.bf16.mxu0 %v9254_v58  ;;  %v9330_v56 = vld [vmem:[#allocation10 + $0x1e0] ss:$16 sps:$4 sm:$0xff]   ;;  %v9335_v58 = vld [vmem:[#allocation10 + $0x204] ss:$16 sps:$4 sm:$0xff]  }
 0x39e   : > { %5331 = vmatpush1.bf16.msra.mxu1 %v9249_v59  ;;  %6016 = vmatpush1.bf16.msra.mxu0 %v9252_v60  ;;  %v9338_v59 = vld [vmem:[#allocation10 + $0xc] ss:$16 sps:$4 sm:$0xff]   ;;  %v9333_v60 = vld [vmem:[#allocation10 + $0x200] ss:$16 sps:$4 sm:$0xff]  }
 0x39f   : > { %5332 = vmatprep.subr.bf16.mxu1 %v9257_v36  ;;  %6017 = vmatprep.subr.bf16.mxu0 %v9260_v61  ;;  %v9336_v36 = vld [vmem:[#allocation10 + $0x8] ss:$16 sps:$4 sm:$0xff]   ;;  %v9341_v61 = vld [vmem:[#allocation10 + $0x224] ss:$16 sps:$4 sm:$0xff]  }
 0x3a2   : > { %5333 = vmatpush1.bf16.msra.mxu1 %v9255_v39  ;;  %6018 = vmatpush1.bf16.msra.mxu0 %v9258_v0  ;;  %v9344_v39 = vld [vmem:[#allocation10 + $0x2c] ss:$16 sps:$4 sm:$0xff]   ;;  %v9339_v0 = vld [vmem:[#allocation10 + $0x220] ss:$16 sps:$4 sm:$0xff]  }
 0x3a3   : > { %5334 = vmatprep.subr.bf16.mxu1 %v9263_v40  ;;  %6019 = vmatprep.subr.bf16.mxu0 %v9266_v43  ;;  %v9342_v40 = vld [vmem:[#allocation10 + $0x28] ss:$16 sps:$4 sm:$0xff]   ;;  %v9347_v43 = vld [vmem:[#allocation10 + $0x244] ss:$16 sps:$4 sm:$0xff]  }
 0x3a6   : > { %5335 = vmatpush1.bf16.msra.mxu1 %v9261_v35  ;;  %6020 = vmatpush1.bf16.msra.mxu0 %v9264_v44  ;;  %v9350_v35 = vld [vmem:[#allocation10 + $0x4c] ss:$16 sps:$4 sm:$0xff]   ;;  %v9345_v44 = vld [vmem:[#allocation10 + $0x240] ss:$16 sps:$4 sm:$0xff]  }
 0x3a7   : > { %5336 = vmatprep.subr.bf16.mxu1 %v9269_v62  ;;  %6021 = vmatprep.subr.bf16.mxu0 %v9272_v1  ;;  %v9348_v62 = vld [vmem:[#allocation10 + $0x48] ss:$16 sps:$4 sm:$0xff]   ;;  %v9356_v1 = vld [vmem:[#allocation10 + $0x6c] ss:$16 sps:$4 sm:$0xff]  }
 0x3aa   : > { %5337 = vmatpush1.bf16.msra.mxu1 %v9267_v3  ;;  %6022 = vmatpush1.bf16.msra.mxu0 %v9270_v4  ;;  %v9351_v3 = vld [vmem:[#allocation10 + $0x260] ss:$16 sps:$4 sm:$0xff]   ;;  %v9354_v4 = vld [vmem:[#allocation10 + $0x68] ss:$16 sps:$4 sm:$0xff]  }
 0x3ab   : > { %5338 = vmatprep.subr.bf16.mxu1 %v9275_v6  ;;  %6023 = vmatprep.subr.bf16.mxu0 %v9278_v25  ;;  %v9359_v6 = vld [vmem:[#allocation10 + $0x284] ss:$16 sps:$4 sm:$0xff]   ;;  %v9362_v25 = vld [vmem:[#allocation10 + $0x8c] ss:$16 sps:$4 sm:$0xff]  }
 0x3ae   : > { %5339 = vmatpush1.bf16.msra.mxu1 %v9273_v7  ;;  %6024 = vmatpush1.bf16.msra.mxu0 %v9276_v2  ;;  %v9357_v7 = vld [vmem:[#allocation10 + $0x280] ss:$16 sps:$4 sm:$0xff]   ;;  %v9360_v2 = vld [vmem:[#allocation10 + $0x88] ss:$16 sps:$4 sm:$0xff]  }
 0x3af   : > { %5340 = vmatprep.subr.bf16.mxu1 %v9281_v8  ;;  %6025 = vmatprep.subr.bf16.mxu0 %v9284_v27  ;;  %v9365_v8 = vld [vmem:[#allocation10 + $0x2a4] ss:$16 sps:$4 sm:$0xff]   ;;  %v9368_v27 = vld [vmem:[#allocation10 + $0xac] ss:$16 sps:$4 sm:$0xff]  }
 0x3b2   : > { %5341 = vmatpush1.bf16.msra.mxu1 %v9279_v28  ;;  %6026 = vmatpush1.bf16.msra.mxu0 %v9282_v32  ;;  %v9363_v28 = vld [vmem:[#allocation10 + $0x2a0] ss:$16 sps:$4 sm:$0xff]   ;;  %v9366_v32 = vld [vmem:[#allocation10 + $0xa8] ss:$16 sps:$4 sm:$0xff]  }
 0x3b3   : > { %5342 = vmatprep.subr.bf16.mxu1 %v9287_v10  ;;  %6027 = vmatprep.subr.bf16.mxu0 %v9290_v53  ;;  %v9371_v10 = vld [vmem:[#allocation10 + $0x2c4] ss:$16 sps:$4 sm:$0xff]   ;;  %v9374_v53 = vld [vmem:[#allocation10 + $0xcc] ss:$16 sps:$4 sm:$0xff]  }
 0x3b6   : > { %5343 = vmatpush1.bf16.msra.mxu1 %v9285_v42  ;;  %6028 = vmatpush1.bf16.msra.mxu0 %v9288_v12  ;;  %v9369_v42 = vld [vmem:[#allocation10 + $0x2c0] ss:$16 sps:$4 sm:$0xff]   ;;  %v9372_v12 = vld [vmem:[#allocation10 + $0xc8] ss:$16 sps:$4 sm:$0xff]  }
 0x3b7   : > { %5344 = vmatprep.subr.bf16.mxu1 %v9293_v57  ;;  %6029 = vmatprep.subr.bf16.mxu0 %v9296_v13  ;;  %v9377_v57 = vld [vmem:[#allocation10 + $0x2e4] ss:$16 sps:$4 sm:$0xff]   ;;  %v9380_v13 = vld [vmem:[#allocation10 + $0xec] ss:$16 sps:$4 sm:$0xff]  }
 0x3ba   : > { %5345 = vmatpush1.bf16.msra.mxu1 %v9291_v17  ;;  %6030 = vmatpush1.bf16.msra.mxu0 %v9294_v18  ;;  %v9375_v17 = vld [vmem:[#allocation10 + $0x2e0] ss:$16 sps:$4 sm:$0xff]   ;;  %v9378_v18 = vld [vmem:[#allocation10 + $0xe8] ss:$16 sps:$4 sm:$0xff]  }
 0x3bb   : > { %5346 = vmatprep.subr.bf16.mxu1 %v9299_v19  ;;  %6031 = vmatprep.subr.bf16.mxu0 %v9302_v20  ;;  %v9383_v19 = vld [vmem:[#allocation10 + $0x304] ss:$16 sps:$4 sm:$0xff]   ;;  %v9386_v20 = vld [vmem:[#allocation10 + $0x10c] ss:$16 sps:$4 sm:$0xff]  }
 0x3be   : > { %5347 = vmatpush1.bf16.msra.mxu1 %v9297_v37  ;;  %6032 = vmatpush1.bf16.msra.mxu0 %v9300_v63  ;;  %v9381_v37 = vld [vmem:[#allocation10 + $0x300] ss:$16 sps:$4 sm:$0xff]   ;;  %v9384_v63 = vld [vmem:[#allocation10 + $0x108] ss:$16 sps:$4 sm:$0xff]  }
 0x3bf   : > { %5348 = vmatprep.subr.bf16.mxu1 %v9305_v31  ;;  %6033 = vmatprep.subr.bf16.mxu0 %v9308_v38  ;;  %v9389_v31 = vld [vmem:[#allocation10 + $0x324] ss:$16 sps:$4 sm:$0xff]   ;;  %v9392_v38 = vld [vmem:[#allocation10 + $0x12c] ss:$16 sps:$4 sm:$0xff]  }
 0x3c2   : > { %5349 = vmatpush1.bf16.msra.mxu1 %v9303_v21  ;;  %6034 = vmatpush1.bf16.msra.mxu0 %v9306_v24  ;;  %v9387_v21 = vld [vmem:[#allocation10 + $0x320] ss:$16 sps:$4 sm:$0xff]   ;;  %v9390_v24 = vld [vmem:[#allocation10 + $0x128] ss:$16 sps:$4 sm:$0xff]  }
 0x3c3   : > { %5350 = vmatprep.subr.bf16.mxu1 %v9311_v9  ;;  %6035 = vmatprep.subr.bf16.mxu0 %v9314_v33  ;;  %v9395_v9 = vld [vmem:[#allocation10 + $0x344] ss:$16 sps:$4 sm:$0xff]   ;;  %v9398_v33 = vld [vmem:[#allocation10 + $0x14c] ss:$16 sps:$4 sm:$0xff]  }
 0x3c6   : > { %5351 = vmatpush1.bf16.msra.mxu1 %v9309_v11  ;;  %6036 = vmatpush1.bf16.msra.mxu0 %v9312_v26  ;;  %v9393_v11 = vld [vmem:[#allocation10 + $0x340] ss:$16 sps:$4 sm:$0xff]   ;;  %v9396_v26 = vld [vmem:[#allocation10 + $0x148] ss:$16 sps:$4 sm:$0xff]  }
 0x3c7   : > { %5352 = vmatprep.subr.bf16.mxu1 %v9317_v14  ;;  %6037 = vmatprep.subr.bf16.mxu0 %v9320_v41  ;;  %v9401_v14 = vld [vmem:[#allocation10 + $0x364] ss:$16 sps:$4 sm:$0xff]   ;;  %v9404_v41 = vld [vmem:[#allocation10 + $0x16c] ss:$16 sps:$4 sm:$0xff]  }
 0x3ca   : > { %5353 = vmatpush1.bf16.msra.mxu1 %v9315_v30  ;;  %6038 = vmatpush1.bf16.msra.mxu0 %v9318_v23  ;;  %v9399_v30 = vld [vmem:[#allocation10 + $0x360] ss:$16 sps:$4 sm:$0xff]   ;;  %v9402_v23 = vld [vmem:[#allocation10 + $0x168] ss:$16 sps:$4 sm:$0xff]  }
 0x3cb   : > { %5354 = vmatprep.subr.bf16.mxu1 %v9323_v34  ;;  %6039 = vmatprep.subr.bf16.mxu0 %v9326_v45  ;;  %v9407_v34 = vld [vmem:[#allocation10 + $0x384] ss:$16 sps:$4 sm:$0xff]   ;;  %v9410_v45 = vld [vmem:[#allocation10 + $0x18c] ss:$16 sps:$4 sm:$0xff]  }
 0x3ce   : > { %5355 = vmatpush1.bf16.msra.mxu1 %v9321_v46  ;;  %6040 = vmatpush1.bf16.msra.mxu0 %v9324_v49  ;;  %v9405_v46 = vld [vmem:[#allocation10 + $0x380] ss:$16 sps:$4 sm:$0xff]   ;;  %v9408_v49 = vld [vmem:[#allocation10 + $0x188] ss:$16 sps:$4 sm:$0xff]  }
 0x3cf   : > { %5356 = vmatprep.subr.bf16.mxu1 %v9329_v50  ;;  %6041 = vmatprep.subr.bf16.mxu0 %v9332_v55  ;;  %v9413_v50 = vld [vmem:[#allocation10 + $0x3a4] ss:$16 sps:$4 sm:$0xff]   ;;  %v9416_v55 = vld [vmem:[#allocation10 + $0x1ac] ss:$16 sps:$4 sm:$0xff]  }
 0x3d2   : > { %5357 = vmatpush1.bf16.msra.mxu1 %v9327_v5  ;;  %6042 = vmatpush1.bf16.msra.mxu0 %v9330_v56  ;;  %v9411_v5 = vld [vmem:[#allocation10 + $0x3a0] ss:$16 sps:$4 sm:$0xff]   ;;  %v9414_v56 = vld [vmem:[#allocation10 + $0x1a8] ss:$16 sps:$4 sm:$0xff]  }
 0x3d3   : > { %6052 = vmatprep.subr.bf16.mxu1 %v9335_v58  ;;  %6093 = vmatprep.subr.bf16.mxu0 %v9338_v59  ;;  %v9419_v58 = vld [vmem:[#allocation10 + $0x3c4] ss:$16 sps:$4 sm:$0xff]   ;;  %v9422_v59 = vld [vmem:[#allocation10 + $0x1cc] ss:$16 sps:$4 sm:$0xff]  }
 0x3d5   : > { %5359 = vmatmul.mubr.bf16.vlgmr.msra.gmra.mrb[36].mxu1 %v10406_v47  ;;  %6044 = vmatmul.mubr.bf16.vlgmr.msra.gmra.mrb[40].mxu0 %v10376_v15  ;;  %v9353_v47 = vld [vmem:[#allocation10 + $0x264] ss:$16 sps:$4 sm:$0xff]  }
 0x3d6   : > { %6053 = vmatpush1.bf16.msra.mxu1 %v9333_v60  ;;  %6084 = vmatprep.mubr.bf16.mxu1 %v10400_v29  ;;  %v9417_v60 = vld [vmem:[#allocation10 + $0x3c0] ss:$16 sps:$4 sm:$0xff]  }
 0x3d7   : > { %6094 = vmatpush1.bf16.msra.mxu0 %v9336_v36  ;;  %6125 = vmatprep.mubr.bf16.mxu0 %v10378_v16  ;;  %v9420_v36 = vld [vmem:[#allocation10 + $0x1c8] ss:$16 sps:$4 sm:$0xff]  }
 0x3d8   : > { %6054 = vmatprep.subr.bf16.mxu1 %v9341_v61  ;;  %6095 = vmatprep.subr.bf16.mxu0 %v9344_v39  ;;  %v9425_v61 = vld [vmem:[#allocation10 + $0x3e4] ss:$16 sps:$4 sm:$0xff]   ;;  %v9428_v39 = vld [vmem:[#allocation10 + $0x1ec] ss:$16 sps:$4 sm:$0xff]  }
 0x3da   : > { %6055 = vmatpush1.bf16.msra.mxu1 %v9339_v0  ;;  %v9423_v0 = vld [vmem:[#allocation10 + $0x3e0] ss:$16 sps:$4 sm:$0xff]  }
 0x3db   : > { %6096 = vmatpush1.bf16.msra.mxu0 %v9342_v40  ;;  %6056 = vmatprep.subr.bf16.mxu1 %v9347_v43  ;;  %v9426_v40 = vld [vmem:[#allocation10 + $0x1e8] ss:$16 sps:$4 sm:$0xff]   ;;  %v9431_v43 = vld [vmem:[#allocation10 + $0x20c] ss:$16 sps:$4 sm:$0xff]  }
 0x3dc   : > { %6097 = vmatprep.subr.bf16.mxu0 %v9350_v35  ;;  %v9434_v35 = vld [vmem:[#allocation10 + $0x804] ss:$16 sps:$4 sm:$0xff]  }
 0x3de   : > { %6057 = vmatpush1.bf16.msra.mxu1 %v9345_v44  ;;  %v9429_v44 = vld [vmem:[#allocation10 + $0x208] ss:$16 sps:$4 sm:$0xff]  }
 0x3df   : > { %6098 = vmatpush1.bf16.msra.mxu0 %v9348_v62  ;;  %6058 = vmatprep.subr.bf16.mxu1 %v9353_v47  ;;  %v9432_v62 = vld [vmem:[#allocation10 + $0x800] ss:$16 sps:$4 sm:$0xff]   ;;  %v9437_v47 = vld [vmem:[#allocation10 + $0x22c] ss:$16 sps:$4 sm:$0xff]  }
 0x3e0   : > { %6099 = vmatprep.subr.bf16.mxu0 %v9356_v1  ;;  %v9440_v1 = vld [vmem:[#allocation10 + $0x824] ss:$16 sps:$4 sm:$0xff]  }
 0x3e2   : > { %6059 = vmatpush1.bf16.msra.mxu1 %v9351_v3  ;;  %v6305_v3 = vrot.slane %v10378_v16, 1  ;;  %v9554_v16 = vld [vmem:[#allocation10 + $0x88c] ss:$16 sps:$4 sm:$0xff]  }
 0x3e3   : > { %6100 = vmatpush1.bf16.msra.mxu0 %v9354_v4  ;;  %6060 = vmatprep.subr.bf16.mxu1 %v9359_v6  ;;  %v9435_v4 = vld [vmem:[#allocation10 + $0x228] ss:$16 sps:$4 sm:$0xff]   ;;  %v9438_v6 = vld [vmem:[#allocation10 + $0x820] ss:$16 sps:$4 sm:$0xff]  }
 0x3e4   : > { %6101 = vmatprep.subr.bf16.mxu0 %v9362_v25  ;;  %v9443_v25 = vld [vmem:[#allocation10 + $0x24c] ss:$16 sps:$4 sm:$0xff]  }
 0x3e6   : > { %6061 = vmatpush1.bf16.msra.mxu1 %v9357_v7  ;;  %v9446_v7 = vld [vmem:[#allocation10 + $0x844] ss:$16 sps:$4 sm:$0xff]  }
 0x3e7   : > { %6102 = vmatpush1.bf16.msra.mxu0 %v9360_v2  ;;  %6062 = vmatprep.subr.bf16.mxu1 %v9365_v8  ;;  %v9441_v2 = vld [vmem:[#allocation10 + $0x248] ss:$16 sps:$4 sm:$0xff]   ;;  %v9444_v8 = vld [vmem:[#allocation10 + $0x840] ss:$16 sps:$4 sm:$0xff]  }
 0x3e8   : > { %6103 = vmatprep.subr.bf16.mxu0 %v9368_v27  ;;  %v9449_v27 = vld [vmem:[#allocation10 + $0x26c] ss:$16 sps:$4 sm:$0xff]  }
 0x3ea   : > { %6063 = vmatpush1.bf16.msra.mxu1 %v9363_v28  ;;  %v9452_v28 = vld [vmem:[#allocation10 + $0x864] ss:$16 sps:$4 sm:$0xff]  }
 0x3eb   : > { %6104 = vmatpush1.bf16.msra.mxu0 %v9366_v32  ;;  %6064 = vmatprep.subr.bf16.mxu1 %v9371_v10  ;;  %v9447_v32 = vld [vmem:[#allocation10 + $0x268] ss:$16 sps:$4 sm:$0xff]   ;;  %v9450_v10 = vld [vmem:[#allocation10 + $0x860] ss:$16 sps:$4 sm:$0xff]  }
 0x3ec   : > { %6105 = vmatprep.subr.bf16.mxu0 %v9374_v53  ;;  %v9455_v53 = vld [vmem:[#allocation10 + $0x28c] ss:$16 sps:$4 sm:$0xff]  }
 0x3ee   : > { %6065 = vmatpush1.bf16.msra.mxu1 %v9369_v42  ;;  %v9458_v42 = vld [vmem:[#allocation10 + $0x884] ss:$16 sps:$4 sm:$0xff]  }
 0x3ef   : > { %6106 = vmatpush1.bf16.msra.mxu0 %v9372_v12  ;;  %6066 = vmatprep.subr.bf16.mxu1 %v9377_v57  ;;  %v9453_v12 = vld [vmem:[#allocation10 + $0x288] ss:$16 sps:$4 sm:$0xff]   ;;  %v9456_v57 = vld [vmem:[#allocation10 + $0x880] ss:$16 sps:$4 sm:$0xff]  }
 0x3f0   : > { %6107 = vmatprep.subr.bf16.mxu0 %v9380_v13  ;;  %v9461_v13 = vld [vmem:[#allocation10 + $0x2ac] ss:$16 sps:$4 sm:$0xff]  }
 0x3f2   : > { %6067 = vmatpush1.bf16.msra.mxu1 %v9375_v17  ;;  %v9464_v17 = vld [vmem:[#allocation10 + $0x8a4] ss:$16 sps:$4 sm:$0xff]  }
 0x3f3   : > { %6108 = vmatpush1.bf16.msra.mxu0 %v9378_v18  ;;  %6068 = vmatprep.subr.bf16.mxu1 %v9383_v19  ;;  %v9459_v18 = vld [vmem:[#allocation10 + $0x2a8] ss:$16 sps:$4 sm:$0xff]   ;;  %v9462_v19 = vld [vmem:[#allocation10 + $0x8a0] ss:$16 sps:$4 sm:$0xff]  }
 0x3f4   : > { %6109 = vmatprep.subr.bf16.mxu0 %v9386_v20  ;;  %v9467_v20 = vld [vmem:[#allocation10 + $0x2cc] ss:$16 sps:$4 sm:$0xff]  }
 0x3f6   : > { %6069 = vmatpush1.bf16.msra.mxu1 %v9381_v37 }
 0x3f7   : > { %6110 = vmatpush1.bf16.msra.mxu0 %v9384_v63  ;;  %6070 = vmatprep.subr.bf16.mxu1 %v9389_v31  ;;  %v9470_v63 = vld [vmem:[#allocation10 + $0x8c4] ss:$16 sps:$4 sm:$0xff]  }
 0x3f8   : > { %6111 = vmatprep.subr.bf16.mxu0 %v9392_v38 }
 0x3fa   : > { %6071 = vmatpush1.bf16.msra.mxu1 %v9387_v21  ;;  %v9465_v21 = vld [vmem:[#allocation10 + $0x2c8] ss:$16 sps:$4 sm:$0xff]  }
 0x3fb   : > { %6112 = vmatpush1.bf16.msra.mxu0 %v9390_v24  ;;  %6072 = vmatprep.subr.bf16.mxu1 %v9395_v9  ;;  %v9468_v9 = vld [vmem:[#allocation10 + $0x8c0] ss:$16 sps:$4 sm:$0xff]  }
 0x3fc   : > { %6113 = vmatprep.subr.bf16.mxu0 %v9398_v33  ;;  %v9473_v33 = vld [vmem:[#allocation10 + $0x2ec] ss:$16 sps:$4 sm:$0xff]  }
 0x3fe   : > { %6073 = vmatpush1.bf16.msra.mxu1 %v9393_v11  ;;  %v9476_v11 = vld [vmem:[#allocation10 + $0x8e4] ss:$16 sps:$4 sm:$0xff]  }
 0x3ff   : > { %6114 = vmatpush1.bf16.msra.mxu0 %v9396_v26  ;;  %6074 = vmatprep.subr.bf16.mxu1 %v9401_v14  ;;  %v9471_v26 = vld [vmem:[#allocation10 + $0x2e8] ss:$16 sps:$4 sm:$0xff]   ;;  %v9474_v14 = vld [vmem:[#allocation10 + $0x8e0] ss:$16 sps:$4 sm:$0xff]  }
 0x400   : > { %6115 = vmatprep.subr.bf16.mxu0 %v9404_v41  ;;  %v9479_v41 = vld [vmem:[#allocation10 + $0x30c] ss:$16 sps:$4 sm:$0xff]  }
 0x402   : > { %6075 = vmatpush1.bf16.msra.mxu1 %v9399_v30  ;;  %v9482_v30 = vld [vmem:[#allocation10 + $0x904] ss:$16 sps:$4 sm:$0xff]  }
 0x403   : > { %6116 = vmatpush1.bf16.msra.mxu0 %v9402_v23  ;;  %6076 = vmatprep.subr.bf16.mxu1 %v9407_v34  ;;  %v9477_v23 = vld [vmem:[#allocation10 + $0x308] ss:$16 sps:$4 sm:$0xff]   ;;  %v9480_v34 = vld [vmem:[#allocation10 + $0x900] ss:$16 sps:$4 sm:$0xff]  }
 0x404   : > { %6117 = vmatprep.subr.bf16.mxu0 %v9410_v45  ;;  %v9485_v45 = vld [vmem:[#allocation10 + $0x32c] ss:$16 sps:$4 sm:$0xff]  }
 0x406   : > { %6077 = vmatpush1.bf16.msra.mxu1 %v9405_v46  ;;  %v9488_v46 = vld [vmem:[#allocation10 + $0x924] ss:$16 sps:$4 sm:$0xff]  }
 0x407   : > { %6118 = vmatpush1.bf16.msra.mxu0 %v9408_v49  ;;  %6078 = vmatprep.subr.bf16.mxu1 %v9413_v50  ;;  %v9483_v49 = vld [vmem:[#allocation10 + $0x328] ss:$16 sps:$4 sm:$0xff]   ;;  %v9486_v50 = vld [vmem:[#allocation10 + $0x920] ss:$16 sps:$4 sm:$0xff]  }
 0x408   : > { %6119 = vmatprep.subr.bf16.mxu0 %v9416_v55  ;;  %v9491_v55 = vld [vmem:[#allocation10 + $0x34c] ss:$16 sps:$4 sm:$0xff]  }
 0x40a   : > { %6079 = vmatpush1.bf16.msra.mxu1 %v9411_v5  ;;  %v9494_v5 = vld [vmem:[#allocation10 + $0x944] ss:$16 sps:$4 sm:$0xff]  }
 0x40b   : > { %6120 = vmatpush1.bf16.msra.mxu0 %v9414_v56  ;;  %6080 = vmatprep.subr.bf16.mxu1 %v9419_v58  ;;  %v9489_v56 = vld [vmem:[#allocation10 + $0x348] ss:$16 sps:$4 sm:$0xff]   ;;  %v9492_v58 = vld [vmem:[#allocation10 + $0x940] ss:$16 sps:$4 sm:$0xff]  }
 0x40c   : > { %6121 = vmatprep.subr.bf16.mxu0 %v9422_v59  ;;  %v9497_v59 = vld [vmem:[#allocation10 + $0x36c] ss:$16 sps:$4 sm:$0xff]  }
 0x40e   : > { %6081 = vmatpush1.bf16.msra.mxu1 %v9417_v60  ;;  %v9500_v60 = vld [vmem:[#allocation10 + $0x964] ss:$16 sps:$4 sm:$0xff]  }
 0x40f   : > { %6122 = vmatpush1.bf16.msra.mxu0 %v9420_v36  ;;  %6082 = vmatprep.subr.bf16.mxu1 %v9425_v61  ;;  %v9495_v36 = vld [vmem:[#allocation10 + $0x368] ss:$16 sps:$4 sm:$0xff]   ;;  %v9498_v61 = vld [vmem:[#allocation10 + $0x960] ss:$16 sps:$4 sm:$0xff]  }
 0x410   : > { %6123 = vmatprep.subr.bf16.mxu0 %v9428_v39  ;;  %v9503_v39 = vld [vmem:[#allocation10 + $0x38c] ss:$16 sps:$4 sm:$0xff]  }
 0x412   : > { %6083 = vmatpush1.bf16.msra.mxu1 %v9423_v0  ;;  %v9506_v0 = vld [vmem:[#allocation10 + $0x984] ss:$16 sps:$4 sm:$0xff]  }
 0x413   : > { %6124 = vmatpush1.bf16.msra.mxu0 %v9426_v40  ;;  %6134 = vmatprep.subr.bf16.mxu1 %v9431_v43  ;;  %v9501_v40 = vld [vmem:[#allocation10 + $0x388] ss:$16 sps:$4 sm:$0xff]   ;;  %v9504_v43 = vld [vmem:[#allocation10 + $0x980] ss:$16 sps:$4 sm:$0xff]  }
 0x414   : > { %6952 = vmatprep.subr.bf16.mxu0 %v9434_v35  ;;  %v9509_v35 = vld [vmem:[#allocation10 + $0x3ac] ss:$16 sps:$4 sm:$0xff]  }
 0x415   : > { %6085 = vmatmul.mubr.bf16.vlgmr.msra.gmra.mrb[40].mxu1 %v10398_v22 }
 0x416   : > { %6126 = vmatmul.mubr.bf16.vlgmr.msra.gmra.mrb[44].mxu0 %v10376_v15  ;;  %6135 = vmatpush1.bf16.msra.mxu1 %v9429_v44  ;;  %v9512_v44 = vld [vmem:[#allocation10 + $0x9a4] ss:$16 sps:$4 sm:$0xff]  }
 0x417   : > { %6166 = vmatprep.mubr.bf16.mxu1 %v10400_v29  ;;  %6953 = vmatpush1.bf16.msra.mxu0 %v9432_v62  ;;  %v9507_v62 = vld [vmem:[#allocation10 + $0x3a8] ss:$16 sps:$4 sm:$0xff]  }
 0x418   : > { %6984 = vmatprep.mubr.bf16.mxu0 %v6305_v3  ;;  %6136 = vmatprep.subr.bf16.mxu1 %v9437_v47  ;;  %v9510_v47 = vld [vmem:[#allocation10 + $0x9a0] ss:$16 sps:$4 sm:$0xff]  }
 0x419   : > { %6954 = vmatprep.subr.bf16.mxu0 %v9440_v1  ;;  %v9515_v1 = vld [vmem:[#allocation10 + $0x3cc] ss:$16 sps:$4 sm:$0xff]  }
 0x41a   : > { %6137 = vmatpush1.bf16.msra.mxu1 %v9435_v4  ;;  %v9518_v4 = vld [vmem:[#allocation10 + $0x9c4] ss:$16 sps:$4 sm:$0xff]  }
 0x41b   : > { %6955 = vmatpush1.bf16.msra.mxu0 %v9438_v6  ;;  %6138 = vmatprep.subr.bf16.mxu1 %v9443_v25  ;;  %v9513_v6 = vld [vmem:[#allocation10 + $0x3c8] ss:$16 sps:$4 sm:$0xff]   ;;  %v9516_v25 = vld [vmem:[#allocation10 + $0x9c0] ss:$16 sps:$4 sm:$0xff]  }
 0x41c   : > { %6956 = vmatprep.subr.bf16.mxu0 %v9446_v7  ;;  %v9521_v7 = vld [vmem:[#allocation10 + $0x3ec] ss:$16 sps:$4 sm:$0xff]  }
 0x41e   : > { %6139 = vmatpush1.bf16.msra.mxu1 %v9441_v2  ;;  %v9524_v2 = vld [vmem:[#allocation10 + $0x9e4] ss:$16 sps:$4 sm:$0xff]  }
 0x41f   : > { %6957 = vmatpush1.bf16.msra.mxu0 %v9444_v8  ;;  %6140 = vmatprep.subr.bf16.mxu1 %v9449_v27  ;;  %v9519_v8 = vld [vmem:[#allocation10 + $0x3e8] ss:$16 sps:$4 sm:$0xff]   ;;  %v9522_v27 = vld [vmem:[#allocation10 + $0x9e0] ss:$16 sps:$4 sm:$0xff]  }
 0x420   : > { %6958 = vmatprep.subr.bf16.mxu0 %v9452_v28  ;;  %v9527_v28 = vld [vmem:[#allocation10 + $0xa04] ss:$16 sps:$4 sm:$0xff]  }
 0x422   : > { %6141 = vmatpush1.bf16.msra.mxu1 %v9447_v32  ;;  %v9530_v32 = vld [vmem:[#allocation10 + $0x80c] ss:$16 sps:$4 sm:$0xff]  }
 0x423   : > { %6959 = vmatpush1.bf16.msra.mxu0 %v9450_v10  ;;  %6142 = vmatprep.subr.bf16.mxu1 %v9455_v53  ;;  %v9525_v10 = vld [vmem:[#allocation10 + $0xa00] ss:$16 sps:$4 sm:$0xff]   ;;  %v9528_v53 = vld [vmem:[#allocation10 + $0x808] ss:$16 sps:$4 sm:$0xff]  }
 0x424   : > { %6960 = vmatprep.subr.bf16.mxu0 %v9458_v42  ;;  %v6304_v42 = vrot.slane %v10376_v15, 1  ;;  %v9638_v15 = vld [vmem:[#allocation10 + $0xaac] ss:$16 sps:$4 sm:$0xff]  }
 0x426   : > { %6143 = vmatpush1.bf16.msra.mxu1 %v9453_v12  ;;  %v9533_v12 = vld [vmem:[#allocation10 + $0xa24] ss:$16 sps:$4 sm:$0xff]  }
 0x427   : > { %6961 = vmatpush1.bf16.msra.mxu0 %v9456_v57  ;;  %6144 = vmatprep.subr.bf16.mxu1 %v9461_v13  ;;  %v6307_v57 = vrot.slane %v10400_v29, 1  ;;  %v9536_v13 = vld [vmem:[#allocation10 + $0x82c] ss:$16 sps:$4 sm:$0xff]  }
 0x428   : > { %v10421_v37 = vpop.f32.mrb[32].mxu0  ;;  %6962 = vmatprep.subr.bf16.mxu0 %v9464_v17  ;;  %v9531_v17 = vld [vmem:[#allocation10 + $0xa20] ss:$16 sps:$4 sm:$0xff]  }
 0x429   : > { %v10423_v31 = vpop.f32.mrb[33].mxu0 }
 0x42a   : > { %6145 = vmatpush1.bf16.msra.mxu1 %v9459_v18  ;;  %v5241_v38 = vpop.f32.mrb[34].mxu0  ;;  %v9534_v18 = vld [vmem:[#allocation10 + $0x828] ss:$16 sps:$4 sm:$0xff]  }
 0x42b   : > { %6963 = vmatpush1.bf16.msra.mxu0 %v9462_v19  ;;  %v5242_v24 = vpop.f32.mrb[35].mxu0  ;;  %6146 = vmatprep.subr.bf16.mxu1 %v9467_v20  ;;  %v9539_v19 = vld [vmem:[#allocation10 + $0xa44] ss:$16 sps:$4 sm:$0xff]   ;;  %v9542_v20 = vld [vmem:[#allocation10 + $0x84c] ss:$16 sps:$4 sm:$0xff]  }
 0x42c   : > { %6964 = vmatprep.subr.bf16.mxu0 %v9470_v63  ;;  %v9537_v63 = vld [vmem:[#allocation10 + $0xa40] ss:$16 sps:$4 sm:$0xff]   ;;  %v9540_v38 = vld [vmem:[#allocation10 + $0x848] ss:$16 sps:$4 sm:$0xff]   ;;  %v9548_v24 = vld [vmem:[#allocation10 + $0x86c] ss:$16 sps:$4 sm:$0xff]  }
 0x42e   : > { %6147 = vmatpush1.bf16.msra.mxu1 %v9465_v21  ;;  %v9545_v21 = vld [vmem:[#allocation10 + $0xa64] ss:$16 sps:$4 sm:$0xff]  }
 0x42f   : > { %6965 = vmatpush1.bf16.msra.mxu0 %v9468_v9  ;;  %6148 = vmatprep.subr.bf16.mxu1 %v9473_v33  ;;  %v9543_v9 = vld [vmem:[#allocation10 + $0xa60] ss:$16 sps:$4 sm:$0xff]   ;;  %v9546_v33 = vld [vmem:[#allocation10 + $0x868] ss:$16 sps:$4 sm:$0xff]  }
 0x430   : > { %6966 = vmatprep.subr.bf16.mxu0 %v9476_v11  ;;  %v9551_v11 = vld [vmem:[#allocation10 + $0xa84] ss:$16 sps:$4 sm:$0xff]  }
 0x432   : > { %6149 = vmatpush1.bf16.msra.mxu1 %v9471_v26  ;;  %v9552_v26 = vld [vmem:[#allocation10 + $0x888] ss:$16 sps:$4 sm:$0xff]  }
 0x433   : > { %6967 = vmatpush1.bf16.msra.mxu0 %v9474_v14  ;;  %6150 = vmatprep.subr.bf16.mxu1 %v9479_v41  ;;  %v9557_v14 = vld [vmem:[#allocation10 + $0xaa4] ss:$16 sps:$4 sm:$0xff]   ;;  %v9560_v41 = vld [vmem:[#allocation10 + $0x8ac] ss:$16 sps:$4 sm:$0xff]  }
 0x434   : > { %6968 = vmatprep.subr.bf16.mxu0 %v9482_v30  ;;  %v9555_v30 = vld [vmem:[#allocation10 + $0xaa0] ss:$16 sps:$4 sm:$0xff]  }
 0x436   : > { %6151 = vmatpush1.bf16.msra.mxu1 %v9477_v23  ;;  %v9558_v23 = vld [vmem:[#allocation10 + $0x8a8] ss:$16 sps:$4 sm:$0xff]  }
 0x437   : > { %6969 = vmatpush1.bf16.msra.mxu0 %v9480_v34  ;;  %6152 = vmatprep.subr.bf16.mxu1 %v9485_v45  ;;  %v9563_v34 = vld [vmem:[#allocation10 + $0xac4] ss:$16 sps:$4 sm:$0xff]  }
 0x438   : > { %6970 = vmatprep.subr.bf16.mxu0 %v9488_v46 }
 0x43a   : > { %6153 = vmatpush1.bf16.msra.mxu1 %v9483_v49  ;;  %v9566_v49 = vld [vmem:[#allocation10 + $0x8cc] ss:$16 sps:$4 sm:$0xff]  }
 0x43b   : > { %6971 = vmatpush1.bf16.msra.mxu0 %v9486_v50  ;;  %6154 = vmatprep.subr.bf16.mxu1 %v9491_v55 }
 0x43c   : > { %6972 = vmatprep.subr.bf16.mxu0 %v9494_v5 }
 0x43e   : > { %6155 = vmatpush1.bf16.msra.mxu1 %v9489_v56 }
 0x43f   : > { %6973 = vmatpush1.bf16.msra.mxu0 %v9492_v58  ;;  %6156 = vmatprep.subr.bf16.mxu1 %v9497_v59 }
 0x440   : > { %6974 = vmatprep.subr.bf16.mxu0 %v9500_v60  ;;  %v9561_v60 = vld [vmem:[#allocation10 + $0xac0] ss:$16 sps:$4 sm:$0xff]  }
 0x442   : > { %6157 = vmatpush1.bf16.msra.mxu1 %v9495_v36 }
 0x443   : > { %6975 = vmatpush1.bf16.msra.mxu0 %v9498_v61  ;;  %6158 = vmatprep.subr.bf16.mxu1 %v9503_v39  ;;  %v9564_v39 = vld [vmem:[#allocation10 + $0x8c8] ss:$16 sps:$4 sm:$0xff]  }
 0x444   : > { %6976 = vmatprep.subr.bf16.mxu0 %v9506_v0  ;;  %v9569_v0 = vld [vmem:[#allocation10 + $0xae4] ss:$16 sps:$4 sm:$0xff]  }
 0x446   : > { %6159 = vmatpush1.bf16.msra.mxu1 %v9501_v40  ;;  %v9572_v40 = vld [vmem:[#allocation10 + $0x8ec] ss:$16 sps:$4 sm:$0xff]  }
 0x447   : > { %6977 = vmatpush1.bf16.msra.mxu0 %v9504_v43  ;;  %6160 = vmatprep.subr.bf16.mxu1 %v9509_v35  ;;  %v9570_v43 = vld [vmem:[#allocation10 + $0x8e8] ss:$16 sps:$4 sm:$0xff]   ;;  %v9575_v35 = vld [vmem:[#allocation10 + $0xb04] ss:$16 sps:$4 sm:$0xff]  }
 0x448   : > { %6978 = vmatprep.subr.bf16.mxu0 %v9512_v44  ;;  %v9573_v44 = vld [vmem:[#allocation10 + $0xb00] ss:$16 sps:$4 sm:$0xff]  }
 0x44a   : > { %6161 = vmatpush1.bf16.msra.mxu1 %v9507_v62  ;;  %v9576_v62 = vld [vmem:[#allocation10 + $0x908] ss:$16 sps:$4 sm:$0xff]  }
 0x44b   : > { %6979 = vmatpush1.bf16.msra.mxu0 %v9510_v47  ;;  %6162 = vmatprep.subr.bf16.mxu1 %v9515_v1  ;;  %v9581_v47 = vld [vmem:[#allocation10 + $0xb24] ss:$16 sps:$4 sm:$0xff]   ;;  %v9584_v1 = vld [vmem:[#allocation10 + $0x92c] ss:$16 sps:$4 sm:$0xff]  }
 0x44c   : > { %6980 = vmatprep.subr.bf16.mxu0 %v9518_v4  ;;  %v9579_v4 = vld [vmem:[#allocation10 + $0xb20] ss:$16 sps:$4 sm:$0xff]  }
 0x44e   : > { %6163 = vmatpush1.bf16.msra.mxu1 %v9513_v6  ;;  %v9582_v6 = vld [vmem:[#allocation10 + $0x928] ss:$16 sps:$4 sm:$0xff]  }
 0x44f   : > { %6981 = vmatpush1.bf16.msra.mxu0 %v9516_v25  ;;  %6164 = vmatprep.subr.bf16.mxu1 %v9521_v7  ;;  %v9587_v25 = vld [vmem:[#allocation10 + $0xb44] ss:$16 sps:$4 sm:$0xff]   ;;  %v9590_v7 = vld [vmem:[#allocation10 + $0x94c] ss:$16 sps:$4 sm:$0xff]  }
 0x450   : > { %6982 = vmatprep.subr.bf16.mxu0 %v9524_v2  ;;  %v9585_v2 = vld [vmem:[#allocation10 + $0xb40] ss:$16 sps:$4 sm:$0xff]  }
 0x452   : > { %6165 = vmatpush1.bf16.msra.mxu1 %v9519_v8  ;;  %v9588_v8 = vld [vmem:[#allocation10 + $0x948] ss:$16 sps:$4 sm:$0xff]  }
 0x453   : > { %6983 = vmatpush1.bf16.msra.mxu0 %v9522_v27  ;;  %6993 = vmatprep.subr.bf16.mxu1 %v9527_v28  ;;  %v9593_v27 = vld [vmem:[#allocation10 + $0xb64] ss:$16 sps:$4 sm:$0xff]   ;;  %v9596_v28 = vld [vmem:[#allocation10 + $0x96c] ss:$16 sps:$4 sm:$0xff]  }
 0x454   : > { %7034 = vmatprep.subr.bf16.mxu0 %v9530_v32  ;;  %v9591_v32 = vld [vmem:[#allocation10 + $0xb60] ss:$16 sps:$4 sm:$0xff]  }
 0x455   : > { %6167 = vmatmul.mubr.bf16.vlgmr.msra.gmra.mrb[44].mxu1 %v10398_v22 }
 0x456   : > { %6985 = vmatmul.mubr.bf16.vlgmr.msra.gmra.mrb[48].mxu0 %v6304_v42  ;;  %6994 = vmatpush1.bf16.msra.mxu1 %v9525_v10  ;;  %v9594_v10 = vld [vmem:[#allocation10 + $0x968] ss:$16 sps:$4 sm:$0xff]  }
 0x457   : > { %7025 = vmatprep.mubr.bf16.mxu1 %v6307_v57  ;;  %7035 = vmatpush1.bf16.msra.mxu0 %v9528_v53  ;;  %v9599_v53 = vld [vmem:[#allocation10 + $0xb84] ss:$16 sps:$4 sm:$0xff]  }
 0x458   : > { %7066 = vmatprep.mubr.bf16.mxu0 %v6305_v3  ;;  %6995 = vmatprep.subr.bf16.mxu1 %v9533_v12  ;;  %v9549_v3 = vld [vmem:[#allocation10 + $0xa80] ss:$16 sps:$4 sm:$0xff]   ;;  %v9602_v12 = vld [vmem:[#allocation10 + $0x98c] ss:$16 sps:$4 sm:$0xff]  }
 0x459   : > { %7036 = vmatprep.subr.bf16.mxu0 %v9536_v13  ;;  %v9597_v13 = vld [vmem:[#allocation10 + $0xb80] ss:$16 sps:$4 sm:$0xff]  }
 0x45a   : > { %6996 = vmatpush1.bf16.msra.mxu1 %v9531_v17  ;;  %v9600_v17 = vld [vmem:[#allocation10 + $0x988] ss:$16 sps:$4 sm:$0xff]  }
 0x45b   : > { %7037 = vmatpush1.bf16.msra.mxu0 %v9534_v18  ;;  %6997 = vmatprep.subr.bf16.mxu1 %v9539_v19  ;;  %v9605_v18 = vld [vmem:[#allocation10 + $0xba4] ss:$16 sps:$4 sm:$0xff]   ;;  %v9608_v19 = vld [vmem:[#allocation10 + $0x9ac] ss:$16 sps:$4 sm:$0xff]  }
 0x45c   : > { %7038 = vmatprep.subr.bf16.mxu0 %v9542_v20  ;;  %v9603_v20 = vld [vmem:[#allocation10 + $0xba0] ss:$16 sps:$4 sm:$0xff]  }
 0x45e   : > { %6998 = vmatpush1.bf16.msra.mxu1 %v9537_v63  ;;  %v9606_v63 = vld [vmem:[#allocation10 + $0x9a8] ss:$16 sps:$4 sm:$0xff]  }
 0x45f   : > { %7039 = vmatpush1.bf16.msra.mxu0 %v9540_v38  ;;  %6999 = vmatprep.subr.bf16.mxu1 %v9545_v21  ;;  %v9611_v38 = vld [vmem:[#allocation10 + $0xbc4] ss:$16 sps:$4 sm:$0xff]   ;;  %v9614_v21 = vld [vmem:[#allocation10 + $0x9cc] ss:$16 sps:$4 sm:$0xff]  }
 0x460   : > { %7040 = vmatprep.subr.bf16.mxu0 %v9548_v24  ;;  %v9609_v24 = vld [vmem:[#allocation10 + $0xbc0] ss:$16 sps:$4 sm:$0xff]  }
 0x462   : > { %7000 = vmatpush1.bf16.msra.mxu1 %v9543_v9  ;;  %v9612_v9 = vld [vmem:[#allocation10 + $0x9c8] ss:$16 sps:$4 sm:$0xff]  }
 0x463   : > { %7041 = vmatpush1.bf16.msra.mxu0 %v9546_v33  ;;  %7001 = vmatprep.subr.bf16.mxu1 %v9551_v11  ;;  %v9617_v33 = vld [vmem:[#allocation10 + $0xbe4] ss:$16 sps:$4 sm:$0xff]   ;;  %v9620_v11 = vld [vmem:[#allocation10 + $0x9ec] ss:$16 sps:$4 sm:$0xff]  }
 0x464   : > { %7042 = vmatprep.subr.bf16.mxu0 %v9554_v16  ;;  %v9615_v16 = vld [vmem:[#allocation10 + $0xbe0] ss:$16 sps:$4 sm:$0xff]  }
 0x466   : > { %7002 = vmatpush1.bf16.msra.mxu1 %v9549_v3  ;;  %v9618_v3 = vld [vmem:[#allocation10 + $0x9e8] ss:$16 sps:$4 sm:$0xff]  }
 0x467   : > { %7043 = vmatpush1.bf16.msra.mxu0 %v9552_v26  ;;  %7003 = vmatprep.subr.bf16.mxu1 %v9557_v14  ;;  %v9623_v26 = vld [vmem:[#allocation10 + $0xa0c] ss:$16 sps:$4 sm:$0xff]   ;;  %v9621_v14 = vld [vmem:[#allocation10 + $0xa08] ss:$16 sps:$4 sm:$0xff]  }
 0x468   : > { %v10434_v45 = vpop.f32.mrb[36].mxu0  ;;  %v5278_v46 = vpop.f32.mrb[32].mxu1  ;;  %7044 = vmatprep.subr.bf16.mxu0 %v9560_v41  ;;  %v6306_v41 = vrot.slane %v10398_v22, 1 }
 0x469   : > { %v10437_v50 = vadd.f32 %v5278_v46, %v10421_v37  ;;  %v10439_v55 = vpop.f32.mrb[37].mxu0  ;;  %v5280_v5 = vpop.f32.mrb[33].mxu1  ;;  %v9567_v37 = vld [vmem:[#allocation10 + $0xae0] ss:$16 sps:$4 sm:$0xff]   ;;  %v9627_v46 = vld [vmem:[#allocation10 + $0xa48] ss:$16 sps:$4 sm:$0xff]  }
 0x46a   : > { %v10442_v56 = vadd.f32 %v5280_v5, %v10423_v31  ;;  %v5323_v58 = vpop.f32.mrb[38].mxu0  ;;  %7004 = vmatpush1.bf16.msra.mxu1 %v9555_v30  ;;  %v5282_v59 = vpop.f32.mrb[34].mxu1  ;;  %v9578_v31 = vld [vmem:[#allocation10 + $0x90c] ss:$16 sps:$4 sm:$0xff]   ;;  %v9630_v5 = vld [vmem:[#allocation10 + $0xa68] ss:$16 sps:$4 sm:$0xff]  }
 0x46b   : > { %7045 = vmatpush1.bf16.msra.mxu0 %v9558_v23  ;;  %v5324_v36 = vpop.f32.mrb[39].mxu0  ;;  %v5283_v61 = vpop.f32.mrb[35].mxu1  ;;  %7005 = vmatprep.subr.bf16.mxu1 %v9563_v34  ;;  %v9626_v30 = vld [vmem:[#allocation10 + $0xa2c] ss:$16 sps:$4 sm:$0xff]   ;;  %v9624_v23 = vld [vmem:[#allocation10 + $0xa28] ss:$16 sps:$4 sm:$0xff]  }
 0x46c   : > { %7046 = vmatprep.subr.bf16.mxu0 %v9566_v49  ;;  %v9629_v34 = vld [vmem:[#allocation10 + $0xa4c] ss:$16 sps:$4 sm:$0xff]   ;;  %v9633_v59 = vld [vmem:[#allocation10 + $0xa88] ss:$16 sps:$4 sm:$0xff]  }
 0x46d   : > { %v9632_v49 = vld [vmem:[#allocation10 + $0xa6c] ss:$16 sps:$4 sm:$0xff]  }
 0x46e   : > { %7006 = vmatpush1.bf16.msra.mxu1 %v9561_v60  ;;  %v9635_v58 = vld [vmem:[#allocation10 + $0xa8c] ss:$16 sps:$4 sm:$0xff]  }
 0x46f   : > { %7047 = vmatpush1.bf16.msra.mxu0 %v9564_v39  ;;  %7007 = vmatprep.subr.bf16.mxu1 %v9569_v0  ;;  %v9641_v60 = vld [vmem:[#allocation10 + $0xacc] ss:$16 sps:$4 sm:$0xff]  }
 0x470   : > { %7048 = vmatprep.subr.bf16.mxu0 %v9572_v40 }
 0x472   : > { %7008 = vmatpush1.bf16.msra.mxu1 %v9567_v37 }
 0x473   : > { %7049 = vmatpush1.bf16.msra.mxu0 %v9570_v43  ;;  %7009 = vmatprep.subr.bf16.mxu1 %v9575_v35 }
 0x474   : > { %7050 = vmatprep.subr.bf16.mxu0 %v9578_v31  ;;  %v9639_v31 = vld [vmem:[#allocation10 + $0xac8] ss:$16 sps:$4 sm:$0xff]  }
 0x476   : > { %7010 = vmatpush1.bf16.msra.mxu1 %v9573_v44 }
 0x477   : > { %7051 = vmatpush1.bf16.msra.mxu0 %v9576_v62  ;;  %7011 = vmatprep.subr.bf16.mxu1 %v9581_v47  ;;  %v9644_v47 = vld [vmem:[#allocation10 + $0xaec] ss:$16 sps:$4 sm:$0xff]  }
 0x478   : > { %7052 = vmatprep.subr.bf16.mxu0 %v9584_v1  ;;  %v9642_v1 = vld [vmem:[#allocation10 + $0xae8] ss:$16 sps:$4 sm:$0xff]  }
 0x47a   : > { %7012 = vmatpush1.bf16.msra.mxu1 %v9579_v4  ;;  %v9650_v4 = vld [vmem:[#allocation10 + $0xb2c] ss:$16 sps:$4 sm:$0xff]  }
 0x47b   : > { %7053 = vmatpush1.bf16.msra.mxu0 %v9582_v6  ;;  %7013 = vmatprep.subr.bf16.mxu1 %v9587_v25  ;;  %v9651_v6 = vld [vmem:[#allocation10 + $0xb48] ss:$16 sps:$4 sm:$0xff]   ;;  %v9656_v25 = vld [vmem:[#allocation10 + $0xb6c] ss:$16 sps:$4 sm:$0xff]  }
 0x47c   : > { %7054 = vmatprep.subr.bf16.mxu0 %v9590_v7  ;;  %v9654_v7 = vld [vmem:[#allocation10 + $0xb68] ss:$16 sps:$4 sm:$0xff]  }
 0x47e   : > { %7014 = vmatpush1.bf16.msra.mxu1 %v9585_v2  ;;  %v9659_v2 = vld [vmem:[#allocation10 + $0xb8c] ss:$16 sps:$4 sm:$0xff]  }
 0x47f   : > { %7055 = vmatpush1.bf16.msra.mxu0 %v9588_v8  ;;  %7015 = vmatprep.subr.bf16.mxu1 %v9593_v27  ;;  %v9657_v8 = vld [vmem:[#allocation10 + $0xb88] ss:$16 sps:$4 sm:$0xff]   ;;  %v9662_v27 = vld [vmem:[#allocation10 + $0xbac] ss:$16 sps:$4 sm:$0xff]  }
 0x480   : > { %7056 = vmatprep.subr.bf16.mxu0 %v9596_v28  ;;  %v9660_v28 = vld [vmem:[#allocation10 + $0xba8] ss:$16 sps:$4 sm:$0xff]  }
 0x482   : > { %7016 = vmatpush1.bf16.msra.mxu1 %v9591_v32  ;;  %v9665_v32 = vld [vmem:[#allocation10 + $0xbcc] ss:$16 sps:$4 sm:$0xff]  }
 0x483   : > { %7057 = vmatpush1.bf16.msra.mxu0 %v9594_v10  ;;  %7017 = vmatprep.subr.bf16.mxu1 %v9599_v53  ;;  %v9663_v10 = vld [vmem:[#allocation10 + $0xbc8] ss:$16 sps:$4 sm:$0xff]   ;;  %v9668_v53 = vld [vmem:[#allocation10 + $0xbec] ss:$16 sps:$4 sm:$0xff]  }
 0x484   : > { %7058 = vmatprep.subr.bf16.mxu0 %v9602_v12  ;;  %v9666_v12 = vld [vmem:[#allocation10 + $0xbe8] ss:$16 sps:$4 sm:$0xff]  }
 0x486   : > { %7018 = vmatpush1.bf16.msra.mxu1 %v9597_v13 }
 0x487   : > { %7059 = vmatpush1.bf16.msra.mxu0 %v9600_v17  ;;  %7019 = vmatprep.subr.bf16.mxu1 %v9605_v18 }
 0x488   : > { %7060 = vmatprep.subr.bf16.mxu0 %v9608_v19 }
 0x48a   : > { %7020 = vmatpush1.bf16.msra.mxu1 %v9603_v20 }
 0x48b   : > { %7061 = vmatpush1.bf16.msra.mxu0 %v9606_v63  ;;  %7021 = vmatprep.subr.bf16.mxu1 %v9611_v38 }
 0x48c   : > { %7062 = vmatprep.subr.bf16.mxu0 %v9614_v21 }
 0x48e   : > { %7022 = vmatpush1.bf16.msra.mxu1 %v9609_v24 }
 0x48f   : > { %7063 = vmatpush1.bf16.msra.mxu0 %v9612_v9  ;;  %7023 = vmatprep.subr.bf16.mxu1 %v9617_v33 }
 0x490   : > { %7064 = vmatprep.subr.bf16.mxu0 %v9620_v11 }
 0x492   : > { %7024 = vmatpush1.bf16.msra.mxu1 %v9615_v16 }
 0x493   : > { %7065 = vmatpush1.bf16.msra.mxu0 %v9618_v3  ;;  %7075 = vmatprep.subr.bf16.mxu1 %v9623_v26 }
 0x495   : > { %7026 = vmatmul.mubr.bf16.vlgmr.msra.gmra.mrb[48].mxu1 %v6306_v41 }
 0x496   : > { %7067 = vmatmul.mubr.bf16.vlgmr.msra.gmra.mrb[52].mxu0 %v6304_v42  ;;  %7076 = vmatpush1.bf16.msra.mxu1 %v9621_v14  ;;  %v9636_v42 = vld [vmem:[#allocation10 + $0xaa8] ss:$16 sps:$4 sm:$0xff]  }
 0x497   : > { %7107 = vmatprep.mubr.bf16.mxu1 %v6307_v57  ;;  %7077 = vmatprep.subr.bf16.mxu1 %v9626_v30 }
 0x49a   : > { %7078 = vmatpush1.bf16.msra.mxu1 %v9624_v23 }
 0x49b   : > { %7079 = vmatprep.subr.bf16.mxu1 %v9629_v34 }
 0x49e   : > { %7080 = vmatpush1.bf16.msra.mxu1 %v9627_v46 }
 0x49f   : > { %7081 = vmatprep.subr.bf16.mxu1 %v9632_v49  ;;  %v7120_v49 = vld [vmem:[#allocation12] sm:$0xf] }
 0x4a2   : > { %7082 = vmatpush1.bf16.msra.mxu1 %v9630_v5 }
 0x4a3   : > { %7083 = vmatprep.subr.bf16.mxu1 %v9635_v58 }
 0x4a6   : > { %7084 = vmatpush1.bf16.msra.mxu1 %v9633_v59  ;;  %v7125_v59 = vrot.slane %v7120_v49, %v10172_v48 }
 0x4a7   : > { %7085 = vmatprep.subr.bf16.mxu1 %v9638_v15 }
 0x4a8   : > { %v5360_v29 = vpop.f32.mrb[36].mxu1  ;;  %v6045_v57 = vpop.f32.mrb[40].mxu0 }
 0x4a9   : > { %v5361_v36 = vadd.f32 %v5360_v29, %v10434_v45  ;;  %v6046_v61 = vadd.f32 %v6045_v57, %v10437_v50  ;;  %v5362_v39 = vpop.f32.mrb[37].mxu1  ;;  %v6047_v0 = vpop.f32.mrb[41].mxu0  ;;  %v9647_v45 = vld [vmem:[#allocation10 + $0xb0c] ss:$16 sps:$4 sm:$0xff]   ;;  %v9645_v50 = vld [vmem:[#allocation10 + $0xb08] ss:$16 sps:$4 sm:$0xff]   ;;  %v7129_v29 = vrot.slane %v7120_v49, %v10179_v51 }
 0x4aa   : > { %v5363_v40 = vadd.f32 %v5362_v39, %v10439_v55  ;;  %v6048_v37 = vadd.f32 %v6047_v0, %v10442_v56  ;;  %v5364_v43 = vpop.f32.mrb[38].mxu1  ;;  %v6049_v35 = vpop.f32.mrb[42].mxu0  ;;  %7086 = vmatpush1.bf16.msra.mxu1 %v9636_v42  ;;  %v9648_v55 = vld [vmem:[#allocation10 + $0xb28] ss:$16 sps:$4 sm:$0xff]   ;;  %v9653_v56 = vld [vmem:[#allocation10 + $0xb4c] ss:$16 sps:$4 sm:$0xff]  }
 0x4ab   : > { %v5365_v44 = vpop.f32.mrb[39].mxu1  ;;  %v6050_v62 = vpop.f32.mrb[43].mxu0  ;;  %7087 = vmatprep.subr.bf16.mxu1 %v9641_v60 }
 0x4ae   : > { %7088 = vmatpush1.bf16.msra.mxu1 %v9639_v31 }
 0x4af   : > { %7089 = vmatprep.subr.bf16.mxu1 %v9644_v47 }
 0x4b2   : > { %7090 = vmatpush1.bf16.msra.mxu1 %v9642_v1 }
 0x4b3   : > { %7091 = vmatprep.subr.bf16.mxu1 %v9647_v45  ;;  %v7133_v45 = vrot.slane %v7120_v49, %v10181_v52 }
 0x4b6   : > { %7092 = vmatpush1.bf16.msra.mxu1 %v9645_v50 }
 0x4b7   : > { %7093 = vmatprep.subr.bf16.mxu1 %v9650_v4 }
 0x4ba   : > { %7094 = vmatpush1.bf16.msra.mxu1 %v9648_v55  ;;  %v7137_v55 = vrot.slane %v7120_v49, %v10183_v54 }
 0x4bb   : > { %7095 = vmatprep.subr.bf16.mxu1 %v9653_v56 }
 0x4be   : > { %7096 = vmatpush1.bf16.msra.mxu1 %v9651_v6 }
 0x4bf   : > { %7097 = vmatprep.subr.bf16.mxu1 %v9656_v25 }
 0x4c2   : > { %7098 = vmatpush1.bf16.msra.mxu1 %v9654_v7 }
 0x4c3   : > { %7099 = vmatprep.subr.bf16.mxu1 %v9659_v2 }
 0x4c6   : > { %7100 = vmatpush1.bf16.msra.mxu1 %v9657_v8 }
 0x4c7   : > { %7101 = vmatprep.subr.bf16.mxu1 %v9662_v27 }
 0x4ca   : > { %7102 = vmatpush1.bf16.msra.mxu1 %v9660_v28 }
 0x4cb   : > { %7103 = vmatprep.subr.bf16.mxu1 %v9665_v32 }
 0x4ce   : > { %7104 = vmatpush1.bf16.msra.mxu1 %v9663_v10 }
 0x4cf   : > { %7105 = vmatprep.subr.bf16.mxu1 %v9668_v53 }
 0x4d2   : > { %7106 = vmatpush1.bf16.msra.mxu1 %v9666_v12 }
 0x4d5   : > { %7108 = vmatmul.mubr.bf16.vlgmr.msra.gmra.mrb[52].mxu1 %v6306_v41 }
 0x4e8   : > { %v6086_v13 = vpop.f32.mrb[40].mxu1 }
 0x4e9   : > { %v6087_v17 = vadd.f32 %v6086_v13, %v6046_v61  ;;  %v6127_v18 = vpop.f32.mrb[44].mxu0  ;;  %v6088_v19 = vpop.f32.mrb[41].mxu1 }
 0x4ea   : > { %v6128_v20 = vadd.f32 %v6127_v18, %v5361_v36  ;;  %v6089_v63 = vadd.f32 %v6088_v19, %v6048_v37  ;;  %v6129_v38 = vpop.f32.mrb[45].mxu0  ;;  %v6090_v21 = vpop.f32.mrb[42].mxu1 }
 0x4eb   : > { %v6130_v24 = vadd.f32 %v6129_v38, %v5363_v40  ;;  %v6131_v9 = vpop.f32.mrb[46].mxu0  ;;  %v6091_v33 = vpop.f32.mrb[43].mxu1 }
 0x4ec   : > { %v6132_v11 = vpop.f32.mrb[47].mxu0 }
 0x528   : > { %v6168_v16 = vpop.f32.mrb[44].mxu1 }
 0x529   : > { %v6169_v3 = vadd.f32 %v6168_v16, %v6128_v20  ;;  %v6986_v26 = vpop.f32.mrb[48].mxu0  ;;  %v6170_v14 = vpop.f32.mrb[45].mxu1 }
 0x52a   : > { %v6171_v30 = vadd.f32 %v6170_v14, %v6130_v24  ;;  %v6988_v23 = vpop.f32.mrb[49].mxu0  ;;  %v6172_v22 = vpop.f32.mrb[46].mxu1 }
 0x52b   : > { %v6990_v41 = vpop.f32.mrb[50].mxu0  ;;  %v6173_v34 = vpop.f32.mrb[47].mxu1 }
 0x52c   : > { %v6991_v46 = vpop.f32.mrb[51].mxu0 }
 0x568   : > { %v7027_v5 = vpop.f32.mrb[48].mxu1 }
 0x569   : > { %v7028_v58 = vadd.f32 %v7027_v5, %v6986_v26  ;;  %v7068_v15 = vpop.f32.mrb[52].mxu0  ;;  %v7029_v42 = vpop.f32.mrb[49].mxu1 }
 0x56a   : > { %v7030_v60 = vadd.f32 %v7029_v42, %v6988_v23  ;;  %v7070_v57 = vpop.f32.mrb[53].mxu0  ;;  %v7031_v36 = vpop.f32.mrb[50].mxu1 }
 0x56b   : > { %v7116_v61 = vadd.f32 %v7028_v58, %v6087_v17  ;;  %v7072_v39 = vpop.f32.mrb[54].mxu0  ;;  %v7032_v0 = vpop.f32.mrb[51].mxu1 }
 0x56c   : > { %v7117_v40 = vadd.f32 %v7030_v60, %v6089_v63  ;;  %v7073_v37 = vpop.f32.mrb[55].mxu0 }
 0x56d   : > { %v7142_v43 = vadd.f32 %v7125_v59, %v7116_v61 }
 0x56e   : > { %v7143_v35 = vadd.f32 %v7129_v29, %v7117_v40 }
 0x56f   : > { %vm7146_vm9 = vcmp.gt.f32.partialorder %v7142_v43, 0.0  ;;  %v7150_v31 = vmul.f32 0.2, %v7142_v43 }
 0x570   : > { %vm7147_vm10 = vcmp.gt.f32.partialorder %v7143_v35, 0.0  ;;  %v7151_v48 = vmul.f32 0.2, %v7143_v35 }
 0x571   : > { %v7154_v44 = vsel %vm7146_vm9, %v7142_v43, %v7150_v31 }
 0x572   : > { %v7155_v62 = vsel %vm7147_vm10, %v7143_v35, %v7151_v48 }
 0x573   : > { %v7162_v47 = vcombine.low %v7154_v44, %v7155_v62 }
 0x575   : > { %7166 = vst [vmem:[%s294_s16] sm:$0xff] %v7162_v47 }
 0x5a8   : > { %v7109_v51 = vpop.f32.mrb[52].mxu1 }
 0x5a9   : > { %v7110_v1 = vadd.f32 %v7109_v51, %v7068_v15  ;;  %v7111_v50 = vpop.f32.mrb[53].mxu1 }
 0x5aa   : > { %v7112_v4 = vadd.f32 %v7111_v50, %v7070_v57  ;;  %v7113_v56 = vpop.f32.mrb[54].mxu1 }
 0x5ab   : > { %v7118_v6 = vadd.f32 %v7110_v1, %v6169_v3  ;;  %v7114_v25 = vpop.f32.mrb[55].mxu1 }
 0x5ac   : > { %v7119_v7 = vadd.f32 %v7112_v4, %v6171_v30 }
 0x5ad   : > { %v7144_v2 = vadd.f32 %v7133_v45, %v7118_v6 }
 0x5ae   : > { %v7145_v8 = vadd.f32 %v7137_v55, %v7119_v7 }
 0x5af   : > { %vm7148_vm11 = vcmp.gt.f32.partialorder %v7144_v2, 0.0  ;;  %v7152_v27 = vmul.f32 0.2, %v7144_v2 }
 0x5b0   : > { %vm7149_vm12 = vcmp.gt.f32.partialorder %v7145_v8, 0.0  ;;  %v7153_v28 = vmul.f32 0.2, %v7145_v8 }
 0x5b1   : > { %v7156_v32 = vsel %vm7148_vm11, %v7144_v2, %v7152_v27 }
 0x5b2   : > { %v7157_v52 = vsel %vm7149_vm12, %v7145_v8, %v7153_v28 }
 0x5b3   : > { %v7163_v10 = vcombine.low %v7156_v32, %v7157_v52 }
 0x5b5   : > { %7167 = vst [vmem:[%s294_s16 + $0x8] sm:$0xff] %v7163_v10 }
 0x5b6   : > { %9824 = shalt.err (!%p9821_p0)
}
 0x5b7   : > { %s9825_s22 = scalar_lea.hbm %s10466_s15, 256  ;;  %s9829_s7 = scalar_lea.hbm %s10515_s5, 512 }
 0x5b8   : > { %p9826_p2 = scmp.ne.s32.totalorder %s10466_s15, %s9825_s22  ;;  %p9830_p10 = scmp.lt.u32.totalorder %s10466_s15, %s10515_s5 }
 0x5b9   : > { %p9831_p11 = scmp.lt.u32.totalorder %s9829_s7, %s9825_s22  ;;  %p9833_p6 = scmp.lt.u32.totalorder %s9825_s22, %s10466_s15 }
 0x5ba   : > { %p9827_p8 = pnand %p9826_p2, %p10545_p5 }
 0x5bb   : > { %p9832_p1 = por %p9831_p11, %p9830_p10 }
 0x5bc   : > { %p9828_p4 = pneg %p9827_p8 }
 0x5bd   : > { %p9834_p7 = por %p9833_p6, %p9832_p1 }
 0x5bf   : > { %p9835_p9 = pnand %p9834_p7, %p9828_p4 }
 0x5c1   : > { %9838 = shalt.err (!%p9835_p9)
}
 0x5c2   : > { %8245 = dma.vmem_to_hbm [thread:$0]  (%p10545_p5), %s10468_s30, 256, %s10466_s15, %s7169_s12  }
 0x5c3 PF: > { %s7195_s16 = sand.u32 1, %s9873_s18   ;;  %p10546_p12 = scmp.ne.s32.totalorder %s10526_s10, 0 }
 0x5c4   : > { %p10547_p3 = scmp.ge.s32.totalorder %s9885_s21, 2  ;;  %s7196_s17 = scalar_lea.sflag [#allocation6], %s7195_s16 }
 0x5c6   : > { %p8265_p13 = pnand %p10547_p3, %p10546_p12 }
 0x5c8   : > { %9868 = dma.done.wait (!%p8265_p13), %s7196_s17, 256  }
 0x5c9   : > { %9870 = vsyncadd (!%p8265_p13), %s7196_s17, 4294967040  ;;  %p20_p0 = scmp.ge.s32.totalorder %s10066_s28, 4   ;;  %s10548_s18 = smov %s9877_s19 }
 0x5ca   : > { %s10549_s19 = smov %s9881_s20  ;;  %s10550_s20 = smov %s10077_s27 }
 0x5cb   : > { %s10551_s21 = smov %s10066_s28  ;;  %22 = sbr.rel (!%p20_p0) target bundleno = 7 (0x7), region = 106 }
 0x5d2   :  { %7201 = vsyncpa [#allocation5], 1 }
 0x5d3   :  { %7203 = vsyncpa [#allocation5 + $0x1], 1 }
 0x5d4   :  { %7204 = vsyncpa [#allocation8], 1 }
 0x5d5   :  { %7205 = vsyncpa [#allocation11], 1 }
 0x5d6   :  { %7206 = vsyncpa [#allocation6], 1 }
 0x5d7   :  { %7208 = vsyncpa [#allocation6 + $0x1], 1 }

</bundles_post_ra>
